<compile_context>
chip_gen: v7x
topology: tpu7x:2x2x1
jax: 0.10.0
libtpu: 0.0.40
codegen_flags: <defaults>
</compile_context>

<pallas_src>
import math

import jax
import jax.numpy as jnp
import numpy as np
from jax.experimental import pallas as pl
from jax.experimental.pallas import tpu as pltpu

# ---------------- configuration -----------------------------------------------
D = 8                           # xyz-encoder depth
W = 64                          # hidden width (torch default 256; small test)
HALF = W // 2                   # dir_encoding width
FREQS_XYZ = 10                  # positional-encoding frequencies
SKIPS = (4,)                    # skip connection at layer 4
IN_XYZ = 3 + 3 * FREQS_XYZ * 2  # 63 embedded xyz channels
LANES = 128                     # packed lane width: [hidden (W) | embedding | 1]
ONE_LANE = LANES - 1            # constant-1 lane (bias lane)
assert W + IN_XYZ < LANES       # embedding fits and lane 127 stays free

OUT_LANES = 8                   # narrow output: rgb lanes 0..2, sigma lane 3
N_MATS = D + 3                  # xyz layers + [final|sigma] + dir + rgb
NEG = -3.0e38                   # "pass-through" floor for non-ReLU lanes

B = 256                         # batch of points
TB = 128                        # batch tile per grid step (keep n//TB even for v7x)


# ---------------- the Pallas kernel: the whole forward pass --------------------
def nerf_kernel(x_ref, emb_ref, w_ref, out_ref):
    """x_ref: (TB, 3) raw xyz.
    emb_ref: (4, 128) f32 -- rows 0..2 per-lane frequency scales, row 3 per-lane
    phase (pi/2 on the cos lanes and on the constant-1 bias lane 127).
    w_ref: (D+3, 128, 128) bf16 packed weights; every layer's bias is folded
    into row 127 (multiplied by the carried constant-1 lane).
    out_ref: (TB, 8) f32: rgb in lanes 0..2, sigma in lane 3."""
    lane = jax.lax.broadcasted_iota(jnp.int32, (1, LANES), 1)
    x = x_ref[...]                                       # (TB, 3) f32
    emb = emb_ref[...]                                   # (4, 128) f32

    # --- positional embedding, all f32 (bf16 would wreck high-frequency args) --
    # t[:, W+p] = 2^k * x[:, c]  (+ pi/2 on "cos" lanes); cos(a) = sin(a + pi/2)
    # lane 127 gets t = pi/2 -> sin = 1.0 : the constant-1 bias lane.
    t = (x[:, 0:1] * emb[0:1, :]
         + x[:, 1:2] * emb[1:2, :]
         + x[:, 2:3] * emb[2:3, :]
         + emb[3:4, :])                                  # (TB, 128)
    is_raw = jnp.logical_and(lane >= W, lane < W + 3)    # identity lanes (x, y, z)
    z = jnp.where(is_raw, t, jnp.sin(t)).astype(jnp.bfloat16)
    # z: lanes [0,W) hidden (=0), [W,127) embedded xyz, 127 = 1.0

    # ReLU-on-hidden-lanes as a single vmax against a per-lane floor (hoisted).
    floor_hidden = jnp.where(lane < W, 0.0, NEG).astype(jnp.float32)
    floor_dir = jnp.where(lane < HALF, 0.0, NEG).astype(jnp.float32)

    # --- D xyz-encoding layers: embedding + constant-1 carried by identity block
    for i in range(D):
        acc = jnp.dot(z, w_ref[i], preferred_element_type=jnp.float32)
        z = jnp.maximum(acc, floor_hidden).astype(jnp.bfloat16)

    # --- fused xyz_encoding_final (lanes [0,W)) + sigma (lane W); no activation -
    sf = jnp.dot(z, w_ref[D], preferred_element_type=jnp.float32).astype(jnp.bfloat16)

    # --- dir_encoding: ReLU on lanes [0,HALF); sigma rides along to lane HALF ---
    acc = jnp.dot(sf, w_ref[D + 1], preferred_element_type=jnp.float32)
    d = jnp.maximum(acc, floor_dir).astype(jnp.bfloat16)

    # --- rgb head: sigmoid via EUP exp + approx reciprocal; sigma rides to lane 3
    acc = jnp.dot(d, w_ref[D + 2], preferred_element_type=jnp.float32)
    sig = pl.reciprocal(1.0 + jnp.exp(-acc), approx=True)
    full = jnp.where(lane < 3, sig, acc)
    out_ref[...] = full[:, 0:OUT_LANES]


# ---------------- wrapper -------------------------------------------------------
def nerf_forward(xyz, emb_scale, w_stack):
    n = xyz.shape[0]
    assert n % TB == 0
    cost = pl.CostEstimate(
        flops=2 * N_MATS * LANES * LANES * n,
        transcendentals=3 * LANES * n,  # sin + exp + reciprocal on full vregs
        bytes_accessed=(n * 3 * 4 + n * OUT_LANES * 4
                        + N_MATS * LANES * LANES * 2 + 4 * LANES * 4),
    )
    out = pl.pallas_call(
        nerf_kernel,
        grid=(n // TB,),
        in_specs=[
            pl.BlockSpec((TB, 3), lambda i: (i, 0)),
            # Constant index_map -> embedding table / weight stack stay
            # VMEM-resident across grid steps. (pl.Buffered(1) could drop the
            # redundant second pipeline buffer; default kept for portability --
            # ~360 KB is a non-issue at this size.)
            pl.BlockSpec((4, LANES), lambda i: (0, 0)),
            pl.BlockSpec((N_MATS, LANES, LANES), lambda i: (0, 0, 0)),
        ],
        out_specs=pl.BlockSpec((TB, OUT_LANES), lambda i: (i, 0)),
        out_shape=jax.ShapeDtypeStruct((n, OUT_LANES), jnp.float32),
        compiler_params=pltpu.CompilerParams(dimension_semantics=("parallel",)),
        cost_estimate=cost,
    )(xyz, emb_scale, w_stack)
    return out[:, 0:3], out[:, 3:4]          # rgb, sigma


# ---------------- deterministic parameters (torch nn.Linear default init) -------
def init_raw_params(key):
    keys = jax.random.split(key, D + 4)

    def linear(k, fan_in, fan_out):
        k1, k2 = jax.random.split(k)
        bound = 1.0 / math.sqrt(fan_in)
        w = jax.random.uniform(k1, (fan_in, fan_out), jnp.float32, -bound, bound)
        b = jax.random.uniform(k2, (fan_out,), jnp.float32, -bound, bound)
        return w, b

    raw = {}
    for i in range(D):
        fan_in = IN_XYZ if i == 0 else (IN_XYZ + W if i in SKIPS else W)
        raw[f"xyz_{i}"] = linear(keys[i], fan_in, W)
    raw["sigma"] = linear(keys[D], W, 1)
    raw["final"] = linear(keys[D + 1], W, W)
    raw["dir"] = linear(keys[D + 2], W, HALF)      # in_channels_dir == 0
    raw["rgb"] = linear(keys[D + 3], HALF, 3)
    return raw


def pack_params(raw):
    """Pack all layers into one bf16 weight stack (biases folded into row 127)
    plus one small f32 embedding table (scales + phases)."""
    ws = np.zeros((N_MATS, LANES, LANES), np.float32)
    emb = np.zeros((4, LANES), np.float32)         # rows 0..2 scales, row 3 phase

    # embedding layout at lanes W..W+62: [x, sin(2^k x), cos(2^k x), ...]
    for c in range(3):
        emb[c, W + c] = 1.0                        # identity lanes (raw x, y, z)
    p = 3
    for k in range(FREQS_XYZ):
        for fn in range(2):                        # 0: sin, 1: cos = sin(.+pi/2)
            for c in range(3):
                emb[c, W + p] = float(2 ** k)
                if fn == 1:
                    emb[3, W + p] = np.pi / 2.0
                p += 1
    emb[3, ONE_LANE] = np.pi / 2.0                 # constant-1 lane: sin(pi/2)=1

    eye = np.eye(LANES - W, dtype=np.float32)      # carries embedding + lane 127
    for i in range(D):
        w, b = map(np.asarray, raw[f"xyz_{i}"])
        if i == 0:
            ws[i, W:W + IN_XYZ, :W] = w            # embedding -> hidden
        elif i in SKIPS:
            ws[i, W:W + IN_XYZ, :W] = w[:IN_XYZ]   # torch cat([emb, h]): emb rows
            ws[i, :W, :W] = w[IN_XYZ:]             # hidden rows
        else:
            ws[i, :W, :W] = w
        ws[i, W:, W:] = eye                        # carry embedding + const-1 lane
        ws[i, ONE_LANE, :W] = b                    # bias folded into const-1 row

    wf, bf = map(np.asarray, raw["final"])         # fused [xyz_encoding_final | sigma]
    wsg, bsg = map(np.asarray, raw["sigma"])
    ws[D, :W, :W] = wf
    ws[D, :W, W:W + 1] = wsg
    ws[D, ONE_LANE, :W] = bf
    ws[D, ONE_LANE, W] = bsg[0]
    ws[D, ONE_LANE, ONE_LANE] = 1.0                # keep const-1 lane alive

    wd, bd = map(np.asarray, raw["dir"])
    ws[D + 1, :W, :HALF] = wd
    ws[D + 1, W, HALF] = 1.0                       # sigma pass-through lane W -> HALF
    ws[D + 1, ONE_LANE, :HALF] = bd
    ws[D + 1, ONE_LANE, ONE_LANE] = 1.0            # keep const-1 lane alive

    wr, br = map(np.asarray, raw["rgb"])
    ws[D + 2, :HALF, :3] = wr
    ws[D + 2, HALF, 3] = 1.0                       # sigma pass-through lane HALF -> 3
    ws[D + 2, ONE_LANE, :3] = br

    return jnp.asarray(emb), jnp.asarray(ws, dtype=jnp.bfloat16)


# ---------------- pure-JAX reference (mirrors the PyTorch forward exactly) ------
def embed_xyz(xyz):
    outs = [xyz]
    for k in range(FREQS_XYZ):
        f = float(2.0 ** k)
        outs.append(jnp.sin(f * xyz))
        outs.append(jnp.cos(f * xyz))
    return jnp.concatenate(outs, axis=-1)          # (B, 63)


def nerf_ref(xyz, raw):
    emb = embed_xyz(xyz)
    h = emb
    for i in range(D):
        w, b = raw[f"xyz_{i}"]
        if i in SKIPS:
            h = jnp.concatenate([emb, h], -1)
        h = jnp.maximum(h @ w + b, 0.0)
    ws_, bs_ = raw["sigma"]; sigma = h @ ws_ + bs_
    wf, bf = raw["final"]; final = h @ wf + bf
    wd, bd = raw["dir"];  d = jnp.maximum(final @ wd + bd, 0.0)
    wr, br = raw["rgb"];  rgb = jax.nn.sigmoid(d @ wr + br)
    return rgb, sigma


# TODO(synk): get_normal() relies on torch.autograd.grad through the density;
# it is not part of forward() and is not reproduced here.

if __name__ == "__main__":
    key = jax.random.PRNGKey(0)
    k_x, k_p = jax.random.split(key)
    xyz = jax.random.uniform(k_x, (B, 3), jnp.float32, -1.0, 1.0)
    raw = init_raw_params(k_p)
    emb_scale, w_stack = pack_params(raw)

    rgb, sigma = nerf_forward(xyz, emb_scale, w_stack)
    rgb = jax.block_until_ready(rgb)
    sigma = jax.block_until_ready(sigma)

    rgb_r, sigma_r = nerf_ref(xyz, raw)
    assert rgb.shape == (B, 3) and sigma.shape == (B, 1)
    # bf16 weights/biases/activations with f32 accumulation -> loosened tolerances
    assert float(jnp.max(jnp.abs(rgb - rgb_r))) < 2e-2, "rgb mismatch"
    assert float(jnp.max(jnp.abs(sigma - sigma_r))) < 5e-2, "sigma mismatch"
    print("KERNEL_OK")
</pallas_src>

<mosaic_0001>
module attributes {stable_mosaic.version = 11 : i64} {
  func.func @nerf_kernel(%arg0: i32, %arg1: memref<128x3xf32, #tpu.memory_space<vmem>>, %arg2: memref<4x128xf32, #tpu.memory_space<vmem>>, %arg3: memref<11x128x128xbf16, #tpu.memory_space<vmem>>, %arg4: memref<128x8xf32, #tpu.memory_space<vmem>>) attributes {dimension_semantics = [#tpu.dimension_semantics<parallel>], iteration_bounds = array<i64: 2>, scalar_prefetch = 0 : i64, scratch_operands = 0 : i64, tpu.core_type = #tpu.core_type<tc>, window_params = [{transform_indices = @transform_0, window_bounds = array<i64: 128, 3>}, {pipeline_mode = #tpu.pipeline_mode<synchronous>, transform_indices = @transform_1, window_bounds = array<i64: 4, 128>}, {pipeline_mode = #tpu.pipeline_mode<synchronous>, transform_indices = @transform_2, window_bounds = array<i64: 11, 128, 128>}, {transform_indices = @transform_3, window_bounds = array<i64: 128, 8>}]} {
    %0 = tpu.iota {dimensions = array<i32: 1>} : vector<1x128xi32>
    %c0 = arith.constant 0 : index
    %c0_0 = arith.constant 0 : index
    %1 = vector.load %arg1[%c0, %c0_0] : memref<128x3xf32, #tpu.memory_space<vmem>>, vector<128x3xf32>
    %c0_1 = arith.constant 0 : index
    %c0_2 = arith.constant 0 : index
    %2 = vector.load %arg2[%c0_1, %c0_2] : memref<4x128xf32, #tpu.memory_space<vmem>>, vector<4x128xf32>
    %3 = vector.extract_strided_slice %1 {offsets = [0, 0], sizes = [128, 1], strides = [1, 1]} : vector<128x3xf32> to vector<128x1xf32>
    %4 = vector.extract_strided_slice %2 {offsets = [0, 0], sizes = [1, 128], strides = [1, 1]} : vector<4x128xf32> to vector<1x128xf32>
    %5 = vector.broadcast %3 : vector<128x1xf32> to vector<128x128xf32>
    %6 = vector.broadcast %4 : vector<1x128xf32> to vector<128x128xf32>
    %7 = arith.mulf %5, %6 : vector<128x128xf32>
    %8 = vector.extract_strided_slice %1 {offsets = [0, 1], sizes = [128, 1], strides = [1, 1]} : vector<128x3xf32> to vector<128x1xf32>
    %9 = vector.extract_strided_slice %2 {offsets = [1, 0], sizes = [1, 128], strides = [1, 1]} : vector<4x128xf32> to vector<1x128xf32>
    %10 = vector.broadcast %8 : vector<128x1xf32> to vector<128x128xf32>
    %11 = vector.broadcast %9 : vector<1x128xf32> to vector<128x128xf32>
    %12 = arith.mulf %10, %11 : vector<128x128xf32>
    %13 = arith.addf %7, %12 : vector<128x128xf32>
    %14 = vector.extract_strided_slice %1 {offsets = [0, 2], sizes = [128, 1], strides = [1, 1]} : vector<128x3xf32> to vector<128x1xf32>
    %15 = vector.extract_strided_slice %2 {offsets = [2, 0], sizes = [1, 128], strides = [1, 1]} : vector<4x128xf32> to vector<1x128xf32>
    %16 = vector.broadcast %14 : vector<128x1xf32> to vector<128x128xf32>
    %17 = vector.broadcast %15 : vector<1x128xf32> to vector<128x128xf32>
    %18 = arith.mulf %16, %17 : vector<128x128xf32>
    %19 = arith.addf %13, %18 : vector<128x128xf32>
    %20 = vector.extract_strided_slice %2 {offsets = [3, 0], sizes = [1, 128], strides = [1, 1]} : vector<4x128xf32> to vector<1x128xf32>
    %21 = vector.broadcast %20 : vector<1x128xf32> to vector<128x128xf32>
    %22 = arith.addf %19, %21 : vector<128x128xf32>
    %c64_i32 = arith.constant 64 : i32
    %23 = vector.broadcast %c64_i32 : i32 to vector<1x128xi32>
    %24 = arith.cmpi sge, %0, %23 : vector<1x128xi32>
    %c67_i32 = arith.constant 67 : i32
    %25 = vector.broadcast %c67_i32 : i32 to vector<1x128xi32>
    %26 = arith.cmpi slt, %0, %25 : vector<1x128xi32>
    %27 = arith.andi %24, %26 : vector<1x128xi1>
    %28 = math.sin %22 : vector<128x128xf32>
    %29 = vector.shape_cast %27 : vector<1x128xi1> to vector<1x128xi1>
    %30 = vector.broadcast %29 : vector<1x128xi1> to vector<128x128xi1>
    %31 = arith.select %30, %22, %28 : vector<128x128xi1>, vector<128x128xf32>
    %32 = arith.truncf %31 : vector<128x128xf32> to vector<128x128xbf16>
    %c64_i32_3 = arith.constant 64 : i32
    %33 = vector.broadcast %c64_i32_3 : i32 to vector<1x128xi32>
    %34 = arith.cmpi slt, %0, %33 : vector<1x128xi32>
    %cst = arith.constant 0.000000e+00 : f32
    %cst_4 = arith.constant -3.000000e+38 : f32
    %35 = vector.broadcast %cst : f32 to vector<1x128xf32>
    %36 = vector.broadcast %cst_4 : f32 to vector<1x128xf32>
    %37 = arith.select %34, %35, %36 : vector<1x128xi1>, vector<1x128xf32>
    %c32_i32 = arith.constant 32 : i32
    %38 = vector.broadcast %c32_i32 : i32 to vector<1x128xi32>
    %39 = arith.cmpi slt, %0, %38 : vector<1x128xi32>
    %cst_5 = arith.constant 0.000000e+00 : f32
    %cst_6 = arith.constant -3.000000e+38 : f32
    %40 = vector.broadcast %cst_5 : f32 to vector<1x128xf32>
    %41 = vector.broadcast %cst_6 : f32 to vector<1x128xf32>
    %42 = arith.select %39, %40, %41 : vector<1x128xi1>, vector<1x128xf32>
    %c0_7 = arith.constant 0 : index
    %c0_8 = arith.constant 0 : index
    %c0_9 = arith.constant 0 : index
    %43 = vector.load %arg3[%c0_7, %c0_8, %c0_9] : memref<11x128x128xbf16, #tpu.memory_space<vmem>>, vector<1x128x128xbf16>
    %44 = vector.shape_cast %43 : vector<1x128x128xbf16> to vector<128x128xbf16>
    %cst_10 = arith.constant dense<0.000000e+00> : vector<128x128xf32>
    %45 = tpu.matmul %32, %44, %cst_10 {dimension_numbers = #tpu.dot_dimension_numbers<[1], [0], [0], [1], [0, 0, 1, 1], [], []>} : vector<128x128xbf16>, vector<128x128xbf16>, vector<128x128xf32> -> vector<128x128xf32>
    %46 = vector.broadcast %37 : vector<1x128xf32> to vector<128x128xf32>
    %47 = arith.maximumf %45, %46 : vector<128x128xf32>
    %48 = arith.truncf %47 : vector<128x128xf32> to vector<128x128xbf16>
    %c1 = arith.constant 1 : index
    %c0_11 = arith.constant 0 : index
    %c0_12 = arith.constant 0 : index
    %49 = vector.load %arg3[%c1, %c0_11, %c0_12] : memref<11x128x128xbf16, #tpu.memory_space<vmem>>, vector<1x128x128xbf16>
    %50 = vector.shape_cast %49 : vector<1x128x128xbf16> to vector<128x128xbf16>
    %cst_13 = arith.constant dense<0.000000e+00> : vector<128x128xf32>
    %51 = tpu.matmul %48, %50, %cst_13 {dimension_numbers = #tpu.dot_dimension_numbers<[1], [0], [0], [1], [0, 0, 1, 1], [], []>} : vector<128x128xbf16>, vector<128x128xbf16>, vector<128x128xf32> -> vector<128x128xf32>
    %52 = vector.broadcast %37 : vector<1x128xf32> to vector<128x128xf32>
    %53 = arith.maximumf %51, %52 : vector<128x128xf32>
    %54 = arith.truncf %53 : vector<128x128xf32> to vector<128x128xbf16>
    %c2 = arith.constant 2 : index
    %c0_14 = arith.constant 0 : index
    %c0_15 = arith.constant 0 : index
    %55 = vector.load %arg3[%c2, %c0_14, %c0_15] : memref<11x128x128xbf16, #tpu.memory_space<vmem>>, vector<1x128x128xbf16>
    %56 = vector.shape_cast %55 : vector<1x128x128xbf16> to vector<128x128xbf16>
    %cst_16 = arith.constant dense<0.000000e+00> : vector<128x128xf32>
    %57 = tpu.matmul %54, %56, %cst_16 {dimension_numbers = #tpu.dot_dimension_numbers<[1], [0], [0], [1], [0, 0, 1, 1], [], []>} : vector<128x128xbf16>, vector<128x128xbf16>, vector<128x128xf32> -> vector<128x128xf32>
    %58 = vector.broadcast %37 : vector<1x128xf32> to vector<128x128xf32>
    %59 = arith.maximumf %57, %58 : vector<128x128xf32>
    %60 = arith.truncf %59 : vector<128x128xf32> to vector<128x128xbf16>
    %c3 = arith.constant 3 : index
    %c0_17 = arith.constant 0 : index
    %c0_18 = arith.constant 0 : index
    %61 = vector.load %arg3[%c3, %c0_17, %c0_18] : memref<11x128x128xbf16, #tpu.memory_space<vmem>>, vector<1x128x128xbf16>
    %62 = vector.shape_cast %61 : vector<1x128x128xbf16> to vector<128x128xbf16>
    %cst_19 = arith.constant dense<0.000000e+00> : vector<128x128xf32>
    %63 = tpu.matmul %60, %62, %cst_19 {dimension_numbers = #tpu.dot_dimension_numbers<[1], [0], [0], [1], [0, 0, 1, 1], [], []>} : vector<128x128xbf16>, vector<128x128xbf16>, vector<128x128xf32> -> vector<128x128xf32>
    %64 = vector.broadcast %37 : vector<1x128xf32> to vector<128x128xf32>
    %65 = arith.maximumf %63, %64 : vector<128x128xf32>
    %66 = arith.truncf %65 : vector<128x128xf32> to vector<128x128xbf16>
    %c4 = arith.constant 4 : index
    %c0_20 = arith.constant 0 : index
    %c0_21 = arith.constant 0 : index
    %67 = vector.load %arg3[%c4, %c0_20, %c0_21] : memref<11x128x128xbf16, #tpu.memory_space<vmem>>, vector<1x128x128xbf16>
    %68 = vector.shape_cast %67 : vector<1x128x128xbf16> to vector<128x128xbf16>
    %cst_22 = arith.constant dense<0.000000e+00> : vector<128x128xf32>
    %69 = tpu.matmul %66, %68, %cst_22 {dimension_numbers = #tpu.dot_dimension_numbers<[1], [0], [0], [1], [0, 0, 1, 1], [], []>} : vector<128x128xbf16>, vector<128x128xbf16>, vector<128x128xf32> -> vector<128x128xf32>
    %70 = vector.broadcast %37 : vector<1x128xf32> to vector<128x128xf32>
    %71 = arith.maximumf %69, %70 : vector<128x128xf32>
    %72 = arith.truncf %71 : vector<128x128xf32> to vector<128x128xbf16>
    %c5 = arith.constant 5 : index
    %c0_23 = arith.constant 0 : index
    %c0_24 = arith.constant 0 : index
    %73 = vector.load %arg3[%c5, %c0_23, %c0_24] : memref<11x128x128xbf16, #tpu.memory_space<vmem>>, vector<1x128x128xbf16>
    %74 = vector.shape_cast %73 : vector<1x128x128xbf16> to vector<128x128xbf16>
    %cst_25 = arith.constant dense<0.000000e+00> : vector<128x128xf32>
    %75 = tpu.matmul %72, %74, %cst_25 {dimension_numbers = #tpu.dot_dimension_numbers<[1], [0], [0], [1], [0, 0, 1, 1], [], []>} : vector<128x128xbf16>, vector<128x128xbf16>, vector<128x128xf32> -> vector<128x128xf32>
    %76 = vector.broadcast %37 : vector<1x128xf32> to vector<128x128xf32>
    %77 = arith.maximumf %75, %76 : vector<128x128xf32>
    %78 = arith.truncf %77 : vector<128x128xf32> to vector<128x128xbf16>
    %c6 = arith.constant 6 : index
    %c0_26 = arith.constant 0 : index
    %c0_27 = arith.constant 0 : index
    %79 = vector.load %arg3[%c6, %c0_26, %c0_27] : memref<11x128x128xbf16, #tpu.memory_space<vmem>>, vector<1x128x128xbf16>
    %80 = vector.shape_cast %79 : vector<1x128x128xbf16> to vector<128x128xbf16>
    %cst_28 = arith.constant dense<0.000000e+00> : vector<128x128xf32>
    %81 = tpu.matmul %78, %80, %cst_28 {dimension_numbers = #tpu.dot_dimension_numbers<[1], [0], [0], [1], [0, 0, 1, 1], [], []>} : vector<128x128xbf16>, vector<128x128xbf16>, vector<128x128xf32> -> vector<128x128xf32>
    %82 = vector.broadcast %37 : vector<1x128xf32> to vector<128x128xf32>
    %83 = arith.maximumf %81, %82 : vector<128x128xf32>
    %84 = arith.truncf %83 : vector<128x128xf32> to vector<128x128xbf16>
    %c7 = arith.constant 7 : index
    %c0_29 = arith.constant 0 : index
    %c0_30 = arith.constant 0 : index
    %85 = vector.load %arg3[%c7, %c0_29, %c0_30] : memref<11x128x128xbf16, #tpu.memory_space<vmem>>, vector<1x128x128xbf16>
    %86 = vector.shape_cast %85 : vector<1x128x128xbf16> to vector<128x128xbf16>
    %cst_31 = arith.constant dense<0.000000e+00> : vector<128x128xf32>
    %87 = tpu.matmul %84, %86, %cst_31 {dimension_numbers = #tpu.dot_dimension_numbers<[1], [0], [0], [1], [0, 0, 1, 1], [], []>} : vector<128x128xbf16>, vector<128x128xbf16>, vector<128x128xf32> -> vector<128x128xf32>
    %88 = vector.broadcast %37 : vector<1x128xf32> to vector<128x128xf32>
    %89 = arith.maximumf %87, %88 : vector<128x128xf32>
    %90 = arith.truncf %89 : vector<128x128xf32> to vector<128x128xbf16>
    %c8 = arith.constant 8 : index
    %c0_32 = arith.constant 0 : index
    %c0_33 = arith.constant 0 : index
    %91 = vector.load %arg3[%c8, %c0_32, %c0_33] : memref<11x128x128xbf16, #tpu.memory_space<vmem>>, vector<1x128x128xbf16>
    %92 = vector.shape_cast %91 : vector<1x128x128xbf16> to vector<128x128xbf16>
    %cst_34 = arith.constant dense<0.000000e+00> : vector<128x128xf32>
    %93 = tpu.matmul %90, %92, %cst_34 {dimension_numbers = #tpu.dot_dimension_numbers<[1], [0], [0], [1], [0, 0, 1, 1], [], []>} : vector<128x128xbf16>, vector<128x128xbf16>, vector<128x128xf32> -> vector<128x128xf32>
    %94 = arith.truncf %93 : vector<128x128xf32> to vector<128x128xbf16>
    %c9 = arith.constant 9 : index
    %c0_35 = arith.constant 0 : index
    %c0_36 = arith.constant 0 : index
    %95 = vector.load %arg3[%c9, %c0_35, %c0_36] : memref<11x128x128xbf16, #tpu.memory_space<vmem>>, vector<1x128x128xbf16>
    %96 = vector.shape_cast %95 : vector<1x128x128xbf16> to vector<128x128xbf16>
    %cst_37 = arith.constant dense<0.000000e+00> : vector<128x128xf32>
    %97 = tpu.matmul %94, %96, %cst_37 {dimension_numbers = #tpu.dot_dimension_numbers<[1], [0], [0], [1], [0, 0, 1, 1], [], []>} : vector<128x128xbf16>, vector<128x128xbf16>, vector<128x128xf32> -> vector<128x128xf32>
    %98 = vector.broadcast %42 : vector<1x128xf32> to vector<128x128xf32>
    %99 = arith.maximumf %97, %98 : vector<128x128xf32>
    %100 = arith.truncf %99 : vector<128x128xf32> to vector<128x128xbf16>
    %c10 = arith.constant 10 : index
    %c0_38 = arith.constant 0 : index
    %c0_39 = arith.constant 0 : index
    %101 = vector.load %arg3[%c10, %c0_38, %c0_39] : memref<11x128x128xbf16, #tpu.memory_space<vmem>>, vector<1x128x128xbf16>
    %102 = vector.shape_cast %101 : vector<1x128x128xbf16> to vector<128x128xbf16>
    %cst_40 = arith.constant dense<0.000000e+00> : vector<128x128xf32>
    %103 = tpu.matmul %100, %102, %cst_40 {dimension_numbers = #tpu.dot_dimension_numbers<[1], [0], [0], [1], [0, 0, 1, 1], [], []>} : vector<128x128xbf16>, vector<128x128xbf16>, vector<128x128xf32> -> vector<128x128xf32>
    %cst_41 = arith.constant 0.000000e+00 : f32
    %104 = vector.broadcast %cst_41 : f32 to vector<128x128xf32>
    %105 = arith.subf %104, %103 : vector<128x128xf32>
    %106 = math.exp %105 : vector<128x128xf32>
    %cst_42 = arith.constant 1.000000e+00 : f32
    %107 = vector.broadcast %cst_42 : f32 to vector<128x128xf32>
    %108 = arith.addf %107, %106 : vector<128x128xf32>
    %109 = tpu.reciprocal %108 {approx = true} : vector<128x128xf32> -> vector<128x128xf32>
    %c3_i32 = arith.constant 3 : i32
    %110 = vector.broadcast %c3_i32 : i32 to vector<1x128xi32>
    %111 = arith.cmpi slt, %0, %110 : vector<1x128xi32>
    %112 = vector.shape_cast %111 : vector<1x128xi1> to vector<1x128xi1>
    %113 = vector.broadcast %112 : vector<1x128xi1> to vector<128x128xi1>
    %114 = arith.select %113, %109, %103 : vector<128x128xi1>, vector<128x128xf32>
    %115 = vector.extract_strided_slice %114 {offsets = [0, 0], sizes = [128, 8], strides = [1, 1]} : vector<128x128xf32> to vector<128x8xf32>
    %c0_43 = arith.constant 0 : index
    %c0_44 = arith.constant 0 : index
    %116 = vector.load %arg4[%c0_43, %c0_44] : memref<128x8xf32, #tpu.memory_space<vmem>>, vector<128x8xf32>
    tpu.vector_store %arg4[%c0_43, %c0_44], %115 {strides = array<i32>} : memref<128x8xf32, #tpu.memory_space<vmem>>, vector<128x8xf32>,
    return
  }
  func.func @transform_0(%arg0: i32) -> (i32, i32) {
    %c0_i32 = arith.constant 0 : i32
    %c0_i32_0 = arith.constant 0 : i32
    return %arg0, %c0_i32 : i32, i32
  }
  func.func @transform_1(%arg0: i32) -> (i32, i32) {
    %c0_i32 = arith.constant 0 : i32
    %c0_i32_0 = arith.constant 0 : i32
    %c0_i32_1 = arith.constant 0 : i32
    return %c0_i32, %c0_i32_0 : i32, i32
  }
  func.func @transform_2(%arg0: i32) -> (i32, i32, i32) {
    %c0_i32 = arith.constant 0 : i32
    %c0_i32_0 = arith.constant 0 : i32
    %c0_i32_1 = arith.constant 0 : i32
    %c0_i32_2 = arith.constant 0 : i32
    return %c0_i32, %c0_i32_0, %c0_i32_1 : i32, i32, i32
  }
  func.func @transform_3(%arg0: i32) -> (i32, i32) {
    %c0_i32 = arith.constant 0 : i32
    %c0_i32_0 = arith.constant 0 : i32
    return %arg0, %c0_i32 : i32, i32
  }
}

</mosaic_0001>

<bundles_post_ra>
// kernel: tpu_custom_call.1
= control target key start
LH: loop header
LB: loop body
LE: loop exit
PB: predicated region body
PF: predicated region fallthrough
CT: control target
= control target key end

     0   :  { %8 = vsyncpa [#allocation3], 0  ;;  %s5531_s12 = smov 0   ;;  %s7863_s0 = inlined_call_operand.vmem [shape: f32[256,3], index: 0, kind: input, shape index: {}]   ;;  %s7864_s1 = inlined_call_operand.vmem [shape: f32[4,128], index: 1, kind: input, shape index: {}]   ;;  %s7865_s2 = inlined_call_operand.hbm [shape: bf16[11,128,128], index: 2, kind: input, shape index: {}]   ;;  %s7866_s3 = inlined_call_operand.vmem [shape: f32[256,8], index: 3, kind: output, shape index: {}]  }
   0x1 LB: > { %s4415_s13 = sadd.s32 4294967295, %s5496_s12   ;;  %p4417_p0 = scmp.ge.s32.totalorder %s5496_s12, 1  ;;  %s5496_s12 = sphi %s5531_s12, %s14_s12  }
   0x2   : > { %p113_p1 = scmp.lt.s32.totalorder %s5496_s12, 3  ;;  %s5498_s14 = smov [#allocation2]  }
   0x3   : > { %s128_s15 = sshll.u32 %s5498_s14, 4  ;;  %p5545_p3 = scmp.eq.s32.totalorder %s4415_s13, 0  ;;  %s129_s15 = int_to_ptr.vmem [resolvable:$true] %s128_s15 }
   0x4   : > { %p5539_p2 = pnand %p4417_p0, %p113_p1  ;;  %s5458_s21 = scalar_lea.hbm %s7865_s2, 11264 }
   0x5   : > { %s7923_s17 = scalar_select %p5545_p3, 1, 0 }
   0x6   : > { %s7922_s16 = scalar_select %p5539_p2, 1, 0 }
   0x7   : > { %p5192_p4 = pneg %p5539_p2  ;;  %p5459_p6 = scmp.ne.s32.totalorder %s7865_s2, %s5458_s21 }
   0x8   : > { %p5465_p10 = scmp.lt.u32.totalorder %s5458_s21, %s7865_s2 }
   0x9   : > { %p5553_p5 = pnand %p5545_p3, %p5192_p4 }
   0xb   : > { %p5460_p7 = pneg %p5553_p5 }
   0xd   : > { %p5461_p8 = pnand %p5460_p7, %p5459_p6 }
   0xf   : > { %p5462_p9 = pneg %p5461_p8 }
  0x11   : > { %p5467_p11 = pnand %p5465_p10, %p5462_p9 }
  0x13   : > { %5470 = shalt.err (!%p5467_p11)
}
  0x14   : > { %s5471_s26 = scalar_lea.vmem %s129_s15, 11264  ;;  %p5479_p1 = scmp.lt.s32.totalorder %s129_s15, %s129_s15 }
  0x15   : > { %p5472_p12 = scmp.ne.s32.totalorder %s129_s15, %s5471_s26  ;;  %p5480_p4 = scmp.lt.s32.totalorder %s5471_s26, %s5471_s26 }
  0x17   : > { %p5474_p13 = pnand %p5472_p12, %p5460_p7  ;;  %p5481_p3 = por %p5480_p4, %p5479_p1 }
  0x19   : > { %p5475_p0 = pneg %p5474_p13 }
  0x1b   : > { %p5482_p2 = pnand %p5481_p3, %p5475_p0 }
  0x1d   : > { %5485 = shalt.err (!%p5482_p2)
}
  0x1e   : > { %s5499_s27 = smov 64   ;;  %s5500_s28 = smov 4  }
  0x1f   : > { %5195 = dma.hbm_to_vmem [thread:$0]  (!%p5553_p5), %s7865_s2, 11264, %s129_s15, [#allocation3], %s5499_s27, %s5499_s27, %s5500_s28  }
  0x20   : > { %p7925_p6 = scmp.ne.s32.totalorder %s7922_s16, 0 }
  0x22   : > { %153 = sbr.rel (%p7925_p6) target bundleno = 3112 (0xc28), region = 32 }
  0x29   : > { %p7926_p8 = scmp.ne.s32.totalorder %s7923_s17, 0 }
  0x2b   : > { %5491 = dma.done.wait (%p7926_p8), [#allocation3], 11264  }
  0x2c   : > { %5493 = vsyncadd (%p7926_p8), [#allocation3], 4294956032  ;;  %s4422_s4 = sshll.u32 %s4415_s13, 4  ;;  %v5501_v0 = vmov 2   ;;  %v5502_v1 = vmov 1   ;;  %v5503_v8 = vmov 0   ;;  %v190_v23 = vlaneseq }
  0x2d   : > { %5223 = vset.pattern.permute.xlu0 %v5501_v0  ;;  %5219 = vset.pattern.permute.xlu1 %v5502_v1  ;;  %p178_p2 = scmp.lt.s32.totalorder %s4422_s4, 31  ;;  %v5242_v19 = vld [vmem:[#allocation2] sm:$0xff]   ;;  %v5243_v20 = vld [vmem:[#allocation2 + $0x8] sm:$0xff]   ;;  %v5244_v55 = vld [vmem:[#allocation2 + $0x10] sm:$0xff]  }
  0x2e   : > { %4756 = vmatprep.subr.bf16.mxu0 %v5242_v19  ;;  %v290_v26 = vshrl.u32 %v190_v23, 7  ;;  %v208_v31 = vld [vmem:[%s7864_s1] sm:$0xf]  ;;  %v5245_v56 = vld [vmem:[#allocation2 + $0x18] sm:$0xff]  }
  0x2f   : > { %s8018_s4 = smov (!%p178_p2, %s4422_s4), 31  ;;  %4757 = vmatpush3.bf16.msra.mxu0 %v5242_v19 }
  0x30   : > { %s4423_s5 = sshll.u32 %s8018_s4, 3  ;;  %4758 = vmatprep.subr.bf16.mxu0 %v5243_v20  ;;  %v291_v27 = vsub.s32 0, %v290_v26  ;;  %v375_v29 = vsub.s32 1, %v290_v26  ;;  %v475_v33 = vsub.s32 2, %v290_v26  ;;  %v511_v40 = vsub.s32 3, %v290_v26 }
  0x31   : > { %s5591_s8 = scalar_lea.vmem %s7863_s0, %s4423_s5  ;;  %s7790_s14 = scalar_lea.vmem %s7866_s3, %s4423_s5 }
  0x32   : > { %v193_v2 = vld [vmem:[%s5591_s8 + $0x8] sm:$0xff]  ;;  %v192_v3 = vld [vmem:[%s5591_s8] sm:$0xff]  ;;  %v199_v5 = vld [vmem:[%s5591_s8 + $0x38] sm:$0xff]  ;;  %v5638_v32 = vrot.slane %v208_v31, %v291_v27  ;;  %v5642_v35 = vrot.slane %v208_v31, %v375_v29  ;;  %v5646_v39 = vrot.slane %v208_v31, %v475_v33  ;;  %v5650_v47 = vrot.slane %v208_v31, %v511_v40 }
  0x33   : > { %414 = vperm.xlu0 %5223, %v193_v2   ;;  %310 = vperm.xlu1 %5219, %v192_v3   ;;  %v196_v4 = vld [vmem:[%s5591_s8 + $0x20] sm:$0xff]  ;;  %v195_v6 = vld [vmem:[%s5591_s8 + $0x18] sm:$0xff]  ;;  %v201_v7 = vld [vmem:[%s5591_s8 + $0x48] sm:$0xff]  ;;  %v7890_v27 = vmov 2131351028  }
  0x34   : > { %v194_v9 = vld [vmem:[%s5591_s8 + $0x10] sm:$0xff]  ;;  %v197_v10 = vld [vmem:[%s5591_s8 + $0x28] sm:$0xff]  ;;  %v204_v12 = vld [vmem:[%s5591_s8 + $0x60] sm:$0xff]  ;;  %4759 = vmatpush3.bf16.msra.mxu0 %v5243_v20  ;;  %v7872_v40 = vmov 1326507024  }
  0x35   : > { %v202_v11 = vld [vmem:[%s5591_s8 + $0x50] sm:$0xff]  ;;  %v205_v14 = vld [vmem:[%s5591_s8 + $0x68] sm:$0xff]  ;;  %v200_v15 = vld [vmem:[%s5591_s8 + $0x40] sm:$0xff]  ;;  %4760 = vmatprep.subr.bf16.mxu0 %v5244_v55 }
  0x36   : > { %v198_v13 = vld [vmem:[%s5591_s8 + $0x30] sm:$0xff]  ;;  %v207_v17 = vld [vmem:[%s5591_s8 + $0x78] sm:$0xff] }
  0x37   : > { %426 = vperm.xlu0 %5223, %v196_v4   ;;  %314 = vperm.xlu1 %5219, %v193_v2   ;;  %v206_v16 = vld [vmem:[%s5591_s8 + $0x70] sm:$0xff]  ;;  %v203_v18 = vld [vmem:[%s5591_s8 + $0x58] sm:$0xff] }
  0x38   : > { %4761 = vmatpush3.bf16.msra.mxu0 %v5244_v55 }
  0x39   : > { %4762 = vmatprep.subr.bf16.mxu0 %v5245_v56 }
  0x3b   : > { %438 = vperm.xlu0 %5223, %v199_v5   ;;  %5220 = vset.pattern.permute.xlu1 %v5503_v8 }
  0x3c   : > { %226 = vperm.xlu1 %5220, %v195_v6   ;;  %4763 = vmatpush3.bf16.msra.mxu0 %v5245_v56  ;;  %v7878_v56 = vmov 683565275  }
  0x3f   : > { %446 = vperm.xlu0 %5223, %v201_v7  }
  0x40   : > { %5221 = vset.pattern.permute.xlu1 %v5502_v1 }
  0x41   : > { %322 = vperm.xlu1 %5221, %v195_v6  }
  0x43   : > { %5234 = vset.pattern.permute.xlu0 %v5503_v8 }
  0x44   : > { %211 = vperm.xlu0 %5234, %v192_v3  }
  0x45   : > { %5222 = vset.pattern.permute.xlu1 %v5501_v0 }
  0x46   : > { %410 = vperm.xlu1 %5222, %v192_v3  }
  0x48   : > { %216 = vperm.xlu0 %5234, %v193_v2  }
  0x4a   : > { %418 = vperm.xlu1 %5222, %v194_v9  }
  0x4c   : > { %221 = vperm.xlu0 %5234, %v194_v9  }
  0x4e   : > { %422 = vperm.xlu1 %5222, %v195_v6   ;;  %v5247_v6 = vld [vmem:[#allocation2 + $0x28] sm:$0xff]  }
  0x50   : > { %231 = vperm.xlu0 %5234, %v196_v4  }
  0x52   : > { %5224 = vset.pattern.permute.xlu1 %v5503_v8 }
  0x53   : > { %236 = vperm.xlu1 %5224, %v197_v10  }
  0x54   : > { %256 = vperm.xlu0 %5234, %v201_v7  }
  0x57   : > { %5225 = vset.pattern.permute.xlu1 %v5502_v1 }
  0x58   : > { %261 = vperm.xlu0 %5234, %v202_v11   ;;  %326 = vperm.xlu1 %5225, %v196_v4  }
  0x5c   : > { %271 = vperm.xlu0 %5234, %v204_v12   ;;  %5226 = vset.pattern.permute.xlu1 %v5503_v8 }
  0x5d   : > { %241 = vperm.xlu1 %5226, %v198_v13  }
  0x60   : > { %5235 = vset.pattern.permute.xlu0 %v5502_v1 }
  0x61   : > { %318 = vperm.xlu0 %5235, %v194_v9   ;;  %246 = vperm.xlu1 %5226, %v199_v5  }
  0x65   : > { %330 = vperm.xlu0 %5235, %v197_v10   ;;  %5227 = vset.pattern.permute.xlu1 %v5502_v1 }
  0x66   : > { %338 = vperm.xlu1 %5227, %v199_v5  }
  0x69   : > { %334 = vperm.xlu0 %5235, %v198_v13  }
  0x6a   : > { %5228 = vset.pattern.permute.xlu1 %v5501_v0 }
  0x6b   : > { %430 = vperm.xlu1 %5228, %v197_v10  }
  0x6d   : > { %350 = vperm.xlu0 %5235, %v202_v11  }
  0x6f   : > { %434 = vperm.xlu1 %5228, %v198_v13  }
  0x71   : > { %362 = vperm.xlu0 %5235, %v205_v14  }
  0x73   : > { %5229 = vset.pattern.permute.xlu1 %v5503_v8 }
  0x74   : > { %251 = vperm.xlu1 %5229, %v200_v15  }
  0x75   : > { %366 = vperm.xlu0 %5235, %v206_v16  }
  0x78   : > { %5230 = vset.pattern.permute.xlu1 %v5502_v1 }
  0x79   : > { %342 = vperm.xlu1 %5230, %v200_v15   ;;  %5240 = vset.pattern.permute.xlu0 %v5501_v0 }
  0x7a   : > { %458 = vperm.xlu0 %5240, %v204_v12  }
  0x7d   : > { %346 = vperm.xlu1 %5230, %v201_v7  }
  0x7e   : > { %470 = vperm.xlu0 %5240, %v207_v17  }
  0x81   : > { %5231 = vset.pattern.permute.xlu1 %v5503_v8 }
  0x82   : > { %266 = vperm.xlu1 %5231, %v203_v18  }
  0x86   : > { %5232 = vset.pattern.permute.xlu1 %v5502_v1 }
  0x87   : > { %354 = vperm.xlu1 %5232, %v203_v18  }
  0x8b   : > { %5233 = vset.pattern.permute.xlu1 %v5501_v0 }
  0x8c   : > { %442 = vperm.xlu1 %5233, %v200_v15  }
  0x90   : > { %450 = vperm.xlu1 %5233, %v202_v11  }
  0x94   : > { %454 = vperm.xlu1 %5233, %v203_v18  }
  0x98   : > { %5236 = vset.pattern.permute.xlu1 %v5503_v8 }
  0x99   : > { %276 = vperm.xlu1 %5236, %v205_v14  }
  0x9d   : > { %5237 = vset.pattern.permute.xlu1 %v5502_v1 }
  0x9e   : > { %358 = vperm.xlu1 %5237, %v204_v12   ;;  %v5248_v12 = vld [vmem:[#allocation2 + $0x30] sm:$0xff]  }
  0xa2   : > { %5238 = vset.pattern.permute.xlu1 %v5503_v8 }
  0xa3   : > { %281 = vperm.xlu1 %5238, %v206_v16  }
  0xa7   : > { %286 = vperm.xlu1 %5238, %v207_v17  }
  0xab   : > { %5239 = vset.pattern.permute.xlu1 %v5502_v1 }
  0xac   : > { %370 = vperm.xlu1 %5239, %v207_v17   ;;  %v5249_v17 = vld [vmem:[#allocation2 + $0x38] sm:$0xff]  }
  0xb0   : > { %5241 = vset.pattern.permute.xlu1 %v5501_v0  ;;  %v5246_v0 = vld [vmem:[#allocation2 + $0x20] sm:$0xff]  }
  0xb1   : > { %462 = vperm.xlu1 %5241, %v205_v14   ;;  %4764 = vmatprep.subr.bf16.mxu0 %v5246_v0 }
  0xb2   : > { %v311_v21 = vpop.permute.xlu1 %310  ;;  %v415_v22 = vpop.permute.xlu0 %414  ;;  %4765 = vmatpush3.bf16.msra.mxu0 %v5246_v0 }
  0xb3   : > { %v377_v43 = vmul.f32 %v5642_v35, %v311_v21  ;;  %v478_v60 = vmul.f32 %v5646_v39, %v415_v22  ;;  %4766 = vmatprep.subr.bf16.mxu0 %v5247_v6 }
  0xb5   : > { %466 = vperm.xlu1 %5241, %v206_v16  }
  0xb6   : > { %v315_v24 = vpop.permute.xlu1 %314  ;;  %v5630_v25 = vpop.permute.xlu0 %426  ;;  %4767 = vmatpush3.bf16.msra.mxu0 %v5247_v6 }
  0xb7   : > { %v378_v57 = vmul.f32 %v5642_v35, %v315_v24  ;;  %4768 = vmatprep.subr.bf16.mxu0 %v5248_v12 }
  0xba   : > { %v5633_v28 = vpop.permute.xlu0 %438  ;;  %4769 = vmatpush3.bf16.msra.mxu0 %v5248_v12 }
  0xbb   : > { %v227_v30 = vpop.permute.xlu1 %226  ;;  %4770 = vmatprep.subr.bf16.mxu0 %v5249_v17 }
  0xbc   : > { %v296_v37 = vmul.f32 %v5638_v32, %v227_v30  ;;  %v7876_v30 = vmov 2102212464  }
  0xbe   : > { %v5640_v34 = vpop.permute.xlu0 %446  ;;  %4771 = vmatpush3.bf16.msra.mxu0 %v5249_v17 }
  0xc0   : > { %v323_v36 = vpop.permute.xlu1 %322 }
  0xc1   : > { %v380_v38 = vmul.f32 %v5642_v35, %v323_v36 }
  0xc3   : > { %v396_v41 = vadd.f32 %v380_v38, %v296_v37  ;;  %v212_v42 = vpop.permute.xlu0 %211  ;;  %v7874_v37 = vmov 920167782  }
  0xc4   : > { %v293_v44 = vmul.f32 %v5638_v32, %v212_v42 }
  0xc5   : > { %v411_v45 = vpop.permute.xlu1 %410 }
  0xc6   : > { %v393_v46 = vadd.f32 %v377_v43, %v293_v44  ;;  %v477_v48 = vmul.f32 %v5646_v39, %v411_v45  ;;  %v7885_v43 = vmov 2475754826  }
  0xc7   : > { %v217_v49 = vpop.permute.xlu0 %216 }
  0xc8   : > { %v493_v50 = vadd.f32 %v477_v48, %v393_v46  ;;  %v294_v53 = vmul.f32 %v5638_v32, %v217_v49  ;;  %v481_v49 = vmul.f32 %v5646_v39, %v5630_v25 }
  0xc9   : > { %v5653_v51 = vpop.permute.xlu1 %418 }
  0xca   : > { %v5656_v52 = vadd.f32 %v5650_v47, %v493_v50  ;;  %v394_v62 = vadd.f32 %v378_v57, %v294_v53 }
  0xcb   : > { %v5659_v54 = vpop.permute.xlu0 %221 }
  0xcc   : > { %v535_v58 = vand.u32 2139095040, %v5656_v52  ;;  %v494_v3 = vadd.f32 %v478_v60, %v394_v62  ;;  %v532_v16 = vand.u32 2147483647, %v5656_v52  ;;  %vm534_vm15 = vcmp.lt.s32.totalorder %v5656_v52, 0 }
  0xcd   : > { %v423_v59 = vpop.permute.xlu1 %422 }
  0xce   : > { %v536_v61 = vshrl.u32 %v535_v58, 23  ;;  %v5669_v9 = vadd.f32 %v5650_v47, %v494_v3  ;;  %v480_v13 = vmul.f32 %v5646_v39, %v423_v59  ;;  %v539_v26 = vand.u32 8388607, %v532_v16 }
  0xcf   : > { %v232_v63 = vpop.permute.xlu0 %231 }
  0xd0   : > { %v4426_v1 = vadd.s32 4294967169, %v536_v61  ;;  %v639_v15 = vand.u32 2139095040, %v5669_v9  ;;  %v496_v19 = vadd.f32 %v480_v13, %v396_v41  ;;  %v297_v20 = vmul.f32 %v5638_v32, %v232_v63 }
  0xd1   : > { %v295_v61 = vmul.f32 %v5638_v32, %v5659_v54  ;;  %v540_v0 = vor.u32 8388608, %v539_v26 }
  0xd2   : > { %v542_v2 = vadd.s32 1, %v4426_v1  ;;  %v5664_v4 = vpop.permute.xlu1 %236  ;;  %v640_v24 = vshrl.u32 %v639_v15, 23  ;;  %v5707_v50 = vadd.f32 %v5650_v47, %v496_v19  ;;  %v7871_v15 = vand.u32 2147483647, %v5669_v9 }
  0xd3   : > { %v5666_v5 = vpop.permute.xlu0 %256 }
  0xd4   : > { %vm543_vm0 = vcmp.gt.s32.totalorder %v542_v2, 0  ;;  %v4430_v63 = vadd.s32 4294967169, %v640_v24  ;;  %v847_v25 = vand.u32 2139095040, %v5707_v50 }
  0xd5   : > { %v544_v7 = vsel %vm543_vm0, %v542_v2, 0 }
  0xd6   : > { %v546_v8 = vand.u32 31, %v544_v7  ;;  %v5690_v33 = vshrl.u32 %v544_v7, 5  ;;  %v646_v17 = vadd.s32 1, %v4430_v63  ;;  %v848_v19 = vshrl.u32 %v847_v25, 23 }
  0xd7   : > { %v327_v10 = vpop.permute.xlu1 %326  ;;  %v5671_v11 = vpop.permute.xlu0 %261  ;;  %v5760_v63 = vand.u32 127, %v190_v23  ;;  %v484_v23 = vmul.f32 %v5646_v39, %v5633_v28  ;;  %v302_v28 = vmul.f32 %v5638_v32, %v5666_v5 }
  0xd8   : > { %v5674_v14 = vsub.s32 32, %v546_v8  ;;  %v381_v21 = vmul.f32 %v5642_v35, %v327_v10  ;;  %v558_v36 = vshll.u32 %v7876_v30, %v546_v8  ;;  %v552_v45 = vshll.u32 %v7885_v43, %v546_v8 }
  0xd9   : > { %v555_v46 = vshll.u32 %v7890_v27, %v546_v8  ;;  %v561_v48 = vshll.u32 %v7874_v37, %v546_v8  ;;  %v549_v57 = vshll.u32 %v7878_v56, %v546_v8  ;;  %vm567_vm1 = vcmp.lt.s32.totalorder %v5690_v33, 4  ;;  %7927 = vst [vmem:[#allocation5_spill] sm:$0xff] %v5760_v63 }
  0xda   : > { %v553_v29 = vshrl.u32 %v7890_v27, %v5674_v14  ;;  %v556_v31 = vshrl.u32 %v7876_v30, %v5674_v14  ;;  %v559_v38 = vshrl.u32 %v7874_v37, %v5674_v14  ;;  %v562_v41 = vshrl.u32 %v7872_v40, %v5674_v14 }
  0xdb   : > { %v5682_v22 = vpop.permute.xlu0 %271  ;;  %v550_v44 = vshrl.u32 %v7885_v43, %v5674_v14  ;;  %v397_v53 = vadd.f32 %v381_v21, %v297_v20  ;;  %vm564_vm2 = vcmp.lt.s32.totalorder %v5690_v33, 1  ;;  %vm566_vm3 = vcmp.lt.s32.totalorder %v5690_v33, 3 }
  0xdc   : > { %v5678_v18 = vpop.permute.xlu1 %241  ;;  %v560_v55 = vor.u32 %v559_v38, %v558_v36  ;;  %v554_v58 = vor.u32 %v553_v29, %v552_v45  ;;  %v557_v59 = vor.u32 %v556_v31, %v555_v46  ;;  %v563_v60 = vor.u32 %v562_v41, %v561_v48 }
  0xdd   : > { %v551_v1 = vor.u32 %v550_v44, %v549_v57  ;;  %v497_v2 = vadd.f32 %v481_v49, %v397_v53  ;;  %vm565_vm4 = vcmp.lt.s32.totalorder %v5690_v33, 2  ;;  %v580_v29 = vshll.u32 %v540_v0, 8 }
  0xde   : > { %v573_v6 = vsel %vm567_vm1, %v560_v55, 920167782  ;;  %v576_v54 = vsel %vm564_vm2, %v554_v58, %v557_v59  ;;  %v577_v8 = vsel %vm567_vm1, %v563_v60, 1326507024  ;;  %v548_v31 = vshrl.u32 %v7878_v56, %v5674_v14 }
  0xdf   : > { %v578_v10 = vsel %vm566_vm3, %v560_v55, %v577_v8  ;;  %v572_v12 = vsel %vm564_vm2, %v551_v1, %v554_v58  ;;  %v574_v13 = vsel %vm566_vm3, %v557_v59, %v573_v6  ;;  %v5732_v20 = vadd.f32 %v5650_v47, %v497_v2 }
  0xe0   : > { %v5697_v42 = vpop.permute.xlu1 %246  ;;  %v319_v62 = vpop.permute.xlu0 %318  ;;  %v579_v21 = vsel %vm565_vm4, %v576_v54, %v578_v10  ;;  %v569_v36 = vsel %vm567_vm1, %v557_v59, 2102212464  ;;  %v575_v38 = vsel %vm565_vm4, %v572_v12, %v574_v13  ;;  %v479_v41 = vmul.f32 %v5646_v39, %v5653_v51 }
  0xe1   : > { %v379_v7 = vmul.f32 %v5642_v35, %v319_v62  ;;  %v5744_v44 = vmul.u32.u64.low %v580_v29, %v579_v21  ;;  %v5745_v45 = vmul.u32.u64.high %v580_v29, %v579_v21, %v5744_v44  ;;  %v643_v46 = vand.u32 8388607, %v7871_v15 }
  0xe2   : > { %vm647_vm5 = vcmp.gt.s32.totalorder %v646_v17, 0  ;;  %v4438_v48 = vadd.s32 4294967169, %v848_v19  ;;  %v951_v49 = vand.u32 2139095040, %v5732_v20  ;;  %v568_v14 = vsel %vm564_vm2, %v548_v31, %v551_v1 }
  0xe3   : > { %v395_v24 = vadd.f32 %v379_v7, %v295_v61  ;;  %v570_v59 = vsel %vm566_vm3, %v554_v58, %v569_v36  ;;  %v5754_v51 = vmul.u32.u64.low %v580_v29, %v575_v38  ;;  %v5755_v60 = vmul.u32.u64.high %v580_v29, %v575_v38, %v5754_v51 }
  0xe4   : > { %v331_v55 = vpop.permute.xlu0 %330  ;;  %v648_v61 = vsel %vm647_vm5, %v646_v17, 0  ;;  %v952_v0 = vshrl.u32 %v951_v49, 23  ;;  %v571_v1 = vsel %vm565_vm4, %v568_v14, %v570_v59  ;;  %v644_v25 = vor.u32 8388608, %v643_v46 }
  0xe5   : > { %v339_v3 = vpop.permute.xlu1 %338  ;;  %v495_v53 = vadd.f32 %v479_v41, %v395_v24  ;;  %vm589_vm6 = vc.u32 %v5745_v45, %v5754_v51  ;;  %v854_v2 = vadd.s32 1, %v4438_v48  ;;  %v300_v6 = vmul.f32 %v5638_v32, %v5697_v42 }
  0xe6   : > { %v384_v62 = vmul.f32 %v5642_v35, %v339_v3  ;;  %v590_v3 = vadd.s32 1, %v5755_v60  ;;  %v486_v33 = vmul.f32 %v5646_v39, %v5640_v34  ;;  %v650_v7 = vand.u32 31, %v648_v61 }
  0xe7   : > { %v5767_v58 = vadd.f32 %v5650_v47, %v495_v53  ;;  %v7870_v8 = vand.u32 2147483647, %v5707_v50  ;;  %v382_v10 = vmul.f32 %v5642_v35, %v331_v55  ;;  %v587_v17 = vmul.u32 %v580_v29, %v571_v1 }
  0xe8   : > { %v400_v12 = vadd.f32 %v384_v62, %v300_v6  ;;  %v335_v13 = vpop.permute.xlu0 %334  ;;  %v591_v42 = vsel %vm589_vm6, %v590_v3, %v5755_v60  ;;  %v298_v19 = vmul.f32 %v5638_v32, %v5664_v4  ;;  %v4442_v21 = vadd.s32 4294967169, %v952_v0 }
  0xe9   : > { %v5785_v34 = vshll.u32 %v644_v25, 8  ;;  %vm855_vm7 = vcmp.gt.s32.totalorder %v854_v2, 0  ;;  %v743_v24 = vand.u32 2139095040, %v5767_v58  ;;  %v592_v36 = vadd.s32 %v591_v42, %v587_v17 }
  0xea   : > { %v431_v26 = vpop.permute.xlu1 %430  ;;  %v651_v38 = vsub.s32 32, %v650_v7  ;;  %v5791_v29 = vmul.f32 %v5638_v32, %v5671_v11  ;;  %v383_v41 = vmul.f32 %v5642_v35, %v335_v13  ;;  %v5796_v4 = vand.u32 8388607, %v7870_v8 }
  0xeb   : > { %v482_v31 = vmul.f32 %v5646_v39, %v431_v26  ;;  %v5798_v5 = vshrl.u32 %v648_v61, 5  ;;  %v398_v44 = vadd.f32 %v382_v10, %v298_v19  ;;  %v500_v46 = vadd.f32 %v484_v23, %v400_v12 }
  0xec   : > { %v593_v49 = vadd.s32 536870912, %v592_v36  ;;  %v5802_v26 = vsel %vm855_vm7, %v854_v2, 0  ;;  %v958_v14 = vadd.s32 1, %v4442_v21  ;;  %v5806_v11 = vmul.f32 %v5638_v32, %v5682_v22 }
  0xed   : > { %v299_v53 = vmul.f32 %v5638_v32, %v5678_v18  ;;  %v744_v55 = vshrl.u32 %v743_v24, 23  ;;  %v498_v59 = vadd.f32 %v482_v31, %v398_v44  ;;  %v653_v0 = vshll.u32 %v7878_v56, %v650_v7 }
  0xee   : > { %v435_v57 = vpop.permute.xlu1 %434  ;;  %v5811_v61 = vshrl.u32 %v593_v49, 30  ;;  %v654_v1 = vshrl.u32 %v7885_v43, %v651_v38  ;;  %v663_v25 = vshrl.u32 %v7874_v37, %v651_v38  ;;  %v5817_v2 = vadd.f32 %v5650_v47, %v500_v46 }
  0xef   : > { %v483_v60 = vmul.f32 %v5646_v39, %v435_v57  ;;  %v399_v62 = vadd.f32 %v383_v41, %v299_v53  ;;  %v656_v18 = vshll.u32 %v7885_v43, %v650_v7  ;;  %v657_v3 = vshrl.u32 %v7890_v27, %v651_v38 }
  0xf0   : > { %7928 = vst [vmem:[#allocation6_spill] sm:$0xff] %v5817_v2  ;;  %v595_v6 = vshll.u32 %v5811_v61, 30  ;;  %v660_v23 = vshrl.u32 %v7876_v30, %v651_v38  ;;  %v662_v10 = vshll.u32 %v7876_v30, %v650_v7  ;;  %v666_v12 = vshrl.u32 %v7872_v40, %v651_v38 }
  0xf1   : > { %v4434_v13 = vadd.s32 4294967169, %v744_v55  ;;  %v5827_v17 = vadd.f32 %v5650_v47, %v498_v59  ;;  %v499_v42 = vadd.f32 %v483_v60, %v399_v62  ;;  %v659_v24 = vshll.u32 %v7890_v27, %v650_v7 }
  0xf2   : > { %v5829_v19 = vsub.s32 %v592_v36, %v595_v6  ;;  %v664_v31 = vor.u32 %v663_v25, %v662_v10  ;;  %v665_v41 = vshll.u32 %v7874_v37, %v650_v7  ;;  %v5834_v44 = vand.u32 31, %v5802_v26 }
  0xf3   : > { %v5776_v54 = vpop.permute.xlu1 %251  ;;  %v1263_v46 = vand.u32 2139095040, %v5817_v2  ;;  %v655_v53 = vor.u32 %v654_v1, %v653_v0  ;;  %v658_v36 = vor.u32 %v657_v3, %v656_v18  ;;  %v661_v60 = vor.u32 %v660_v23, %v659_v24 }
  0xf4   : > { %v598_v49 = vsub.s32 0, %v5829_v19  ;;  %vm959_vm8 = vcmp.gt.s32.totalorder %v958_v14, 0  ;;  %v652_v7 = vshrl.u32 %v7878_v56, %v651_v38  ;;  %vm671_vm9 = vcmp.lt.s32.totalorder %v5798_v5, 4 }
  0xf5   : > { %v750_v25 = vadd.s32 1, %v4434_v13  ;;  %v5847_v6 = vadd.f32 %v5650_v47, %v499_v42  ;;  %v1264_v0 = vshrl.u32 %v1263_v46, 23  ;;  %vm668_vm10 = vcmp.lt.s32.totalorder %v5798_v5, 1 }
  0xf6   : > { %v4427_v62 = vmin.u32 %v598_v49, %v5829_v19  ;;  %vm670_vm11 = vcmp.lt.s32.totalorder %v5798_v5, 3  ;;  %v676_v38 = vsel %vm668_vm10, %v655_v53, %v658_v36  ;;  %v680_v3 = vsel %vm668_vm10, %v658_v36, %v661_v60 }
  0xf7   : > { %7929 = vst [vmem:[#allocation7_spill] sm:$0xff] %v5847_v6  ;;  %v960_v23 = vsel %vm959_vm8, %v958_v14, 0  ;;  %vm669_vm12 = vcmp.lt.s32.totalorder %v5798_v5, 2  ;;  %v673_v24 = vsel %vm671_vm9, %v661_v60, 2102212464  ;;  %vm751_vm14 = vcmp.gt.s32.totalorder %v750_v25, 0 }
  0xf8   : > { %v5800_v48 = vpop.permute.xlu1 %342  ;;  %v600_v1 = vclz %v4427_v62  ;;  %vm5905_vm1 = vcmp.le.f32.partialorder %v532_v16, 0.7853982  ;;  %vm638_vm5 = vcmp.lt.s32.totalorder %v5669_v9, 0 }
  0xfc   : > { %v347_v22 = vpop.permute.xlu1 %346 }
  0xfd   : > { %v386_v57 = vmul.f32 %v5642_v35, %v347_v22  ;;  %v1055_v22 = vand.u32 2139095040, %v5827_v17 }
  0xff   : > { %v402_v21 = vadd.f32 %v386_v57, %v302_v28  ;;  %v667_v28 = vor.u32 %v666_v12, %v665_v41  ;;  %v4428_v12 = vadd.s32 4294967294, %v600_v1  ;;  %v1056_v42 = vshrl.u32 %v1055_v22, 23 }
 0x100   : > { %v674_v1 = vsel %vm670_vm11, %v658_v36, %v673_v24  ;;  %v301_v36 = vmul.f32 %v5638_v32, %v5776_v54  ;;  %v752_v24 = vsel %vm751_vm14, %v750_v25, 0  ;;  %vm529_vm14 = vcmp.ge.s32.totalorder %v5760_v63, 64 }
 0x101   : > { %v5838_v55 = vadd.f32 %v486_v33, %v402_v21  ;;  %v5840_v59 = vpop.permute.xlu1 %266  ;;  %v677_v33 = vsel %vm671_vm9, %v664_v31, 920167782  ;;  %v681_v57 = vsel %vm671_vm9, %v667_v28, 1326507024  ;;  %v1159_v21 = vand.u32 2139095040, %v5847_v6 }
 0x102   : > { %v678_v18 = vsel %vm670_vm11, %v661_v60, %v677_v33  ;;  %v682_v13 = vsel %vm670_vm11, %v664_v31, %v681_v57  ;;  %vm4429_vm13 = vcmp.lt.s32.totalorder %v4428_v12, 0  ;;  %v4454_v28 = vadd.s32 4294967169, %v1264_v0 }
 0x103   : > { %v683_v41 = vsel %vm669_vm12, %v680_v3, %v682_v13  ;;  %v679_v14 = vsel %vm669_vm12, %v676_v38, %v678_v18  ;;  %v588_v31 = vadd.s32 %v5754_v51, %v5745_v45  ;;  %v603_v62 = vsel %vm4429_vm13, 0, %v4428_v12 }
 0x104   : > { %v5875_v46 = vmul.u32.u64.low %v5785_v34, %v683_v41  ;;  %v5876_v49 = vmul.u32.u64.high %v5785_v34, %v683_v41, %v5875_v46  ;;  %v604_v22 = vsub.s32 32, %v603_v62  ;;  %v608_v33 = vsub.s32 4294967266, %v603_v62 }
 0x105   : > { %v672_v60 = vsel %vm668_vm10, %v652_v7, %v655_v53  ;;  %v4446_v3 = vadd.s32 4294967169, %v1056_v42  ;;  %v385_v38 = vmul.f32 %v5642_v35, %v5800_v48  ;;  %v5891_v45 = vand.u32 31, %v960_v23  ;;  %v351_v7 = vpop.permute.xlu0 %350 }
 0x106   : > { %v5862_v10 = vpop.permute.xlu1 %354  ;;  %v5887_v57 = vmul.u32.u64.low %v5785_v34, %v679_v14  ;;  %v5888_v0 = vmul.u32.u64.high %v5785_v34, %v679_v14, %v5887_v57  ;;  %v1160_v51 = vshrl.u32 %v1159_v21, 23  ;;  %v606_v12 = vshrl.u32 %v588_v31, %v604_v22 }
 0x107   : > { %v609_v53 = vadd.s32 127, %v608_v33  ;;  %v605_v48 = vshll.u32 %v5829_v19, %v603_v62  ;;  %v675_v42 = vsel %vm669_vm12, %v672_v60, %v674_v1  ;;  %v1270_v41 = vadd.s32 1, %v4454_v28 }
 0x108   : > { %vm693_vm0 = vc.u32 %v5876_v49, %v5887_v57  ;;  %v1062_v21 = vadd.s32 1, %v4446_v3  ;;  %v401_v46 = vadd.f32 %v385_v38, %v301_v36  ;;  %v694_v19 = vadd.s32 1, %v5888_v0 }
 0x109   : > { %v610_v14 = vshll.u32 %v609_v53, 23  ;;  %v607_v31 = vor.u32 %v606_v12, %v605_v48  ;;  %v4450_v5 = vadd.s32 4294967169, %v1160_v51  ;;  %v5912_v25 = vadd.f32 %v5650_v47, %v5838_v55  ;;  %v363_v16 = vpop.permute.xlu0 %362 }
 0x10a   : > { %v691_v62 = vmul.u32 %v5785_v34, %v675_v42  ;;  %v5916_v22 = vshrl.u32 %v5802_v26, 5  ;;  %v618_v1 = vsub.s32 4, %v5811_v61  ;;  %v695_v3 = vsel %vm693_vm0, %v694_v19, %v5888_v0 }
 0x10b   : > { %v443_v18 = vpop.permute.xlu1 %442  ;;  %7932 = vst [vmem:[#allocation8_spill] sm:$0xff] %v5912_v25  ;;  %v611_v28 = vor.u32 4788187, %v610_v14  ;;  %v5921_v38 = vsub.s32 32, %v5834_v44  ;;  %v5924_v12 = vshrl.u32 %v960_v23, 5  ;;  %v5927_v34 = vsub.s32 32, %v5891_v45 }
 0x10c   : > { %v485_v13 = vmul.f32 %v5646_v39, %v443_v18  ;;  %v387_v18 = vmul.f32 %v5642_v35, %v351_v7  ;;  %v696_v51 = vadd.s32 %v695_v3, %v691_v62  ;;  %v5929_v26 = vand.u32 31, %v752_v24 }
 0x10d   : > { %v612_v55 = vand.u32 2147483647, %v611_v28  ;;  %v614_v53 = vcvt.s32.f32 %v607_v31  ;;  %vm1271_vm2 = vcmp.gt.s32.totalorder %v1270_v41, 0  ;;  %vm1063_vm3 = vcmp.gt.s32.totalorder %v1062_v21, 0 }
 0x10e   : > { %v501_v33 = vadd.f32 %v485_v13, %v401_v46  ;;  %v1166_v36 = vadd.s32 1, %v4450_v5  ;;  %v1471_v0 = vand.u32 2139095040, %v5912_v25  ;;  %v619_v23 = vsel %vm534_vm15, %v618_v1, %v5811_v61 }
 0x10f   : > { %v451_v60 = vpop.permute.xlu1 %450  ;;  %v615_v48 = vmul.f32 %v614_v53, %v612_v55  ;;  %v697_v7 = vadd.s32 536870912, %v696_v51  ;;  %v5938_v42 = vshrl.u32 %v752_v24, 5  ;;  %v403_v14 = vadd.f32 %v387_v18, %v5791_v29 }
 0x110   : > { %v5933_v13 = vadd.f32 %v5650_v47, %v501_v33  ;;  %v487_v46 = vmul.f32 %v5646_v39, %v451_v60  ;;  %v5943_v31 = vmul.f32 %v5642_v35, %v363_v16  ;;  %v5946_v19 = vsub.s32 32, %v5929_v26  ;;  %v367_v33 = vpop.permute.xlu0 %366 }
 0x111   : > { %v1272_v5 = vsel %vm1271_vm2, %v1270_v41, 0  ;;  %v1064_v28 = vsel %vm1063_vm3, %v1062_v21, 0  ;;  %v5948_v3 = vshrl.u32 %v697_v7, 30  ;;  %vm1167_vm4 = vcmp.gt.s32.totalorder %v1166_v36, 0 }
 0x112   : > { %7933 = vst [vmem:[#allocation9_spill] sm:$0xff] %v5933_v13  ;;  %v1472_v61 = vshrl.u32 %v1471_v0, 23  ;;  %v388_v24 = vmul.f32 %v5642_v35, %v5862_v10  ;;  %v621_v29 = vsel %vm5905_vm1, 0, %v619_v23  ;;  %v1367_v60 = vand.u32 2139095040, %v5933_v13 }
 0x113   : > { %v455_v62 = vpop.permute.xlu1 %454  ;;  %v616_v16 = vxor.u32 2147483648, %v615_v48  ;;  %v699_v1 = vshll.u32 %v5948_v3, 30  ;;  %v7880_v41 = vand.u32 2147483647, %v5767_v58  ;;  %v5957_v21 = vand.u32 31, %v1272_v5 }
 0x114   : > { %v304_v18 = vmul.f32 %v5638_v32, %v5840_v59  ;;  %v503_v55 = vadd.f32 %v487_v46, %v403_v14  ;;  %v488_v53 = vmul.f32 %v5646_v39, %v455_v62  ;;  %v5962_v0 = vshrl.u32 %v1272_v5, 5  ;;  %v459_v7 = vpop.permute.xlu0 %458 }
 0x115   : > { %7934 = vst [vmem:[#allocation10_spill] sm:$0xff] %v5957_v21  ;;  %v5964_v10 = vand.u32 31, %v1064_v28  ;;  %v5967_v23 = vmul.f32 %v5642_v35, %v367_v33  ;;  %v5969_v8 = vsub.s32 %v696_v51, %v699_v1  ;;  %v5972_v15 = vsel %vm1167_vm4, %v1166_v36, 0 }
 0x116   : > { %7935 = vst [vmem:[#allocation11_spill] sm:$0xff] %v5962_v0  ;;  %v4462_v40 = vadd.s32 4294967169, %v1472_v61  ;;  %v404_v37 = vadd.f32 %v388_v24, %v304_v18  ;;  %v625_v30 = vadd.s32 3, %v621_v29  ;;  %v1368_v59 = vshrl.u32 %v1367_v60, 23 }
 0x117   : > { %7936 = vst [vmem:[#allocation12_spill] sm:$0xff] %v5964_v10  ;;  %v617_v46 = vsel %vm534_vm15, %v616_v16, %v615_v48  ;;  %v702_v5 = vsub.s32 0, %v5969_v8  ;;  %v5981_v62 = vand.u32 8388607, %v7880_v41  ;;  %v5984_v51 = vsub.s32 32, %v5957_v21 }
 0x118   : > { %v5974_v14 = vpop.permute.xlu1 %276  ;;  %v5987_v36 = vadd.f32 %v5650_v47, %v503_v55  ;;  %v504_v33 = vadd.f32 %v488_v53, %v404_v37  ;;  %v5990_v61 = vmul.f32 %v5646_v39, %v459_v7  ;;  %v5992_v24 = vshrl.u32 %v1064_v28, 5 }
 0x119   : > { %7937 = vst [vmem:[#allocation13_spill] sm:$0xff] %v5984_v51  ;;  %v5995_v48 = vsub.s32 32, %v5964_v10  ;;  %v5998_v29 = vand.u32 31, %v5972_v15  ;;  %v4431_v60 = vmin.u32 %v702_v5, %v5969_v8  ;;  %v6001_v16 = vadd.s32 1, %v4462_v40 }
 0x11a   : > { %7938 = vst [vmem:[#allocation14_spill] sm:$0xff] %v5987_v36  ;;  %7939 = vst [vmem:[#allocation15_spill] sm:$0xff] %v5992_v24  ;;  %v620_v1 = vsel %vm5905_vm1, %v5656_v52, %v617_v46  ;;  %v6006_v37 = vand.u32 3, %v625_v30  ;;  %v6010_v28 = vshrl.u32 %v7878_v56, %v5946_v19  ;;  %v4458_v18 = vadd.s32 4294967169, %v1368_v59 }
 0x11b   : > { %7940 = vst [vmem:[#allocation16_spill] sm:$0xff] %v5995_v48  ;;  %v692_v55 = vadd.s32 %v5887_v57, %v5876_v49  ;;  %v704_v53 = vclz %v4431_v60  ;;  %v1575_v40 = vand.u32 2139095040, %v5987_v36  ;;  %v6017_v5 = vadd.f32 %v5650_v47, %v504_v33 }
 0x11c   : > { %v757_v30 = vshll.u32 %v7878_v56, %v5929_v26  ;;  %v758_v54 = vshrl.u32 %v7885_v43, %v5946_v19  ;;  %5330 = vcosq.f32 %v620_v1  ;;  %v760_v49 = vshll.u32 %v7885_v43, %v5929_v26 }
 0x11d   : > { %7941 = vst [vmem:[#allocation17_spill] sm:$0xff] %v6017_v5  ;;  %v359_v46 = vpop.permute.xlu1 %358  ;;  %v4432_v59 = vadd.s32 4294967294, %v704_v53  ;;  %v761_v57 = vshrl.u32 %v7890_v27, %v5946_v19  ;;  %v763_v33 = vshll.u32 %v7890_v27, %v5929_v26  ;;  %v7942_v60 = vmov 2102212464  }
 0x11e   : > { %v764_v56 = vshrl.u32 %v7942_v60, %v5946_v19  ;;  %v766_v41 = vshll.u32 %v7942_v60, %v5929_v26  ;;  %v7943_v7 = vmov 920167782   ;;  %v6036_v25 = vadd.s32 1, %v4458_v18 }
 0x11f   : > { %v767_v36 = vshrl.u32 %v7943_v7, %v5946_v19  ;;  %5332 = vsinq.f32 %v620_v1  ;;  %vm4433_vm6 = vcmp.lt.s32.totalorder %v4432_v59, 0  ;;  %v7944_v53 = vmov 1326507024  }
 0x120   : > { %v770_v43 = vshrl.u32 %v7944_v53, %v5946_v19  ;;  %v1576_v13 = vshrl.u32 %v1575_v40, 23  ;;  %v1679_v0 = vand.u32 2139095040, %v6017_v5  ;;  %v389_v27 = vmul.f32 %v5642_v35, %v359_v46  ;;  %v471_v40 = vpop.permute.xlu0 %470 }
 0x121   : > { %v707_v21 = vsel %vm4433_vm6, 0, %v4432_v59  ;;  %v759_v6 = vor.u32 %v758_v54, %v757_v30  ;;  %v762_v24 = vor.u32 %v761_v57, %v760_v49  ;;  %v722_v10 = vsub.s32 4, %v5948_v3 }
 0x122   : > { %v708_v51 = vsub.s32 32, %v707_v21  ;;  %v712_v2 = vsub.s32 4294967266, %v707_v21  ;;  %v765_v48 = vor.u32 %v764_v56, %v763_v33  ;;  %v768_v18 = vor.u32 %v767_v36, %v766_v41 }
 0x123   : > { %v769_v1 = vshll.u32 %v7943_v7, %v5929_v26  ;;  %vm1479_vm7 = vcmp.gt.s32.totalorder %v6001_v16, 0  ;;  %vm1375_vm8 = vcmp.gt.s32.totalorder %v6036_v25, 0  ;;  %v7945_v19 = vand.u32 2147483647, %v5669_v9 }
 0x124   : > { %v709_v30 = vshll.u32 %v5969_v8, %v707_v21  ;;  %v710_v54 = vshrl.u32 %v692_v55, %v708_v51  ;;  %v713_v46 = vadd.s32 127, %v712_v2  ;;  %v4466_v59 = vadd.s32 4294967169, %v1576_v13 }
 0x125   : > { %vm6049_vm9 = vcmp.le.f32.partialorder %v7945_v19, 0.7853982  ;;  %v1680_v56 = vshrl.u32 %v1679_v0, 23  ;;  %v405_v41 = vadd.f32 %v389_v27, %v5806_v11  ;;  %v771_v36 = vor.u32 %v770_v43, %v769_v1 }
 0x126   : > { %v711_v26 = vor.u32 %v710_v54, %v709_v30  ;;  %v714_v49 = vshll.u32 %v713_v46, 23  ;;  %vm772_vm10 = vcmp.lt.s32.totalorder %v5938_v42, 1  ;;  %vm775_vm11 = vcmp.lt.s32.totalorder %v5938_v42, 4  ;;  %v5331_v13 = vpop.eup %5330 }
 0x127   : > { %v723_v57 = vsel %vm638_vm5, %v722_v10, %v5948_v3  ;;  %vm774_vm12 = vcmp.lt.s32.totalorder %v5938_v42, 3  ;;  %v780_v8 = vsel %vm772_vm10, %v759_v6, %v762_v24  ;;  %v781_v2 = vsel %vm775_vm11, %v768_v18, 920167782 }
 0x128   : > { %v715_v21 = vor.u32 4788187, %v714_v49  ;;  %vm773_vm13 = vcmp.lt.s32.totalorder %v5938_v42, 2  ;;  %v782_v27 = vsel %vm774_vm12, %v765_v48, %v781_v2  ;;  %v784_v43 = vsel %vm772_vm10, %v762_v24, %v765_v48 }
 0x129   : > { %v505_v11 = vadd.f32 %v5990_v61, %v405_v41  ;;  %v718_v0 = vcvt.s32.f32 %v711_v26  ;;  %v777_v3 = vsel %vm775_vm11, %v765_v48, 2102212464  ;;  %v785_v10 = vsel %vm775_vm11, %v771_v36, 1326507024  ;;  %v5333_v51 = vpop.eup %5332  ;;  %v6080_v41 = vpop.permute.xlu1 %281 }
 0x12a   : > { %v716_v55 = vand.u32 2147483647, %v715_v21  ;;  %v783_v33 = vsel %vm773_vm13, %v780_v8, %v782_v27  ;;  %v786_v1 = vsel %vm774_vm12, %v768_v18, %v785_v10  ;;  %v7948_v19 = vor.u32 8388608, %v5981_v62 }
 0x12b   : > { %v4470_v54 = vadd.s32 4294967169, %v1680_v56  ;;  %v632_v46 = vxor.u32 2147483648, %v5331_v13  ;;  %v776_v61 = vsel %vm772_vm10, %v6010_v28, %v759_v6  ;;  %v787_v48 = vsel %vm773_vm13, %v784_v43, %v786_v1 }
 0x12c   : > { %v788_v30 = vshll.u32 %v7948_v19, 8  ;;  %vm530_vm15 = vcmp.lt.s32.totalorder %v5760_v63, 67  ;;  %v719_v36 = vmul.f32 %v718_v0, %v716_v55  ;;  %v778_v62 = vsel %vm774_vm12, %v762_v24, %v777_v3 }
 0x12d   : > { %v629_v26 = vxor.u32 2147483648, %v5333_v51  ;;  %v725_v6 = vsel %vm6049_vm9, 0, %v723_v57  ;;  %v6096_v8 = vadd.f32 %v5650_v47, %v505_v11  ;;  %vm624_vm0 = vweird.f32 %v5656_v52  ;;  %v287_v42 = vpop.permute.xlu1 %286 }
 0x12e   : > { %v6086_v18 = vmul.u32.u64.low %v788_v30, %v787_v48  ;;  %v6087_v56 = vmul.u32.u64.high %v788_v30, %v787_v48, %v6086_v18  ;;  %v6091_v28 = vmul.u32.u64.low %v788_v30, %v783_v33  ;;  %v6092_v49 = vmul.u32.u64.high %v788_v30, %v783_v33, %v6091_v28 }
 0x12f   : > { %7949 = vst [vmem:[#allocation18_spill] sm:$0xff] %v6096_v8  ;;  %vm628_vm1 = vcmp.eq.s32.totalorder %v6006_v37, 0  ;;  %vm631_vm2 = vcmp.eq.s32.totalorder %v6006_v37, 2  ;;  %v720_v24 = vxor.u32 2147483648, %v719_v36  ;;  %v1480_v2 = vsel %vm1479_vm7, %v6001_v16, 0  ;;  %vm6149_vm7 = vmand %vm529_vm14, %vm530_vm15 }
 0x130   : > { %v1376_v57 = vsel %vm1375_vm8, %v6036_v25, 0  ;;  %v1582_v21 = vadd.s32 1, %v4466_v59  ;;  %v779_v27 = vsel %vm773_vm13, %v776_v61, %v778_v62  ;;  %v1686_v43 = vadd.s32 1, %v4470_v54 }
 0x131   : > { %v633_v11 = vsel %vm631_vm2, %v632_v46, %v5333_v51  ;;  %v721_v0 = vsel %vm638_vm5, %v720_v24, %v719_v36  ;;  %v729_v3 = vadd.s32 3, %v725_v6  ;;  %v630_v10 = vsel %vm628_vm1, %v5331_v13, %v629_v26  ;;  %v5258_v26 = vld [vmem:[#allocation2 + $0x80] sm:$0xff]  }
 0x132   : > { %v724_v55 = vsel %vm6049_vm9, %v5669_v9, %v721_v0  ;;  %vm797_vm3 = vc.u32 %v6087_v56, %v6091_v28  ;;  %v798_v25 = vadd.s32 1, %v6092_v49  ;;  %v1783_v16 = vand.u32 2139095040, %v6096_v8  ;;  %4820 = vmatprep.subr.bf16.mxu0 %v5258_v26 }
 0x133   : > { %vm627_vm4 = vcmp.lt.s32.totalorder %v6006_v37, 2  ;;  %5334 = vcosq.f32 %v724_v55  ;;  %v795_v59 = vmul.u32 %v788_v30, %v779_v27  ;;  %v6119_v51 = vand.u32 31, %v1480_v2 }
 0x134   : > { %v306_v13 = vmul.f32 %v5638_v32, %v5974_v14  ;;  %5336 = vsinq.f32 %v724_v55  ;;  %v799_v33 = vsel %vm797_vm3, %v798_v25, %v6092_v49  ;;  %v6125_v1 = vshrl.u32 %v5972_v15, 5 }
 0x135   : > { %7950 = vst [vmem:[#allocation19_spill] sm:$0xff] %v6119_v51  ;;  %v6127_v19 = vand.u32 31, %v1376_v57  ;;  %v634_v54 = vsel %vm627_vm4, %v630_v10, %v633_v11  ;;  %v800_v46 = vadd.s32 %v799_v33, %v795_v59  ;;  %v6130_v37 = vsub.s32 32, %v5998_v29 }
 0x136   : > { %7951 = vst [vmem:[#allocation20_spill] sm:$0xff] %v6125_v1  ;;  %vm1583_vm5 = vcmp.gt.s32.totalorder %v1582_v21, 0  ;;  %vm1687_vm6 = vcmp.gt.s32.totalorder %v1686_v43, 0  ;;  %v730_v30 = vand.u32 3, %v729_v3  ;;  %v6132_v61 = vshrl.u32 %v1480_v2, 5 }
 0x137   : > { %7952 = vst [vmem:[#allocation21_spill] sm:$0xff] %v6127_v19  ;;  %v1784_v14 = vshrl.u32 %v1783_v16, 23  ;;  %v6135_v48 = vmul.f32 %v5646_v39, %v471_v40  ;;  %v801_v36 = vadd.s32 536870912, %v800_v46  ;;  %v6138_v15 = vsub.s32 32, %v6119_v51 }
 0x138   : > { %7953 = vst [vmem:[#allocation22_spill] sm:$0xff] %v6132_v61  ;;  %v6140_v62 = vshrl.u32 %v1376_v57, 5  ;;  %v6143_v18 = vadd.f32 %v5943_v31, %v306_v13  ;;  %v635_v6 = vsel %vm624_vm0, nan, %v634_v54  ;;  %v6156_v49 = vsub.s32 32, %v6127_v19  ;;  %v371_v31 = vpop.permute.xlu1 %370 }
 0x139   : > { %7954 = vst [vmem:[#allocation23_spill] sm:$0xff] %v6138_v15  ;;  %v6158_v24 = vsel %vm1583_vm5, %v1582_v21, 0  ;;  %v6160_v2 = vsel %vm1687_vm6, %v1686_v43, 0  ;;  %vm742_vm8 = vcmp.lt.s32.totalorder %v5767_v58, 0  ;;  %v802_v57 = vshrl.u32 %v801_v36, 30 }
 0x13a   : > { %7955 = vst [vmem:[#allocation24_spill] sm:$0xff] %v6140_v62  ;;  %7958 = vst [vmem:[#allocation25_spill] sm:$0xff] %v6156_v49  ;;  %vm728_vm9 = vweird.f32 %v5669_v9  ;;  %vm731_vm10 = vcmp.lt.s32.totalorder %v730_v30, 2  ;;  %vm732_vm11 = vcmp.eq.s32.totalorder %v730_v30, 0  ;;  %vm735_vm12 = vcmp.eq.s32.totalorder %v730_v30, 2 }
 0x13b   : > { %v6165_v27 = vmul.f32 %v5638_v32, %v287_v42  ;;  %v6167_v11 = vadd.s32 4294967169, %v1784_v14  ;;  %v2198_v21 = vsel %vm6149_vm7, %v5656_v52, %v635_v6  ;;  %v803_v43 = vshll.u32 %v802_v57, 30 }
 0x13c   : > { %v868_v0 = vshrl.u32 %v7942_v60, %v5921_v38  ;;  %v6175_v3 = vmul.f32 %v5642_v35, %v371_v31  ;;  %v852_v10 = vor.u32 8388608, %v5796_v4  ;;  %v7959_v55 = vmov 2475754826  }
 0x13d   : > { %v862_v25 = vshrl.u32 %v7959_v55, %v5921_v38  ;;  %v7960_v16 = vmov 2131351028   ;;  %v5335_v59 = vpop.eup %5334  ;;  %v7961_v13 = vand.u32 2147483647, %v5767_v58  ;;  %v6188_v40 = vsub.s32 %v800_v46, %v803_v43 }
 0x13e   : > { %v865_v42 = vshrl.u32 %v7960_v16, %v5921_v38  ;;  %v7964_v35 = vmov 683565275   ;;  %v867_v4 = vshll.u32 %v7960_v16, %v5834_v44  ;;  %v871_v54 = vshrl.u32 %v7943_v7, %v5921_v38  ;;  %v5337_v14 = vpop.eup %5336 }
 0x13f   : > { %vm6184_vm13 = vcmp.le.f32.partialorder %v7961_v13, 0.7853982  ;;  %v861_v33 = vshll.u32 %v7964_v35, %v5834_v44  ;;  %v736_v36 = vxor.u32 2147483648, %v5335_v59  ;;  %v826_v6 = vsub.s32 4, %v802_v57 }
 0x140   : > { %v864_v31 = vshll.u32 %v7959_v55, %v5834_v44  ;;  %v870_v13 = vshll.u32 %v7942_v60, %v5834_v44  ;;  %v733_v46 = vxor.u32 2147483648, %v5337_v14  ;;  %v806_v43 = vsub.s32 0, %v6188_v40 }
 0x141   : > { %v869_v63 = vor.u32 %v868_v0, %v867_v4  ;;  %v874_v8 = vshrl.u32 %v7944_v53, %v5921_v38  ;;  %v737_v5 = vsel %vm735_vm12, %v736_v36, %v5337_v14  ;;  %v860_v61 = vshrl.u32 %v7964_v35, %v5921_v38 }
 0x142   : > { %v863_v15 = vor.u32 %v862_v25, %v861_v33  ;;  %v866_v51 = vor.u32 %v865_v42, %v864_v31  ;;  %v734_v62 = vsel %vm732_vm11, %v5335_v59, %v733_v46  ;;  %v4435_v19 = vmin.u32 %v806_v43, %v6188_v40 }
 0x143   : > { %v872_v49 = vor.u32 %v871_v54, %v870_v13  ;;  %v873_v1 = vshll.u32 %v7943_v7, %v5834_v44  ;;  %v738_v0 = vsel %vm731_vm10, %v734_v62, %v737_v5  ;;  %v827_v4 = vsel %vm742_vm8, %v826_v6, %v802_v57 }
 0x144   : > { %vm876_vm14 = vcmp.lt.s32.totalorder %v5916_v22, 1  ;;  %vm879_vm15 = vcmp.lt.s32.totalorder %v5916_v22, 4  ;;  %v739_v38 = vsel %vm728_vm9, nan, %v738_v0  ;;  %v808_v25 = vclz %v4435_v19 }
 0x145   : > { %v875_v42 = vor.u32 %v874_v8, %v873_v1  ;;  %v881_v59 = vsel %vm879_vm15, %v869_v63, 2102212464  ;;  %v2199_v44 = vsel %vm6149_vm7, %v5669_v9, %v739_v38  ;;  %vm878_vm0 = vcmp.lt.s32.totalorder %v5916_v22, 3 }
 0x146   : > { %v880_v5 = vsel %vm876_vm14, %v860_v61, %v863_v15  ;;  %v884_v30 = vsel %vm876_vm14, %v863_v15, %v866_v51  ;;  %v2214_v62 = vpack.c.bf16 %v2199_v44, %v2198_v21  ;;  %v4436_v57 = vadd.s32 4294967294, %v808_v25 }
 0x147   : > { %v882_v8 = vsel %vm878_vm0, %v866_v51, %v881_v59  ;;  %v885_v1 = vsel %vm879_vm15, %v872_v49, 920167782  ;;  %v796_v19 = vadd.s32 %v6091_v28, %v6087_v56  ;;  %v829_v9 = vsel %vm6184_vm13, 0, %v827_v4 }
 0x148   : > { %vm877_vm1 = vcmp.lt.s32.totalorder %v5916_v22, 2  ;;  %v886_v61 = vsel %vm878_vm0, %v869_v63, %v885_v1  ;;  %4772 = vmatprep.mubr.bf16.mxu0 %v2214_v62  ;;  %vm4437_vm2 = vcmp.lt.s32.totalorder %v4436_v57, 0  ;;  %v888_v21 = vsel %vm876_vm14, %v866_v51, %v869_v63 }
 0x149   : > { %v887_v15 = vsel %vm877_vm1, %v884_v30, %v886_v61  ;;  %v889_v33 = vsel %vm879_vm15, %v875_v42, 1326507024  ;;  %v811_v54 = vsel %vm4437_vm2, 0, %v4436_v57  ;;  %v883_v14 = vsel %vm877_vm1, %v880_v5, %v882_v8 }
 0x14a   : > { %v890_v56 = vsel %vm878_vm0, %v872_v49, %v889_v33  ;;  %v892_v28 = vshll.u32 %v852_v10, 8  ;;  %v812_v36 = vsub.s32 32, %v811_v54  ;;  %v816_v6 = vsub.s32 4294967266, %v811_v54 }
 0x14b   : > { %v891_v31 = vsel %vm877_vm1, %v888_v21, %v890_v56  ;;  %v7919_v13 = vand.u32 2147483647, %v5732_v20  ;;  %v6253_v63 = vand.u32 31, %v6158_v24  ;;  %v813_v51 = vshll.u32 %v6188_v40, %v811_v54 }
 0x14c   : > { %v6245_v46 = vmul.u32.u64.low %v892_v28, %v891_v31  ;;  %v6246_v43 = vmul.u32.u64.high %v892_v28, %v891_v31, %v6245_v46  ;;  %v6248_v0 = vmul.u32.u64.low %v892_v28, %v887_v15  ;;  %v6249_v4 = vmul.u32.u64.high %v892_v28, %v887_v15, %v6248_v0 }
 0x14d   : > { %v814_v22 = vshrl.u32 %v796_v19, %v812_v36  ;;  %v817_v49 = vadd.s32 127, %v816_v6  ;;  %v6257_v10 = vand.u32 31, %v6160_v2  ;;  %v6260_v38 = vadd.s32 1, %v6167_v11 }
 0x14e   : > { %v6264_v25 = vmul.f32 %v5638_v32, %v6080_v41  ;;  %v408_v42 = vadd.f32 %v6175_v3, %v6165_v27  ;;  %v6268_v5 = vadd.s32 3, %v829_v9  ;;  %v899_v40 = vmul.u32 %v892_v28, %v883_v14 }
 0x14f   : > { %v815_v59 = vor.u32 %v814_v22, %v813_v51  ;;  %v818_v44 = vshll.u32 %v817_v49, 23  ;;  %vm901_vm3 = vc.u32 %v6246_v43, %v6248_v0  ;;  %v902_v30 = vadd.s32 1, %v6249_v4 }
 0x150   : > { %v955_v11 = vand.u32 8388607, %v7919_v13  ;;  %v966_v32 = vshrl.u32 %v7959_v55, %v5927_v34  ;;  %v965_v27 = vshll.u32 %v7964_v35, %v5891_v45  ;;  %v968_v3 = vshll.u32 %v7959_v55, %v5891_v45 }
 0x151   : > { %v819_v41 = vor.u32 4788187, %v818_v44  ;;  %v969_v62 = vshrl.u32 %v7960_v16, %v5927_v34  ;;  %v822_v57 = vcvt.s32.f32 %v815_v59  ;;  %v903_v8 = vsel %vm901_vm3, %v902_v30, %v6249_v4 }
 0x152   : > { %v971_v1 = vshll.u32 %v7960_v16, %v5891_v45  ;;  %v972_v19 = vshrl.u32 %v7942_v60, %v5927_v34  ;;  %v904_v61 = vadd.s32 %v903_v8, %v899_v40  ;;  %v974_v15 = vshll.u32 %v7942_v60, %v5891_v45  ;;  %v463_v8 = vpop.permute.xlu1 %462 }
 0x153   : > { %v820_v9 = vand.u32 2147483647, %v819_v41  ;;  %v975_v21 = vshrl.u32 %v7943_v7, %v5927_v34  ;;  %v967_v33 = vor.u32 %v966_v32, %v965_v27  ;;  %v970_v54 = vor.u32 %v969_v62, %v968_v3 }
 0x154   : > { %v977_v14 = vshll.u32 %v7943_v7, %v5891_v45  ;;  %v978_v56 = vshrl.u32 %v7944_v53, %v5927_v34  ;;  %vm846_vm4 = vcmp.lt.s32.totalorder %v5707_v50, 0  ;;  %v905_v36 = vadd.s32 536870912, %v904_v61 }
 0x155   : > { %v823_v28 = vmul.f32 %v822_v57, %v820_v9  ;;  %v973_v6 = vor.u32 %v972_v19, %v971_v1  ;;  %v976_v31 = vor.u32 %v975_v21, %v974_v15  ;;  %vm1791_vm5 = vcmp.gt.s32.totalorder %v6260_v38, 0 }
 0x156   : > { %v956_v46 = vor.u32 8388608, %v955_v11  ;;  %v964_v4 = vshrl.u32 %v7964_v35, %v5927_v34  ;;  %v979_v51 = vor.u32 %v978_v56, %v977_v14  ;;  %vm980_vm6 = vcmp.lt.s32.totalorder %v5924_v12, 1 }
 0x157   : > { %v824_v22 = vxor.u32 2147483648, %v823_v28  ;;  %v906_v45 = vshrl.u32 %v905_v36, 30  ;;  %vm981_vm9 = vcmp.lt.s32.totalorder %v5924_v12, 2  ;;  %vm983_vm10 = vcmp.lt.s32.totalorder %v5924_v12, 4 }
 0x158   : > { %v7965_v49 = vand.u32 2147483647, %v5707_v50  ;;  %vm982_vm12 = vcmp.lt.s32.totalorder %v5924_v12, 3  ;;  %v988_v34 = vsel %vm980_vm6, %v967_v33, %v970_v54  ;;  %v989_v44 = vsel %vm983_vm10, %v976_v31, 920167782 }
 0x159   : > { %v993_v40 = vsel %vm983_vm10, %v979_v51, 1326507024  ;;  %v825_v30 = vsel %vm742_vm8, %v824_v22, %v823_v28  ;;  %v907_v11 = vshll.u32 %v906_v45, 30  ;;  %v985_v32 = vsel %vm983_vm10, %v973_v6, 2102212464 }
 0x15a   : > { %vm6305_vm11 = vcmp.le.f32.partialorder %v7965_v49, 0.7853982  ;;  %v992_v41 = vsel %vm980_vm6, %v970_v54, %v973_v6  ;;  %v828_v27 = vsel %vm6184_vm13, %v5767_v58, %v825_v30  ;;  %v930_v3 = vsub.s32 4, %v906_v45 }
 0x15b   : > { %v990_v62 = vsel %vm982_vm12, %v973_v6, %v989_v44  ;;  %v994_v57 = vsel %vm982_vm12, %v976_v31, %v993_v40  ;;  %5338 = vcosq.f32 %v828_v27  ;;  %v6323_v1 = vsub.s32 %v904_v61, %v907_v11  ;;  %v7970_v11 = vld [vmem:[#allocation16_spill] sm:$0xff] }
 0x15c   : > { %v991_v19 = vsel %vm981_vm9, %v988_v34, %v990_v62  ;;  %v996_v9 = vshll.u32 %v956_v46, 8  ;;  %v508_v15 = vadd.f32 %v6135_v48, %v408_v42  ;;  %5340 = vsinq.f32 %v828_v27 }
 0x15d   : > { %v984_v52 = vsel %vm980_vm6, %v964_v4, %v967_v33  ;;  %v995_v21 = vsel %vm981_vm9, %v992_v41, %v994_v57  ;;  %v910_v14 = vsub.s32 0, %v6323_v1  ;;  %v986_v56 = vsel %vm982_vm12, %v970_v54, %v985_v32 }
 0x15e   : > { %v6335_v61 = vmul.u32.u64.low %v996_v9, %v995_v21  ;;  %v6336_v28 = vmul.u32.u64.high %v996_v9, %v995_v21, %v6335_v61  ;;  %v490_v36 = vmul.f32 %v5646_v39, %v463_v8  ;;  %v931_v48 = vsel %vm846_vm4, %v930_v3, %v906_v45  ;;  %v7971_v3 = vld [vmem:[#allocation12_spill] sm:$0xff] }
 0x15f   : > { %v6341_v42 = vmul.u32.u64.low %v996_v9, %v991_v19  ;;  %v6342_v6 = vmul.u32.u64.high %v996_v9, %v991_v19, %v6341_v42  ;;  %v6346_v33 = vshrl.u32 %v6158_v24, 5  ;;  %v6349_v31 = vsub.s32 32, %v6253_v63 }
 0x160   : > { %v6352_v54 = vand.u32 3, %v6268_v5  ;;  %v4439_v46 = vmin.u32 %v910_v14, %v6323_v1  ;;  %v6356_v4 = vshrl.u32 %v6160_v2, 5  ;;  %v6360_v51 = vadd.f32 %v5967_v23, %v6264_v25 }
 0x161   : > { %v987_v22 = vsel %vm981_vm9, %v984_v52, %v986_v56  ;;  %v7918_v24 = vand.u32 2147483647, %v5827_v17  ;;  %v6366_v45 = vsub.s32 32, %v6257_v10  ;;  %v6371_v5 = vsel %vm1791_vm5, %v6260_v38, 0 }
 0x162   : > { %7968 = vst [vmem:[#allocation26_spill] sm:$0xff] %v6356_v4  ;;  %v912_v49 = vclz %v4439_v46  ;;  %v933_v2 = vsel %vm6305_vm11, 0, %v931_v48  ;;  %v6376_v23 = vadd.f32 %v5650_v47, %v508_v15  ;;  %v6379_v12 = vadd.f32 %v490_v36, %v6143_v18 }
 0x163   : > { %7969 = vst [vmem:[#allocation27_spill] sm:$0xff] %v6366_v45  ;;  %vm1005_vm8 = vc.u32 %v6336_v28, %v6341_v42  ;;  %v1006_v25 = vadd.s32 1, %v6342_v6  ;;  %vm836_vm13 = vcmp.eq.s32.totalorder %v6352_v54, 0  ;;  %vm839_vm14 = vcmp.eq.s32.totalorder %v6352_v54, 2 }
 0x164   : > { %v900_v38 = vadd.s32 %v6248_v0, %v6246_v43  ;;  %v4440_v34 = vadd.s32 4294967294, %v912_v49  ;;  %v1003_v44 = vmul.u32 %v996_v9, %v987_v22  ;;  %v6388_v40 = vadd.s32 3, %v933_v2 }
 0x165   : > { %v1007_v30 = vsel %vm1005_vm8, %v1006_v25, %v6342_v6  ;;  %v1059_v18 = vand.u32 8388607, %v7918_v24  ;;  %v1068_v32 = vshrl.u32 %v7964_v35, %v7970_v11  ;;  %v5339_v41 = vpop.eup %5338  ;;  %v1069_v62 = vshll.u32 %v7964_v35, %v7971_v3 }
 0x166   : > { %vm4441_vm15 = vcmp.lt.s32.totalorder %v4440_v34, 0  ;;  %v1008_v27 = vadd.s32 %v1007_v30, %v1003_v44  ;;  %v1070_v43 = vshrl.u32 %v7959_v55, %v7970_v11  ;;  %v5341_v0 = vpop.eup %5340  ;;  %v1072_v8 = vshll.u32 %v7959_v55, %v7971_v3 }
 0x167   : > { %v915_v57 = vsel %vm4441_vm15, 0, %v4440_v34  ;;  %v1073_v19 = vshrl.u32 %v7960_v16, %v7970_v11  ;;  %v1076_v9 = vshrl.u32 %v7942_v60, %v7970_v11  ;;  %v1075_v21 = vshll.u32 %v7960_v16, %v7971_v3 }
 0x168   : > { %v916_v15 = vsub.s32 32, %v915_v57  ;;  %v920_v52 = vsub.s32 4294967266, %v915_v57  ;;  %v1079_v14 = vshrl.u32 %v7943_v7, %v7970_v11  ;;  %v837_v56 = vxor.u32 2147483648, %v5341_v0 }
 0x169   : > { %v840_v61 = vxor.u32 2147483648, %v5339_v41  ;;  %v1009_v36 = vadd.s32 536870912, %v1008_v27  ;;  %v1078_v48 = vshll.u32 %v7942_v60, %v7971_v3  ;;  %v917_v6 = vshll.u32 %v6323_v1, %v915_v57 }
 0x16a   : > { %v918_v46 = vshrl.u32 %v900_v38, %v916_v15  ;;  %v921_v22 = vadd.s32 127, %v920_v52  ;;  %v1082_v49 = vshrl.u32 %v7944_v53, %v7970_v11  ;;  %v1071_v25 = vor.u32 %v1070_v43, %v1069_v62  ;;  %v7972_v52 = vld [vmem:[#allocation15_spill] sm:$0xff] }
 0x16b   : > { %v1010_v2 = vshrl.u32 %v1009_v36, 30  ;;  %v1074_v34 = vor.u32 %v1073_v19, %v1072_v8  ;;  %v1077_v44 = vor.u32 %v1076_v9, %v1075_v21  ;;  %v1080_v13 = vor.u32 %v1079_v14, %v1078_v48  ;;  %v467_v19 = vpop.permute.xlu1 %466 }
 0x16c   : > { %v919_v30 = vor.u32 %v918_v46, %v917_v6  ;;  %v922_v24 = vshll.u32 %v921_v22, 23  ;;  %v1081_v4 = vshll.u32 %v7943_v7, %v7971_v3  ;;  %v838_v45 = vsel %vm836_vm13, %v5339_v41, %v837_v56 }
 0x16d   : > { %v841_v1 = vsel %vm839_vm14, %v840_v61, %v5341_v0  ;;  %v1011_v38 = vshll.u32 %v1010_v2, 30  ;;  %v1060_v57 = vor.u32 8388608, %v1059_v18  ;;  %vm1084_vm0 = vcmp.lt.s32.totalorder %v7972_v52, 1 }
 0x16e   : > { %v923_v15 = vor.u32 4788187, %v922_v24  ;;  %v1083_v11 = vor.u32 %v1082_v49, %v1081_v4  ;;  %vm1085_vm1 = vcmp.lt.s32.totalorder %v7972_v52, 2  ;;  %vm1086_vm2 = vcmp.lt.s32.totalorder %v7972_v52, 3 }
 0x16f   : > { %v6422_v62 = vsub.s32 %v1008_v27, %v1011_v38  ;;  %vm1087_vm3 = vcmp.lt.s32.totalorder %v7972_v52, 4  ;;  %v1092_v41 = vsel %vm1084_vm0, %v1071_v25, %v1074_v34  ;;  %v926_v43 = vcvt.s32.f32 %v919_v30 }
 0x170   : > { %v924_v3 = vand.u32 2147483647, %v923_v15  ;;  %v1089_v0 = vsel %vm1087_vm3, %v1077_v44, 2102212464  ;;  %v1093_v8 = vsel %vm1087_vm3, %v1080_v13, 920167782  ;;  %vm832_vm5 = vweird.f32 %v5767_v58 }
 0x171   : > { %v1014_v4 = vsub.s32 0, %v6422_v62  ;;  %v1034_v24 = vsub.s32 4, %v1010_v2  ;;  %v1094_v18 = vsel %vm1086_vm2, %v1077_v44, %v1093_v8  ;;  %v1096_v27 = vsel %vm1084_vm0, %v1074_v34, %v1077_v44 }
 0x172   : > { %v927_v9 = vmul.f32 %v926_v43, %v924_v3  ;;  %v1095_v21 = vsel %vm1085_vm1, %v1092_v41, %v1094_v18  ;;  %v1097_v14 = vsel %vm1087_vm3, %v1083_v11, 1326507024  ;;  %v1100_v56 = vshll.u32 %v1060_v57, 8 }
 0x173   : > { %v4443_v61 = vmin.u32 %v1014_v4, %v6422_v62  ;;  %v1088_v36 = vsel %vm1084_vm0, %v1068_v32, %v1071_v25  ;;  %v1090_v48 = vsel %vm1086_vm2, %v1074_v34, %v1089_v0  ;;  %v1098_v6 = vsel %vm1086_vm2, %v1080_v13, %v1097_v14 }
 0x174   : > { %v928_v46 = vxor.u32 2147483648, %v927_v9  ;;  %v1099_v22 = vsel %vm1085_vm1, %v1096_v27, %v1098_v6  ;;  %v6445_v49 = vmul.u32.u64.low %v1100_v56, %v1095_v21  ;;  %v6446_v44 = vmul.u32.u64.high %v1100_v56, %v1095_v21, %v6445_v49 }
 0x175   : > { %v6451_v30 = vadd.f32 %v5650_v47, %v6379_v12  ;;  %v6454_v32 = vmul.f32 %v5646_v39, %v467_v19  ;;  %vm835_vm6 = vcmp.lt.s32.totalorder %v6352_v54, 2  ;;  %v1016_v25 = vclz %v4443_v61 }
 0x176   : > { %v929_v13 = vsel %vm846_vm4, %v928_v46, %v927_v9  ;;  %vm950_vm9 = vcmp.lt.s32.totalorder %v5732_v20, 0  ;;  %v6460_v34 = vmul.u32.u64.low %v1100_v56, %v1099_v22  ;;  %v6461_v38 = vmul.u32.u64.high %v1100_v56, %v1099_v22, %v6460_v34 }
 0x177   : > { %v842_v57 = vsel %vm835_vm6, %v838_v45, %v841_v1  ;;  %v932_v12 = vsel %vm6305_vm11, %v5707_v50, %v929_v13  ;;  %v4444_v15 = vadd.s32 4294967294, %v1016_v25  ;;  %v1091_v39 = vsel %vm1085_vm1, %v1088_v36, %v1090_v48 }
 0x178   : > { %5342 = vcosq.f32 %v932_v12  ;;  %v6469_v54 = vand.u32 3, %v6388_v40  ;;  %v1035_v11 = vsel %vm950_vm9, %v1034_v24, %v1010_v2  ;;  %v1110_v41 = vadd.s32 1, %v6446_v44 }
 0x179   : > { %5344 = vsinq.f32 %v932_v12  ;;  %v7973_v45 = vand.u32 2147483647, %v5732_v20  ;;  %v1004_v59 = vadd.s32 %v6341_v42, %v6336_v28  ;;  %vm4445_vm10 = vcmp.lt.s32.totalorder %v4444_v15, 0  ;;  %v7976_v42 = vld [vmem:[#allocation7_spill] sm:$0xff] }
 0x17a   : > { %v6484_v40 = vsel %vm832_vm5, nan, %v842_v57  ;;  %v1019_v52 = vsel %vm4445_vm10, 0, %v4444_v15  ;;  %v1107_v3 = vmul.u32 %v1100_v56, %v1091_v39  ;;  %vm1109_vm11 = vc.u32 %v6461_v38, %v6445_v49 }
 0x17b   : > { %vm6476_vm4 = vcmp.le.f32.partialorder %v7973_v45, 0.7853982  ;;  %v1020_v2 = vsub.s32 32, %v1019_v52  ;;  %v1024_v43 = vsub.s32 4294967266, %v1019_v52  ;;  %v1111_v8 = vsel %vm1109_vm11, %v1110_v41, %v6446_v44 }
 0x17c   : > { %v1037_v0 = vsel %vm6476_vm4, 0, %v1035_v11  ;;  %v1887_v4 = vand.u32 2139095040, %v6451_v30  ;;  %vm943_vm12 = vcmp.eq.s32.totalorder %v6469_v54, 2  ;;  %v1112_v28 = vadd.s32 %v1111_v8, %v1107_v3 }
 0x17d   : > { %v1156_v24 = vand.u32 2147483647, %v7976_v42  ;;  %vm940_vm8 = vcmp.eq.s32.totalorder %v6469_v54, 0  ;;  %v1021_v18 = vshll.u32 %v6422_v62, %v1019_v52  ;;  %v1022_v27 = vshrl.u32 %v1004_v59, %v1020_v2 }
 0x17e   : > { %v1025_v19 = vadd.s32 127, %v1024_v43  ;;  %v1174_v9 = vshrl.u32 %v7959_v55, %v6130_v37  ;;  %vm939_vm13 = vcmp.lt.s32.totalorder %v6469_v54, 2  ;;  %v2200_v21 = vsel %vm6149_vm7, %v5767_v58, %v6484_v40 }
 0x17f   : > { %v6503_v14 = vadd.s32 3, %v1037_v0  ;;  %v1113_v56 = vadd.s32 536870912, %v1112_v28  ;;  %v1177_v61 = vshrl.u32 %v7960_v16, %v6130_v37  ;;  %vm936_vm14 = vweird.f32 %v5707_v50 }
 0x180   : > { %v1023_v62 = vor.u32 %v1022_v27, %v1021_v18  ;;  %v1026_v36 = vshll.u32 %v1025_v19, 23  ;;  %v1173_v48 = vshll.u32 %v7964_v35, %v5998_v29  ;;  %v1183_v6 = vshrl.u32 %v7943_v7, %v6130_v37 }
 0x181   : > { %v1114_v46 = vshrl.u32 %v1113_v56, 30  ;;  %v1172_v58 = vshrl.u32 %v7964_v35, %v6130_v37  ;;  %v1176_v22 = vshll.u32 %v7959_v55, %v5998_v29  ;;  %v1180_v44 = vshrl.u32 %v7942_v60, %v6130_v37 }
 0x182   : > { %v1027_v25 = vor.u32 4788187, %v1026_v36  ;;  %v1163_v13 = vand.u32 8388607, %v1156_v24  ;;  %v1175_v34 = vor.u32 %v1174_v9, %v1173_v48  ;;  %v1182_v57 = vshll.u32 %v7942_v60, %v5998_v29  ;;  %v5343_v12 = vpop.eup %5342 }
 0x183   : > { %v1115_v15 = vshll.u32 %v1114_v46, 30  ;;  %v1178_v39 = vor.u32 %v1177_v61, %v1176_v22  ;;  %v1179_v11 = vshll.u32 %v7960_v16, %v5998_v29  ;;  %v1186_v41 = vshrl.u32 %v7944_v53, %v6130_v37  ;;  %v5345_v45 = vpop.eup %5344  ;;  %v7977_v37 = vld [vmem:[#allocation20_spill] sm:$0xff] }
 0x184   : > { %v944_v59 = vxor.u32 2147483648, %v5343_v12  ;;  %v1028_v40 = vand.u32 2147483647, %v1027_v25  ;;  %v1030_v52 = vcvt.s32.f32 %v1023_v62  ;;  %v1184_v3 = vor.u32 %v1183_v6, %v1182_v57 }
 0x185   : > { %v941_v2 = vxor.u32 2147483648, %v5345_v45  ;;  %vm1054_vm15 = vcmp.lt.s32.totalorder %v5827_v17, 0  ;;  %v6527_v43 = vsub.s32 %v1112_v28, %v1115_v15  ;;  %v1181_v0 = vor.u32 %v1180_v44, %v1179_v11 }
 0x186   : > { %v1185_v8 = vshll.u32 %v7943_v7, %v5998_v29  ;;  %v945_v18 = vsel %vm943_vm12, %v944_v59, %v5345_v45  ;;  %v1031_v27 = vmul.f32 %v1030_v52, %v1028_v40  ;;  %v1164_v19 = vor.u32 8388608, %v1163_v13 }
 0x187   : > { %vm1188_vm0 = vcmp.lt.s32.totalorder %v7977_v37, 1  ;;  %v942_v9 = vsel %vm940_vm8, %v5343_v12, %v941_v2  ;;  %v1118_v56 = vsub.s32 0, %v6527_v43  ;;  %vm1191_vm1 = vcmp.lt.s32.totalorder %v7977_v37, 4 }
 0x188   : > { %v1187_v61 = vor.u32 %v1186_v41, %v1185_v8  ;;  %v946_v28 = vsel %vm939_vm13, %v942_v9, %v945_v18  ;;  %v1032_v62 = vxor.u32 2147483648, %v1031_v27  ;;  %vm1190_vm2 = vcmp.lt.s32.totalorder %v7977_v37, 3 }
 0x189   : > { %v1197_v29 = vsel %vm1191_vm1, %v1184_v3, 920167782  ;;  %v947_v36 = vsel %vm936_vm14, nan, %v946_v28  ;;  %v4447_v48 = vmin.u32 %v1118_v56, %v6527_v43  ;;  %v1196_v6 = vsel %vm1188_vm0, %v1175_v34, %v1178_v39 }
 0x18a   : > { %v1198_v22 = vsel %vm1190_vm2, %v1181_v0, %v1197_v29  ;;  %v2201_v54 = vsel %vm6149_vm7, %v5707_v50, %v947_v36  ;;  %v1033_v44 = vsel %vm950_vm9, %v1032_v62, %v1031_v27  ;;  %v1138_v25 = vsub.s32 4, %v1114_v46  ;;  %v7981_v62 = vld [vmem:[#allocation6_spill] sm:$0xff] }
 0x18b   : > { %vm1189_vm3 = vcmp.lt.s32.totalorder %v7977_v37, 2  ;;  %v2215_v13 = vpack.c.bf16 %v2201_v54, %v2200_v21  ;;  %v1036_v57 = vsel %vm6476_vm4, %v5732_v20, %v1033_v44  ;;  %v1120_v12 = vclz %v4447_v48  ;;  %v7983_v54 = vld [vmem:[#allocation10_spill] sm:$0xff] }
 0x18c   : > { %v1200_v15 = vsel %vm1188_vm0, %v1178_v39, %v1181_v0  ;;  %5346 = vcosq.f32 %v1036_v57  ;;  %v1193_v11 = vsel %vm1191_vm1, %v1181_v0, 2102212464  ;;  %v1199_v50 = vsel %vm1189_vm3, %v1196_v6, %v1198_v22 }
 0x18d   : > { %v1201_v41 = vsel %vm1191_vm1, %v1187_v61, 1326507024  ;;  %4773 = vmatmul.mubr.bf16.vlgmr.msra.gmra.mrb[0].mxu0 %v2215_v13  ;;  %5348 = vsinq.f32 %v1036_v57  ;;  %v4448_v21 = vadd.s32 4294967294, %v1120_v12  ;;  %v1204_v45 = vshll.u32 %v1164_v19, 8 }
 0x18e   : > { %v1202_v1 = vsel %vm1190_vm2, %v1184_v3, %v1201_v41  ;;  %v7978_v59 = vand.u32 2147483647, %v5827_v17  ;;  %v1139_v52 = vsel %vm1054_vm15, %v1138_v25, %v1114_v46  ;;  %v1192_v2 = vsel %vm1188_vm0, %v1172_v58, %v1175_v34  ;;  %4821 = vmatpush3.bf16.msra.mxu0 %v5258_v26 }
 0x18f   : > { %v1203_v0 = vsel %vm1189_vm3, %v1200_v15, %v1202_v1  ;;  %vm4449_vm6 = vcmp.lt.s32.totalorder %v4448_v21, 0  ;;  %v1194_v3 = vsel %vm1190_vm2, %v1178_v39, %v1193_v11  ;;  %v6587_v27 = vand.u32 3, %v6503_v14 }
 0x190   : > { %vm6571_vm5 = vcmp.le.f32.partialorder %v7978_v59, 0.7853982  ;;  %v6583_v8 = vmul.u32.u64.low %v1204_v45, %v1203_v0  ;;  %v6584_v18 = vmul.u32.u64.high %v1204_v45, %v1203_v0, %v6583_v8  ;;  %v1123_v19 = vsel %vm4449_vm6, 0, %v4448_v21 }
 0x191   : > { %v6589_v9 = vmul.u32.u64.low %v1204_v45, %v1199_v50  ;;  %v6590_v56 = vmul.u32.u64.high %v1204_v45, %v1199_v50, %v6589_v9  ;;  %v1108_v46 = vadd.s32 %v6445_v49, %v6461_v38  ;;  %v1124_v58 = vsub.s32 32, %v1123_v19  ;;  %v7982_v49 = vld [vmem:[#allocation13_spill] sm:$0xff] }
 0x192   : > { %v1128_v34 = vsub.s32 4294967266, %v1123_v19  ;;  %v1141_v61 = vsel %vm6571_vm5, 0, %v1139_v52  ;;  %v6599_v39 = vadd.f32 %v6454_v32, %v6360_v51  ;;  %v1125_v14 = vshll.u32 %v6527_v43, %v1123_v19 }
 0x193   : > { %v1195_v28 = vsel %vm1189_vm3, %v1192_v2, %v1194_v3  ;;  %v1260_v29 = vand.u32 2147483647, %v7981_v62  ;;  %v1126_v36 = vshrl.u32 %v1108_v46, %v1124_v58  ;;  %vm1213_vm9 = vc.u32 %v6584_v18, %v6589_v9 }
 0x194   : > { %v1129_v48 = vadd.s32 127, %v1128_v34  ;;  %v1278_v38 = vshrl.u32 %v7959_v55, %v7982_v49  ;;  %v6611_v6 = vshrl.u32 %v1887_v4, 23  ;;  %vm1047_vm4 = vcmp.eq.s32.totalorder %v6587_v27, 2 }
 0x195   : > { %v1145_v51 = vadd.s32 3, %v1141_v61  ;;  %v1214_v32 = vadd.s32 1, %v6590_v56  ;;  %vm1044_vm10 = vcmp.eq.s32.totalorder %v6587_v27, 0  ;;  %v1127_v43 = vor.u32 %v1126_v36, %v1125_v14 }
 0x196   : > { %v1130_v37 = vshll.u32 %v1129_v48, 23  ;;  %v1211_v22 = vmul.u32 %v1204_v45, %v1195_v28  ;;  %v1277_v44 = vshll.u32 %v7964_v35, %v7983_v54  ;;  %v5347_v25 = vpop.eup %5346  ;;  %v1267_v4 = vand.u32 8388607, %v1260_v29 }
 0x197   : > { %v1215_v13 = vsel %vm1213_vm9, %v1214_v32, %v6590_v56  ;;  %v1281_v57 = vshrl.u32 %v7960_v16, %v7982_v49  ;;  %v1287_v12 = vshrl.u32 %v7943_v7, %v7982_v49  ;;  %v5349_v15 = vpop.eup %5348  ;;  %v1280_v21 = vshll.u32 %v7959_v55, %v7983_v54 }
 0x198   : > { %v1131_v11 = vor.u32 4788187, %v1130_v37  ;;  %v1216_v50 = vadd.s32 %v1215_v13, %v1211_v22  ;;  %v1279_v41 = vor.u32 %v1278_v38, %v1277_v44  ;;  %vm1043_vm11 = vcmp.lt.s32.totalorder %v6587_v27, 2  ;;  %v7984_v22 = vld [vmem:[#allocation11_spill] sm:$0xff] }
 0x199   : > { %v1048_v1 = vxor.u32 2147483648, %v5347_v25  ;;  %v1134_v45 = vcvt.s32.f32 %v1127_v43  ;;  %v1284_v59 = vshrl.u32 %v7942_v60, %v7982_v49  ;;  %v1286_v52 = vshll.u32 %v7942_v60, %v7983_v54 }
 0x19a   : > { %v1132_v2 = vand.u32 2147483647, %v1131_v11  ;;  %v1217_v0 = vadd.s32 536870912, %v1216_v50  ;;  %v1289_v3 = vshll.u32 %v7943_v7, %v7983_v54  ;;  %v1290_v8 = vshrl.u32 %v7944_v53, %v7982_v49 }
 0x19b   : > { %v1045_v19 = vxor.u32 2147483648, %v5349_v15  ;;  %v1282_v56 = vor.u32 %v1281_v57, %v1280_v21  ;;  %v1283_v46 = vshll.u32 %v7960_v16, %v7983_v54  ;;  %v1288_v58 = vor.u32 %v1287_v12, %v1286_v52 }
 0x19c   : > { %v1135_v34 = vmul.f32 %v1134_v45, %v1132_v2  ;;  %v6638_v61 = vand.u32 3, %v1145_v51  ;;  %v1218_v14 = vshrl.u32 %v1217_v0, 30  ;;  %v1291_v28 = vor.u32 %v1290_v8, %v1289_v3 }
 0x19d   : > { %v1049_v36 = vsel %vm1047_vm4, %v1048_v1, %v5349_v15  ;;  %v1268_v48 = vor.u32 8388608, %v1267_v4  ;;  %v1276_v38 = vshrl.u32 %v7964_v35, %v7982_v49  ;;  %v1285_v32 = vor.u32 %v1284_v59, %v1283_v46 }
 0x19e   : > { %v1136_v43 = vxor.u32 2147483648, %v1135_v34  ;;  %v1219_v37 = vshll.u32 %v1218_v14, 30  ;;  %vm1292_vm12 = vcmp.lt.s32.totalorder %v7984_v22, 1  ;;  %vm1295_vm8 = vcmp.lt.s32.totalorder %v7984_v22, 4 }
 0x19f   : > { %v1046_v51 = vsel %vm1044_vm10, %v5347_v25, %v1045_v19  ;;  %vm1293_vm13 = vcmp.lt.s32.totalorder %v7984_v22, 2  ;;  %v1300_v54 = vsel %vm1292_vm12, %v1279_v41, %v1282_v56  ;;  %v1301_v44 = vsel %vm1295_vm8, %v1288_v58, 920167782 }
 0x1a0   : > { %v1137_v13 = vsel %vm1054_vm15, %v1136_v43, %v1135_v34  ;;  %v6653_v49 = vsub.s32 %v1216_v50, %v1219_v37  ;;  %vm1294_vm14 = vcmp.lt.s32.totalorder %v7984_v22, 3  ;;  %v1305_v4 = vsel %vm1295_vm8, %v1291_v28, 1326507024  ;;  %v7987_v28 = vld [vmem:[#allocation9_spill] sm:$0xff] }
 0x1a1   : > { %v1140_v57 = vsel %vm6571_vm5, %v5827_v17, %v1137_v13  ;;  %v1297_v12 = vsel %vm1295_vm8, %v1285_v32, 2102212464  ;;  %v1302_v25 = vsel %vm1294_vm14, %v1285_v32, %v1301_v44  ;;  %v1304_v15 = vsel %vm1292_vm12, %v1282_v56, %v1285_v32  ;;  %v7989_v37 = vld [vmem:[#allocation21_spill] sm:$0xff] }
 0x1a2   : > { %v1050_v11 = vsel %vm1043_vm11, %v1046_v51, %v1049_v36  ;;  %5350 = vcosq.f32 %v1140_v57  ;;  %v1222_v50 = vsub.s32 0, %v6653_v49  ;;  %v1303_v21 = vsel %vm1293_vm13, %v1300_v54, %v1302_v25 }
 0x1a3   : > { %5352 = vsinq.f32 %v1140_v57  ;;  %v1296_v40 = vsel %vm1292_vm12, %v1276_v38, %v1279_v41  ;;  %v1306_v1 = vsel %vm1294_vm14, %v1288_v58, %v1305_v4  ;;  %v1308_v45 = vshll.u32 %v1268_v48, 8  ;;  %v7988_v48 = vld [vmem:[#allocation25_spill] sm:$0xff] }
 0x1a4   : > { %v4451_v59 = vmin.u32 %v1222_v50, %v6653_v49  ;;  %v1242_v52 = vsub.s32 4, %v1218_v14  ;;  %v1298_v27 = vsel %vm1294_vm14, %v1282_v56, %v1297_v12  ;;  %v1307_v2 = vsel %vm1293_vm13, %v1304_v15, %v1306_v1 }
 0x1a5   : > { %v6677_v0 = vmul.u32.u64.low %v1308_v45, %v1307_v2  ;;  %v6678_v3 = vmul.u32.u64.high %v1308_v45, %v1307_v2, %v6677_v0  ;;  %v6680_v8 = vmul.u32.u64.low %v1308_v45, %v1303_v21  ;;  %v6681_v19 = vmul.u32.u64.high %v1308_v45, %v1303_v21, %v6680_v8 }
 0x1a6   : > { %v6686_v41 = vadd.f32 %v5650_v47, %v6599_v39  ;;  %vm1040_vm15 = vweird.f32 %v5732_v20  ;;  %vm1158_vm0 = vcmp.lt.s32.totalorder %v7976_v42, 0  ;;  %v1224_v46 = vclz %v4451_v59 }
 0x1a7   : > { %v1051_v56 = vsel %vm1040_vm15, nan, %v1050_v11  ;;  %vm6692_vm1 = vcmp.le.f32.partialorder %v1156_v24, 0.7853982  ;;  %v1299_v34 = vsel %vm1293_vm13, %v1296_v40, %v1298_v27  ;;  %v1364_v36 = vand.u32 2147483647, %v7987_v28 }
 0x1a8   : > { %vm1147_vm2 = vcmp.lt.s32.totalorder %v6638_v61, 2  ;;  %vm1148_vm3 = vcmp.eq.s32.totalorder %v6638_v61, 0  ;;  %v4452_v47 = vadd.s32 4294967294, %v1224_v46  ;;  %v1243_v39 = vsel %vm1158_vm0, %v1242_v52, %v1218_v14 }
 0x1a9   : > { %v1382_v38 = vshrl.u32 %v7959_v55, %v7988_v48  ;;  %vm1144_vm5 = vweird.f32 %v5827_v17  ;;  %vm1151_vm6 = vcmp.eq.s32.totalorder %v6638_v61, 2  ;;  %v1212_v24 = vadd.s32 %v6589_v9, %v6584_v18 }
 0x1aa   : > { %vm1317_vm9 = vc.u32 %v6678_v3, %v6680_v8  ;;  %v1318_v32 = vadd.s32 1, %v6681_v19  ;;  %v2202_v43 = vsel %vm6149_vm7, %v5732_v20, %v1051_v56  ;;  %vm4453_vm4 = vcmp.lt.s32.totalorder %v4452_v47, 0 }
 0x1ab   : > { %v1315_v14 = vmul.u32 %v1308_v45, %v1299_v34  ;;  %v1381_v22 = vshll.u32 %v7964_v35, %v7989_v37  ;;  %v1227_v51 = vsel %vm4453_vm4, 0, %v4452_v47  ;;  %v1245_v54 = vsel %vm6692_vm1, 0, %v1243_v39 }
 0x1ac   : > { %v1319_v18 = vsel %vm1317_vm9, %v1318_v32, %v6681_v19  ;;  %v6722_v9 = vand.u32 8388607, %v1364_v36  ;;  %v5351_v44 = vpop.eup %5350  ;;  %v1228_v13 = vsub.s32 32, %v1227_v51  ;;  %v1232_v4 = vsub.s32 4294967266, %v1227_v51 }
 0x1ad   : > { %v1320_v57 = vadd.s32 %v1319_v18, %v1315_v14  ;;  %v1383_v20 = vor.u32 %v1382_v38, %v1381_v22  ;;  %v5353_v12 = vpop.eup %5352  ;;  %v1152_v25 = vxor.u32 2147483648, %v5351_v44  ;;  %v1229_v15 = vshll.u32 %v6653_v49, %v1227_v51 }
 0x1ae   : > { %v1384_v11 = vshll.u32 %v7959_v55, %v7989_v37  ;;  %v1385_v50 = vshrl.u32 %v7960_v16, %v7988_v48  ;;  %v1149_v21 = vxor.u32 2147483648, %v5353_v12  ;;  %v1230_v40 = vshrl.u32 %v1212_v24, %v1228_v13 }
 0x1af   : > { %v1233_v1 = vadd.s32 127, %v1232_v4  ;;  %v1321_v45 = vadd.s32 536870912, %v1320_v57  ;;  %v1153_v59 = vsel %vm1151_vm6, %v1152_v25, %v5353_v12  ;;  %v1388_v52 = vshrl.u32 %v7942_v60, %v7988_v48 }
 0x1b0   : > { %v1391_v27 = vshrl.u32 %v7943_v7, %v7988_v48  ;;  %v1394_v49 = vshrl.u32 %v7944_v53, %v7988_v48  ;;  %v1150_v2 = vsel %vm1148_vm3, %v5351_v44, %v1149_v21  ;;  %v1231_v0 = vor.u32 %v1230_v40, %v1229_v15  ;;  %v7990_v15 = vld [vmem:[#allocation24_spill] sm:$0xff] }
 0x1b1   : > { %v1234_v19 = vshll.u32 %v1233_v1, 23  ;;  %v1322_v46 = vshrl.u32 %v1321_v45, 30  ;;  %v1154_v56 = vsel %vm1147_vm2, %v1150_v2, %v1153_v59  ;;  %v1387_v34 = vshll.u32 %v7960_v16, %v7989_v37 }
 0x1b2   : > { %v1390_v47 = vshll.u32 %v7942_v60, %v7989_v37  ;;  %v1393_v39 = vshll.u32 %v7943_v7, %v7989_v37  ;;  %v1155_v38 = vsel %vm1144_vm5, nan, %v1154_v56  ;;  %v1386_v14 = vor.u32 %v1385_v50, %v1384_v11 }
 0x1b3   : > { %v1235_v24 = vor.u32 4788187, %v1234_v19  ;;  %v1323_v32 = vshll.u32 %v1322_v46, 30  ;;  %v2203_v61 = vsel %vm6149_vm7, %v5827_v17, %v1155_v38  ;;  %v1389_v22 = vor.u32 %v1388_v52, %v1387_v34 }
 0x1b4   : > { %v1392_v51 = vor.u32 %v1391_v27, %v1390_v47  ;;  %v1395_v18 = vor.u32 %v1394_v49, %v1393_v39  ;;  %v2216_v44 = vpack.c.bf16 %v2203_v61, %v2202_v43  ;;  %v1238_v4 = vcvt.s32.f32 %v1231_v0 }
 0x1b5   : > { %v1236_v13 = vand.u32 2147483647, %v1235_v24  ;;  %v6752_v12 = vsub.s32 %v1320_v57, %v1323_v32  ;;  %v1249_v25 = vadd.s32 3, %v1245_v54  ;;  %v1372_v37 = vor.u32 8388608, %v6722_v9 }
 0x1b6   : > { %vm1396_vm10 = vcmp.lt.s32.totalorder %v7990_v15, 1  ;;  %vm1397_vm11 = vcmp.lt.s32.totalorder %v7990_v15, 2  ;;  %4776 = vmatprep.mubr.bf16.mxu0 %v2216_v44  ;;  %vm1399_vm12 = vcmp.lt.s32.totalorder %v7990_v15, 4  ;;  %vm1398_vm8 = vcmp.lt.s32.totalorder %v7990_v15, 3 }
 0x1b7   : > { %v1239_v11 = vmul.f32 %v1238_v4, %v1236_v13  ;;  %v1326_v50 = vsub.s32 0, %v6752_v12  ;;  %v1404_v17 = vsel %vm1396_vm10, %v1383_v20, %v1386_v14  ;;  %v1401_v43 = vsel %vm1399_vm12, %v1389_v22, 2102212464 }
 0x1b8   : > { %v1405_v57 = vsel %vm1399_vm12, %v1392_v51, 920167782  ;;  %v1408_v54 = vsel %vm1396_vm10, %v1386_v14, %v1389_v22  ;;  %v1409_v1 = vsel %vm1399_vm12, %v1395_v18, 1326507024  ;;  %v1346_v45 = vsub.s32 4, %v1322_v46 }
 0x1b9   : > { %v1240_v9 = vxor.u32 2147483648, %v1239_v11  ;;  %v4455_v21 = vmin.u32 %v1326_v50, %v6752_v12  ;;  %v1406_v40 = vsel %vm1398_vm8, %v1389_v22, %v1405_v57  ;;  %v1380_v59 = vshrl.u32 %v7964_v35, %v7988_v48  ;;  %v7994_v57 = vld [vmem:[#allocation19_spill] sm:$0xff] }
 0x1ba   : > { %v1407_v52 = vsel %vm1397_vm11, %v1404_v17, %v1406_v40  ;;  %v1410_v27 = vsel %vm1398_vm8, %v1392_v51, %v1409_v1  ;;  %v1412_v19 = vshll.u32 %v1372_v37, 8  ;;  %vm1262_vm13 = vcmp.lt.s32.totalorder %v7981_v62, 0  ;;  %v7995_v1 = vld [vmem:[#allocation23_spill] sm:$0xff] }
 0x1bb   : > { %v1241_v49 = vsel %vm1158_vm0, %v1240_v9, %v1239_v11  ;;  %v1328_v2 = vclz %v4455_v21  ;;  %v1411_v0 = vsel %vm1397_vm11, %v1408_v54, %v1410_v27  ;;  %v1400_v48 = vsel %vm1396_vm10, %v1380_v59, %v1383_v20 }
 0x1bc   : > { %v1244_v56 = vsel %vm6692_vm1, %v7976_v42, %v1241_v49  ;;  %v1402_v34 = vsel %vm1398_vm8, %v1386_v14, %v1401_v43  ;;  %v6785_v39 = vmul.u32.u64.low %v1412_v19, %v1411_v0  ;;  %v6786_v38 = vmul.u32.u64.high %v1412_v19, %v1411_v0, %v6785_v39 }
 0x1bd   : > { %5354 = vcosq.f32 %v1244_v56  ;;  %v4456_v47 = vadd.s32 4294967294, %v1328_v2  ;;  %v1347_v24 = vsel %vm1262_vm13, %v1346_v45, %v1322_v46  ;;  %v6795_v61 = vand.u32 31, %v6371_v5 }
 0x1be   : > { %5356 = vsinq.f32 %v1244_v56  ;;  %v6790_v32 = vmul.u32.u64.low %v1412_v19, %v1407_v52  ;;  %v6791_v58 = vmul.u32.u64.high %v1412_v19, %v1407_v52, %v6790_v32  ;;  %v6797_v20 = vand.u32 3, %v1249_v25 }
 0x1bf   : > { %vm4457_vm14 = vcmp.lt.s32.totalorder %v4456_v47, 0  ;;  %v1403_v14 = vsel %vm1397_vm11, %v1400_v48, %v1402_v34  ;;  %v2095_v22 = vand.u32 2139095040, %v6376_v23  ;;  %v6803_v51 = vadd.s32 4294967169, %v6611_v6 }
 0x1c0   : > { %vm6807_vm15 = vcmp.le.f32.partialorder %v1260_v29, 0.7853982  ;;  %v1331_v18 = vsel %vm4457_vm14, 0, %v4456_v47  ;;  %v1316_v44 = vadd.s32 %v6680_v8, %v6678_v3  ;;  %v1991_v37 = vand.u32 2139095040, %v6686_v41  ;;  %v7993_v3 = vld [vmem:[#allocation8_spill] sm:$0xff] }
 0x1c1   : > { %v1332_v13 = vsub.s32 32, %v1331_v18  ;;  %v1336_v4 = vsub.s32 4294967266, %v1331_v18  ;;  %v1349_v25 = vsel %vm6807_vm15, 0, %v1347_v24  ;;  %v1419_v15 = vmul.u32 %v1412_v19, %v1403_v14 }
 0x1c2   : > { %vm1421_vm0 = vc.u32 %v6786_v38, %v6790_v32  ;;  %v1422_v29 = vadd.s32 1, %v6791_v58  ;;  %vm1252_vm1 = vcmp.eq.s32.totalorder %v6797_v20, 0  ;;  %v1333_v6 = vshll.u32 %v6752_v12, %v1331_v18 }
 0x1c3   : > { %v1334_v11 = vshrl.u32 %v1316_v44, %v1332_v13  ;;  %v1337_v50 = vadd.s32 127, %v1336_v4  ;;  %v1468_v8 = vand.u32 2147483647, %v7993_v3  ;;  %vm1255_vm2 = vcmp.eq.s32.totalorder %v6797_v20, 2 }
 0x1c4   : > { %v1353_v17 = vadd.s32 3, %v1349_v25  ;;  %v1423_v43 = vsel %vm1421_vm0, %v1422_v29, %v6791_v58  ;;  %v1485_v54 = vshll.u32 %v7964_v35, %v7994_v57  ;;  %v1486_v45 = vshrl.u32 %v7959_v55, %v7995_v1 }
 0x1c5   : > { %v1335_v9 = vor.u32 %v1334_v11, %v1333_v6  ;;  %v1338_v21 = vshll.u32 %v1337_v50, 23  ;;  %v1424_v40 = vadd.s32 %v1423_v43, %v1419_v15  ;;  %vm1251_vm3 = vcmp.lt.s32.totalorder %v6797_v20, 2  ;;  %v7996_v50 = vld [vmem:[#allocation22_spill] sm:$0xff] }
 0x1c6   : > { %v1489_v12 = vshrl.u32 %v7960_v16, %v7995_v1  ;;  %v1492_v59 = vshrl.u32 %v7942_v60, %v7995_v1  ;;  %v1494_v52 = vshll.u32 %v7942_v60, %v7994_v57  ;;  %v1495_v27 = vshrl.u32 %v7943_v7, %v7995_v1 }
 0x1c7   : > { %v5355_v49 = vpop.eup %5354  ;;  %v1339_v2 = vor.u32 4788187, %v1338_v21  ;;  %v1425_v0 = vadd.s32 536870912, %v1424_v40  ;;  %v1475_v19 = vand.u32 8388607, %v1468_v8  ;;  %v1488_v56 = vshll.u32 %v7959_v55, %v7994_v57 }
 0x1c8   : > { %v5357_v48 = vpop.eup %5356  ;;  %v1256_v34 = vxor.u32 2147483648, %v5355_v49  ;;  %v1491_v47 = vshll.u32 %v7960_v16, %v7994_v57  ;;  %v1496_v39 = vor.u32 %v1495_v27, %v1494_v52  ;;  %v1498_v24 = vshrl.u32 %v7944_v53, %v7995_v1 }
 0x1c9   : > { %v1253_v58 = vxor.u32 2147483648, %v5357_v48  ;;  %v1340_v14 = vand.u32 2147483647, %v1339_v2  ;;  %v1342_v18 = vcvt.s32.f32 %v1335_v9  ;;  %v1426_v44 = vshrl.u32 %v1425_v0, 30 }
 0x1ca   : > { %vm1248_vm5 = vweird.f32 %v7976_v42  ;;  %v1487_v13 = vor.u32 %v1486_v45, %v1485_v54  ;;  %v1490_v4 = vor.u32 %v1489_v12, %v1488_v56  ;;  %v1493_v25 = vor.u32 %v1492_v59, %v1491_v47 }
 0x1cb   : > { %v1497_v15 = vshll.u32 %v7943_v7, %v7994_v57  ;;  %v1343_v29 = vmul.f32 %v1342_v18, %v1340_v14  ;;  %v6848_v6 = vand.u32 3, %v1353_v17  ;;  %v1427_v11 = vshll.u32 %v1426_v44, 30 }
 0x1cc   : > { %vm1503_vm6 = vcmp.lt.s32.totalorder %v7996_v50, 4  ;;  %v1254_v43 = vsel %vm1252_vm1, %v5355_v49, %v1253_v58  ;;  %v1257_v9 = vsel %vm1255_vm2, %v1256_v34, %v5357_v48  ;;  %vm1500_vm9 = vcmp.lt.s32.totalorder %v7996_v50, 1 }
 0x1cd   : > { %v1499_v21 = vor.u32 %v1498_v24, %v1497_v15  ;;  %v1509_v54 = vsel %vm1503_vm6, %v1496_v39, 920167782  ;;  %v1344_v45 = vxor.u32 2147483648, %v1343_v29  ;;  %v6857_v12 = vsub.s32 %v1424_v40, %v1427_v11 }
 0x1ce   : > { %vm1502_vm4 = vcmp.lt.s32.totalorder %v7996_v50, 3  ;;  %v1476_v17 = vor.u32 8388608, %v1475_v19  ;;  %v1484_v57 = vshrl.u32 %v7964_v35, %v7995_v1  ;;  %v1508_v59 = vsel %vm1500_vm9, %v1487_v13, %v1490_v4 }
 0x1cf   : > { %v1510_v52 = vsel %vm1502_vm4, %v1493_v25, %v1509_v54  ;;  %v1258_v27 = vsel %vm1251_vm3, %v1254_v43, %v1257_v9  ;;  %v1345_v40 = vsel %vm1262_vm13, %v1344_v45, %v1343_v29  ;;  %v1430_v49 = vsub.s32 0, %v6857_v12 }
 0x1d0   : > { %vm1501_vm10 = vcmp.lt.s32.totalorder %v7996_v50, 2  ;;  %v1348_v1 = vsel %vm6807_vm15, %v7981_v62, %v1345_v40  ;;  %v1505_v2 = vsel %vm1503_vm6, %v1493_v25, 2102212464  ;;  %v1512_v0 = vsel %vm1500_vm9, %v1490_v4, %v1493_v25 }
 0x1d1   : > { %v1513_v20 = vsel %vm1503_vm6, %v1499_v21, 1326507024  ;;  %5358 = vcosq.f32 %v1348_v1  ;;  %v4459_v19 = vmin.u32 %v1430_v49, %v6857_v12  ;;  %v1511_v56 = vsel %vm1501_vm10, %v1508_v59, %v1510_v52 }
 0x1d2   : > { %v1514_v48 = vsel %vm1502_vm4, %v1496_v39, %v1513_v20  ;;  %5360 = vsinq.f32 %v1348_v1  ;;  %v1450_v46 = vsub.s32 4, %v1426_v44  ;;  %v1516_v47 = vshll.u32 %v1476_v17, 8 }
 0x1d3   : > { %v1515_v34 = vsel %vm1501_vm10, %v1512_v0, %v1514_v48  ;;  %v6891_v24 = vsel %vm1248_vm5, nan, %v1258_v27  ;;  %v1432_v58 = vclz %v4459_v19  ;;  %v1504_v14 = vsel %vm1500_vm9, %v1484_v57, %v1487_v13 }
 0x1d4   : > { %v1506_v18 = vsel %vm1502_vm4, %v1490_v4, %v1505_v2  ;;  %v6897_v25 = vmul.u32.u64.low %v1516_v47, %v1515_v34  ;;  %v6898_v15 = vmul.u32.u64.high %v1516_v47, %v1515_v34, %v6897_v25  ;;  %v6905_v11 = vadd.s32 1, %v6803_v51  ;;  %v7999_v51 = vld [vmem:[#allocation14_spill] sm:$0xff] }
 0x1d5   : > { %v6900_v39 = vmul.u32.u64.low %v1516_v47, %v1511_v56  ;;  %v6901_v29 = vmul.u32.u64.high %v1516_v47, %v1511_v56, %v6900_v39  ;;  %vm6909_vm11 = vcmp.le.f32.partialorder %v1364_v36, 0.7853982  ;;  %vm1366_vm12 = vcmp.lt.s32.totalorder %v7987_v28, 0 }
 0x1d6   : > { %v4460_v13 = vadd.s32 4294967294, %v1432_v58  ;;  %vm1356_vm8 = vcmp.eq.s32.totalorder %v6848_v6, 0  ;;  %v6917_v4 = vsel %vm1366_vm12, %v1450_v46, %v1426_v44  ;;  %v1507_v9 = vsel %vm1501_vm10, %v1504_v14, %v1506_v18 }
 0x1d7   : > { %v1572_v21 = vand.u32 2147483647, %v7999_v51  ;;  %vm1355_vm13 = vcmp.lt.s32.totalorder %v6848_v6, 2  ;;  %vm1359_vm14 = vcmp.eq.s32.totalorder %v6848_v6, 2  ;;  %v2204_v36 = vsel %vm6149_vm7, %v7976_v42, %v6891_v24 }
 0x1d8   : > { %v1420_v54 = vadd.s32 %v6790_v32, %v6786_v38  ;;  %vm4461_vm15 = vcmp.lt.s32.totalorder %v4460_v13, 0  ;;  %vm1352_vm0 = vweird.f32 %v7981_v62  ;;  %vm1525_vm1 = vc.u32 %v6898_v15, %v6900_v39 }
 0x1d9   : > { %v1435_v44 = vsel %vm4461_vm15, 0, %v4460_v13  ;;  %v1526_v50 = vadd.s32 1, %v6901_v29  ;;  %v1590_v45 = vshrl.u32 %v7959_v55, %v6349_v31  ;;  %v1453_v42 = vsel %vm6909_vm11, 0, %v6917_v4 }
 0x1da   : > { %v1436_v17 = vsub.s32 32, %v1435_v44  ;;  %v1440_v57 = vsub.s32 4294967266, %v1435_v44  ;;  %v1523_v59 = vmul.u32 %v1516_v47, %v1507_v9  ;;  %v6942_v32 = vand.u32 8388607, %v1572_v21 }
 0x1db   : > { %v1527_v38 = vsel %vm1525_vm1, %v1526_v50, %v6901_v29  ;;  %v1589_v52 = vshll.u32 %v7964_v35, %v6253_v63  ;;  %v1592_v27 = vshll.u32 %v7959_v55, %v6253_v63  ;;  %v5359_v40 = vpop.eup %5358  ;;  %v1437_v49 = vshll.u32 %v6857_v12, %v1435_v44 }
 0x1dc   : > { %v1438_v1 = vshrl.u32 %v1420_v54, %v1436_v17  ;;  %v1441_v2 = vadd.s32 127, %v1440_v57  ;;  %v1528_v0 = vadd.s32 %v1527_v38, %v1523_v59  ;;  %v5361_v20 = vpop.eup %5360  ;;  %v1360_v19 = vxor.u32 2147483648, %v5359_v40 }
 0x1dd   : > { %vm1470_vm2 = vcmp.lt.s32.totalorder %v7993_v3, 0  ;;  %v1591_v56 = vor.u32 %v1590_v45, %v1589_v52  ;;  %v1593_v48 = vshrl.u32 %v7960_v16, %v6349_v31  ;;  %v1599_v46 = vshrl.u32 %v7943_v7, %v6349_v31 }
 0x1de   : > { %v1357_v34 = vxor.u32 2147483648, %v5361_v20  ;;  %v1439_v47 = vor.u32 %v1438_v1, %v1437_v49  ;;  %v1442_v24 = vshll.u32 %v1441_v2, 23  ;;  %v1529_v58 = vadd.s32 536870912, %v1528_v0 }
 0x1df   : > { %v1361_v12 = vsel %vm1359_vm14, %v1360_v19, %v5361_v20  ;;  %v1596_v14 = vshrl.u32 %v7942_v60, %v6349_v31  ;;  %v1598_v18 = vshll.u32 %v7942_v60, %v6253_v63  ;;  %v1602_v25 = vshrl.u32 %v7944_v53, %v6349_v31 }
 0x1e0   : > { %v1358_v29 = vsel %vm1356_vm8, %v5359_v40, %v1357_v34  ;;  %v1443_v13 = vor.u32 4788187, %v1442_v24  ;;  %vm6966_vm3 = vcmp.le.f32.partialorder %v1468_v8, 0.7853982  ;;  %v1530_v9 = vshrl.u32 %v1529_v58, 30 }
 0x1e1   : > { %v1595_v54 = vshll.u32 %v7960_v16, %v6253_v63  ;;  %v1362_v44 = vsel %vm1355_vm13, %v1358_v29, %v1361_v12  ;;  %v1446_v50 = vcvt.s32.f32 %v1439_v47  ;;  %v1600_v45 = vor.u32 %v1599_v46, %v1598_v18 }
 0x1e2   : > { %v1601_v17 = vshll.u32 %v7943_v7, %v6253_v63  ;;  %v1363_v57 = vsel %vm1352_vm0, nan, %v1362_v44  ;;  %v1444_v59 = vand.u32 2147483647, %v1443_v13  ;;  %v1531_v8 = vshll.u32 %v1530_v9, 30 }
 0x1e3   : > { %v1554_v38 = vsub.s32 4, %v1530_v9  ;;  %v2205_v52 = vsel %vm6149_vm7, %v7981_v62, %v1363_v57  ;;  %v1594_v40 = vor.u32 %v1593_v48, %v1592_v27  ;;  %v1597_v49 = vor.u32 %v1596_v14, %v1595_v54 }
 0x1e4   : > { %v1603_v1 = vor.u32 %v1602_v25, %v1601_v17  ;;  %v2217_v6 = vpack.c.bf16 %v2205_v52, %v2204_v36  ;;  %v1447_v2 = vmul.f32 %v1446_v50, %v1444_v59  ;;  %v6981_v20 = vsub.s32 %v1528_v0, %v1531_v8 }
 0x1e5   : > { %vm1607_vm5 = vcmp.lt.s32.totalorder %v6346_v33, 4  ;;  %v1457_v63 = vadd.s32 3, %v1453_v42  ;;  %v1580_v19 = vor.u32 8388608, %v6942_v32  ;;  %vm1604_vm6 = vcmp.lt.s32.totalorder %v6346_v33, 1 }
 0x1e6   : > { %v1613_v46 = vsel %vm1607_vm5, %v1600_v45, 920167782  ;;  %4777 = vmatmul.mubr.bf16.gmra.mrb[4].mxu0 %v2217_v6  ;;  %v1448_v34 = vxor.u32 2147483648, %v1447_v2  ;;  %v1534_v62 = vsub.s32 0, %v6981_v20  ;;  %v1555_v36 = vsel %vm1470_vm2, %v1554_v38, %v1530_v9 }
 0x1e7   : > { %vm1606_vm9 = vcmp.lt.s32.totalorder %v6346_v33, 3  ;;  %v1588_v27 = vshrl.u32 %v7964_v35, %v6349_v31  ;;  %v1612_v42 = vsel %vm1604_vm6, %v1591_v56, %v1594_v40  ;;  %v1617_v0 = vsel %vm1607_vm5, %v1603_v1, 1326507024 }
 0x1e8   : > { %v1614_v32 = vsel %vm1606_vm9, %v1597_v49, %v1613_v46  ;;  %v1449_v48 = vsel %vm1366_vm12, %v1448_v34, %v1447_v2  ;;  %v4463_v47 = vmin.u32 %v1534_v62, %v6981_v20  ;;  %vm1605_vm4 = vcmp.lt.s32.totalorder %v6346_v33, 2 }
 0x1e9   : > { %v1616_v24 = vsel %vm1604_vm6, %v1594_v40, %v1597_v49  ;;  %v1452_v31 = vsel %vm6909_vm11, %v7987_v28, %v1449_v48  ;;  %v1557_v58 = vsel %vm6966_vm3, 0, %v1555_v36  ;;  %v1609_v12 = vsel %vm1607_vm5, %v1597_v49, 2102212464 }
 0x1ea   : > { %v1618_v14 = vsel %vm1606_vm9, %v1600_v45, %v1617_v0  ;;  %5362 = vcosq.f32 %v1452_v31  ;;  %v1536_v18 = vclz %v4463_v47  ;;  %v1615_v25 = vsel %vm1605_vm4, %v1612_v42, %v1614_v32 }
 0x1eb   : > { %v1620_v29 = vshll.u32 %v1580_v19, 8  ;;  %v1992_v13 = vshrl.u32 %v1991_v37, 23  ;;  %5364 = vsinq.f32 %v1452_v31  ;;  %v1608_v43 = vsel %vm1604_vm6, %v1588_v27, %v1591_v56  ;;  %v8003_v27 = vld [vmem:[#allocation27_spill] sm:$0xff] }
 0x1ec   : > { %v1619_v9 = vsel %vm1605_vm4, %v1616_v24, %v1618_v14  ;;  %v4464_v54 = vadd.s32 4294967294, %v1536_v18  ;;  %v1610_v44 = vsel %vm1606_vm9, %v1594_v40, %v1609_v12  ;;  %v7029_v17 = vshrl.u32 %v6371_v5, 5  ;;  %v8002_v40 = vld [vmem:[#allocation17_spill] sm:$0xff] }
 0x1ed   : > { %v7025_v50 = vmul.u32.u64.low %v1620_v29, %v1619_v9  ;;  %v7026_v45 = vmul.u32.u64.high %v1620_v29, %v1619_v9, %v7025_v50  ;;  %v1561_v57 = vadd.s32 3, %v1557_v58  ;;  %v7036_v56 = vsub.s32 32, %v6795_v61 }
 0x1ee   : > { %v7031_v59 = vmul.u32.u64.low %v1620_v29, %v1615_v25  ;;  %v7032_v37 = vmul.u32.u64.high %v1620_v29, %v1615_v25, %v7031_v59  ;;  %vm1895_vm10 = vcmp.gt.s32.totalorder %v6905_v11, 0  ;;  %v7039_v8 = vand.u32 3, %v1457_v63 }
 0x1ef   : > { %vm4465_vm11 = vcmp.lt.s32.totalorder %v4464_v54, 0  ;;  %v7043_v38 = vshrl.u32 %v2095_v22, 23  ;;  %v1611_v5 = vsel %vm1605_vm4, %v1608_v43, %v1610_v44  ;;  %v1676_v49 = vand.u32 2147483647, %v8002_v40 }
 0x1f0   : > { %v1539_v52 = vsel %vm4465_vm11, 0, %v4464_v54  ;;  %v7048_v1 = vadd.s32 4294967169, %v1992_v13  ;;  %v1524_v6 = vadd.s32 %v6900_v39, %v6898_v15  ;;  %v7053_v63 = vsel %vm1895_vm10, %v6905_v11, 0 }
 0x1f1   : > { %v1540_v2 = vsub.s32 32, %v1539_v52  ;;  %v1544_v19 = vsub.s32 4294967266, %v1539_v52  ;;  %v7055_v46 = vand.u32 3, %v1561_v57  ;;  %vm1629_vm12 = vc.u32 %v7026_v45, %v7031_v59 }
 0x1f2   : > { %v1630_v33 = vadd.s32 1, %v7032_v37  ;;  %vm1460_vm8 = vcmp.eq.s32.totalorder %v7039_v8, 0  ;;  %vm1463_vm13 = vcmp.eq.s32.totalorder %v7039_v8, 2  ;;  %v1541_v22 = vshll.u32 %v6981_v20, %v1539_v52 }
 0x1f3   : > { %v1542_v34 = vshrl.u32 %v1524_v6, %v1540_v2  ;;  %v1545_v15 = vadd.s32 127, %v1544_v19  ;;  %v1627_v39 = vmul.u32 %v1620_v29, %v1611_v5  ;;  %v1683_v11 = vand.u32 8388607, %v1676_v49 }
 0x1f4   : > { %v1631_v62 = vsel %vm1629_vm12, %v1630_v33, %v7032_v37  ;;  %v1693_v36 = vshll.u32 %v7964_v35, %v6257_v10  ;;  %v1703_v42 = vshrl.u32 %v7943_v7, %v8003_v27  ;;  %v5363_v32 = vpop.eup %5362  ;;  %v1694_v20 = vshrl.u32 %v7959_v55, %v8003_v27 }
 0x1f5   : > { %v1543_v0 = vor.u32 %v1542_v34, %v1541_v22  ;;  %v1546_v48 = vshll.u32 %v1545_v15, 23  ;;  %v1632_v47 = vadd.s32 %v1631_v62, %v1627_v39  ;;  %v5365_v24 = vpop.eup %5364  ;;  %vm1459_vm14 = vcmp.lt.s32.totalorder %v7039_v8, 2  ;;  %v8004_v15 = vld [vmem:[#allocation26_spill] sm:$0xff] }
 0x1f6   : > { %v1697_v31 = vshrl.u32 %v7960_v16, %v8003_v27  ;;  %v1700_v58 = vshrl.u32 %v7942_v60, %v8003_v27  ;;  %v1702_v12 = vshll.u32 %v7942_v60, %v6257_v10  ;;  %v1706_v14 = vshrl.u32 %v7944_v53, %v8003_v27 }
 0x1f7   : > { %v1547_v18 = vor.u32 4788187, %v1546_v48  ;;  %v1633_v25 = vadd.s32 536870912, %v1632_v47  ;;  %v1696_v29 = vshll.u32 %v7959_v55, %v6257_v10  ;;  %v1699_v13 = vshll.u32 %v7960_v16, %v6257_v10 }
 0x1f8   : > { %v1461_v43 = vxor.u32 2147483648, %v5365_v24  ;;  %v1464_v9 = vxor.u32 2147483648, %v5363_v32  ;;  %v1704_v54 = vor.u32 %v1703_v42, %v1702_v12  ;;  %v1705_v44 = vshll.u32 %v7943_v7, %v6257_v10 }
 0x1f9   : > { %v1548_v50 = vand.u32 2147483647, %v1547_v18  ;;  %v1550_v57 = vcvt.s32.f32 %v1543_v0  ;;  %v7087_v37 = vshrl.u32 %v1633_v25, 30  ;;  %v1692_v52 = vshrl.u32 %v7964_v35, %v8003_v27 }
 0x1fa   : > { %vm1456_vm15 = vweird.f32 %v7987_v28  ;;  %v1695_v5 = vor.u32 %v1694_v20, %v1693_v36  ;;  %v1698_v6 = vor.u32 %v1697_v31, %v1696_v29  ;;  %v1701_v2 = vor.u32 %v1700_v58, %v1699_v13 }
 0x1fb   : > { %v1707_v19 = vor.u32 %v1706_v14, %v1705_v44  ;;  %v1551_v33 = vmul.f32 %v1550_v57, %v1548_v50  ;;  %v1635_v22 = vshll.u32 %v7087_v37, 30  ;;  %v1684_v34 = vor.u32 8388608, %v1683_v11 }
 0x1fc   : > { %vm1711_vm0 = vcmp.lt.s32.totalorder %v8004_v15, 4  ;;  %v1462_v10 = vsel %vm1460_vm8, %v5363_v32, %v1461_v43  ;;  %v1465_v39 = vsel %vm1463_vm13, %v1464_v9, %v5365_v24  ;;  %vm1708_vm1 = vcmp.lt.s32.totalorder %v8004_v15, 1 }
 0x1fd   : > { %v1717_v62 = vsel %vm1711_vm0, %v1704_v54, 920167782  ;;  %v1552_v36 = vxor.u32 2147483648, %v1551_v33  ;;  %v7101_v27 = vsub.s32 %v1632_v47, %v1635_v22  ;;  %vm1709_vm5 = vcmp.lt.s32.totalorder %v8004_v15, 2 }
 0x1fe   : > { %vm1710_vm6 = vcmp.lt.s32.totalorder %v8004_v15, 3  ;;  %v1716_v11 = vsel %vm1708_vm1, %v1695_v5, %v1698_v6  ;;  %v1720_v32 = vsel %vm1708_vm1, %v1698_v6, %v1701_v2  ;;  %v1721_v0 = vsel %vm1711_vm0, %v1707_v19, 1326507024 }
 0x1ff   : > { %v1718_v42 = vsel %vm1710_vm6, %v1701_v2, %v1717_v62  ;;  %v1466_v48 = vsel %vm1459_vm14, %v1462_v10, %v1465_v39  ;;  %v1553_v20 = vsel %vm1470_vm2, %v1552_v36, %v1551_v33  ;;  %v1638_v47 = vsub.s32 0, %v7101_v27 }
 0x200   : > { %v1713_v24 = vsel %vm1711_vm0, %v1701_v2, 2102212464  ;;  %v1556_v31 = vsel %vm6966_vm3, %v7993_v3, %v1553_v20  ;;  %v1712_v58 = vsel %vm1708_vm1, %v1692_v52, %v1695_v5  ;;  %v1722_v12 = vsel %vm1710_vm6, %v1704_v54, %v1721_v0  ;;  %v8005_v5 = vld [vmem:[#allocation18_spill] sm:$0xff] }
 0x201   : > { %v1724_v14 = vshll.u32 %v1684_v34, 8  ;;  %5366 = vcosq.f32 %v1556_v31  ;;  %v4467_v8 = vmin.u32 %v1638_v47, %v7101_v27  ;;  %v1719_v18 = vsel %vm1709_vm5, %v1716_v11, %v1718_v42 }
 0x202   : > { %v1723_v25 = vsel %vm1709_vm5, %v1720_v32, %v1722_v12  ;;  %5368 = vsinq.f32 %v1556_v31  ;;  %v1714_v29 = vsel %vm1710_vm6, %v1698_v6, %v1713_v24  ;;  %v7132_v43 = vand.u32 31, %v7053_v63 }
 0x203   : > { %v7128_v4 = vmul.u32.u64.low %v1724_v14, %v1723_v25  ;;  %v7129_v13 = vmul.u32.u64.high %v1724_v14, %v1723_v25, %v7128_v4  ;;  %v7135_v9 = vadd.s32 1, %v7048_v1  ;;  %v7139_v54 = vsel %vm1456_vm15, nan, %v1466_v48 }
 0x204   : > { %v1640_v44 = vclz %v4467_v8  ;;  %v1658_v50 = vsub.s32 4, %v7087_v37  ;;  %v7142_v57 = vmul.u32.u64.low %v1724_v14, %v1719_v18  ;;  %v7143_v52 = vmul.u32.u64.high %v1724_v14, %v1719_v18, %v7142_v57 }
 0x205   : > { %v1780_v6 = vand.u32 2147483647, %v8005_v5  ;;  %vm1574_vm2 = vcmp.lt.s32.totalorder %v7999_v51, 0  ;;  %v1715_v1 = vsel %vm1709_vm5, %v1712_v58, %v1714_v29  ;;  %v1798_v19 = vshrl.u32 %v7959_v55, %v7036_v56 }
 0x206   : > { %v4468_v2 = vadd.s32 4294967294, %v1640_v44  ;;  %vm1564_vm3 = vcmp.eq.s32.totalorder %v7055_v46, 0  ;;  %vm1567_vm9 = vcmp.eq.s32.totalorder %v7055_v46, 2  ;;  %v1628_v33 = vadd.s32 %v7031_v59, %v7026_v45 }
 0x207   : > { %v7158_v22 = vand.u32 8388607, %v1780_v6  ;;  %vm1563_vm4 = vcmp.lt.s32.totalorder %v7055_v46, 2  ;;  %v2206_v34 = vsel %vm6149_vm7, %v7987_v28, %v7139_v54  ;;  %vm1733_vm11 = vc.u32 %v7129_v13, %v7142_v57 }
 0x208   : > { %vm4469_vm10 = vcmp.lt.s32.totalorder %v4468_v2, 0  ;;  %v1797_v15 = vshll.u32 %v7964_v35, %v6795_v61  ;;  %vm1560_vm12 = vweird.f32 %v7993_v3  ;;  %v7173_v59 = vsel %vm1574_vm2, %v1658_v50, %v7087_v37 }
 0x209   : > { %v1643_v45 = vsel %vm4469_vm10, 0, %v4468_v2  ;;  %v1731_v10 = vmul.u32 %v1724_v14, %v1715_v1  ;;  %v1734_v39 = vadd.s32 1, %v7143_v52  ;;  %v1800_v11 = vshll.u32 %v7959_v55, %v6795_v61 }
 0x20a   : > { %v1644_v62 = vsub.s32 32, %v1643_v45  ;;  %v1648_v28 = vsub.s32 4294967266, %v1643_v45  ;;  %v1799_v36 = vor.u32 %v1798_v19, %v1797_v15  ;;  %v1788_v32 = vor.u32 8388608, %v7158_v22 }
 0x20b   : > { %v1735_v42 = vsel %vm1733_vm11, %v1734_v39, %v7143_v52  ;;  %v1801_v0 = vshrl.u32 %v7960_v16, %v7036_v56  ;;  %v1807_v37 = vshrl.u32 %v7943_v7, %v7036_v56  ;;  %v5367_v48 = vpop.eup %5366  ;;  %vm7186_vm8 = vcmp.le.f32.partialorder %v1572_v21, 0.7853982 }
 0x20c   : > { %v1645_v47 = vshll.u32 %v7101_v27, %v1643_v45  ;;  %v1646_v24 = vshrl.u32 %v1628_v33, %v1644_v62  ;;  %v1649_v31 = vadd.s32 127, %v1648_v28  ;;  %v1736_v58 = vadd.s32 %v1735_v42, %v1731_v10  ;;  %v5369_v12 = vpop.eup %5368 }
 0x20d   : > { %v1568_v14 = vxor.u32 2147483648, %v5367_v48  ;;  %v1804_v8 = vshrl.u32 %v7942_v60, %v7036_v56  ;;  %v1806_v18 = vshll.u32 %v7942_v60, %v6795_v61  ;;  %v1810_v25 = vshrl.u32 %v7944_v53, %v7036_v56 }
 0x20e   : > { %v1565_v21 = vxor.u32 2147483648, %v5369_v12  ;;  %v1647_v29 = vor.u32 %v1646_v24, %v1645_v47  ;;  %v1650_v4 = vshll.u32 %v1649_v31, 23  ;;  %v1737_v54 = vadd.s32 536870912, %v1736_v58 }
 0x20f   : > { %vm1999_vm13 = vcmp.gt.s32.totalorder %v7135_v9, 0  ;;  %v1569_v27 = vsel %vm1567_vm9, %v1568_v14, %v5369_v12  ;;  %v1803_v44 = vshll.u32 %v7960_v16, %v6795_v61  ;;  %v1808_v50 = vor.u32 %v1807_v37, %v1806_v18 }
 0x210   : > { %v1809_v52 = vshll.u32 %v7943_v7, %v6795_v61  ;;  %v1566_v2 = vsel %vm1564_vm3, %v5367_v48, %v1565_v21  ;;  %v1651_v1 = vor.u32 4788187, %v1650_v4  ;;  %v1738_v19 = vshrl.u32 %v1737_v54, 30 }
 0x211   : > { %v1802_v33 = vor.u32 %v1801_v0, %v1800_v11  ;;  %v1570_v22 = vsel %vm1563_vm4, %v1566_v2, %v1569_v27  ;;  %v1654_v15 = vcvt.s32.f32 %v1647_v29  ;;  %v1805_v45 = vor.u32 %v1804_v8, %v1803_v44 }
 0x212   : > { %v1811_v10 = vor.u32 %v1810_v25, %v1809_v52  ;;  %v1571_v39 = vsel %vm1560_vm12, nan, %v1570_v22  ;;  %v1652_v62 = vand.u32 2147483647, %v1651_v1  ;;  %v1739_v28 = vshll.u32 %v1738_v19, 30 }
 0x213   : > { %vm1815_vm14 = vcmp.lt.s32.totalorder %v7029_v17, 4  ;;  %v2207_v61 = vsel %vm6149_vm7, %v7993_v3, %v1571_v39  ;;  %vm1812_vm15 = vcmp.lt.s32.totalorder %v7029_v17, 1  ;;  %vm1814_vm0 = vcmp.lt.s32.totalorder %v7029_v17, 3 }
 0x214   : > { %v1821_v46 = vsel %vm1815_vm14, %v1808_v50, 920167782  ;;  %v2218_v11 = vpack.c.bf16 %v2207_v61, %v2206_v34  ;;  %v1655_v42 = vmul.f32 %v1654_v15, %v1652_v62  ;;  %v7218_v0 = vsub.s32 %v1736_v58, %v1739_v28 }
 0x215   : > { %v1820_v37 = vsel %vm1812_vm15, %v1799_v36, %v1802_v33  ;;  %v1661_v48 = vsel %vm7186_vm8, 0, %v7173_v59  ;;  %v1796_v3 = vshrl.u32 %v7964_v35, %v7036_v56  ;;  %v1817_v47 = vsel %vm1815_vm14, %v1805_v45, 2102212464 }
 0x216   : > { %v1822_v24 = vsel %vm1814_vm0, %v1805_v45, %v1821_v46  ;;  %4780 = vmatprep.mubr.bf16.mxu0 %v2218_v11  ;;  %v1656_v34 = vxor.u32 2147483648, %v1655_v42  ;;  %v1742_v31 = vsub.s32 0, %v7218_v0  ;;  %vm1813_vm1 = vcmp.lt.s32.totalorder %v7029_v17, 2 }
 0x217   : > { %v1824_v58 = vsel %vm1812_vm15, %v1802_v33, %v1805_v45  ;;  %v1816_v59 = vsel %vm1812_vm15, %v1796_v3, %v1799_v36  ;;  %v1823_v56 = vsel %vm1813_vm1, %v1820_v37, %v1822_v24  ;;  %v1825_v12 = vsel %vm1815_vm14, %v1811_v10, 1326507024  ;;  %v5250_v45 = vld [vmem:[#allocation2 + $0x40] sm:$0xff]   ;;  %v5251_v10 = vld [vmem:[#allocation2 + $0x48] sm:$0xff]   ;;  %v5252_v3 = vld [vmem:[#allocation2 + $0x50] sm:$0xff]  }
 0x218   : > { %v1828_v14 = vshll.u32 %v1788_v32, 8  ;;  %v1657_v8 = vsel %vm1574_vm2, %v1656_v34, %v1655_v42  ;;  %v4471_v18 = vmin.u32 %v1742_v31, %v7218_v0  ;;  %v1818_v25 = vsel %vm1814_vm0, %v1802_v33, %v1817_v47  ;;  %4788 = vmatprep.subr.bf16.mxu1 %v5250_v45 }
 0x219   : > { %v1826_v21 = vsel %vm1814_vm0, %v1808_v50, %v1825_v12  ;;  %v1660_v36 = vsel %vm7186_vm8, %v7999_v51, %v1657_v8  ;;  %v7260_v54 = vsel %vm1999_vm13, %v7135_v9, 0  ;;  %v1762_v44 = vsub.s32 4, %v1738_v19  ;;  %4789 = vmatpush3.bf16.msra.mxu1 %v5250_v45 }
 0x21a   : > { %v1827_v29 = vsel %vm1813_vm1, %v1824_v58, %v1826_v21  ;;  %v7253_v4 = vmul.u32.u64.low %v1828_v14, %v1823_v56  ;;  %v7254_v32 = vmul.u32.u64.high %v1828_v14, %v1823_v56, %v7253_v4  ;;  %v1744_v27 = vclz %v4471_v18  ;;  %4790 = vmatprep.subr.bf16.mxu1 %v5251_v10  ;;  %v5253_v21 = vld [vmem:[#allocation2 + $0x58] sm:$0xff]  }
 0x21b   : > { %v1665_v52 = vadd.s32 3, %v1661_v48  ;;  %v7262_v50 = vmul.u32.u64.low %v1828_v14, %v1827_v29  ;;  %v7263_v2 = vmul.u32.u64.high %v1828_v14, %v1827_v29, %v7262_v50  ;;  %v4486_v20 = vadd.s32 4294967169, %v7043_v38 }
 0x21c   : > { %5370 = vcosq.f32 %v1660_v36  ;;  %v4472_v1 = vadd.s32 4294967294, %v1744_v27  ;;  %v1819_v33 = vsel %vm1813_vm1, %v1816_v59, %v1818_v25  ;;  %v7269_v22 = vsub.s32 32, %v7132_v43 }
 0x21d   : > { %v7272_v15 = vand.u32 31, %v7260_v54  ;;  %vm1678_vm5 = vcmp.lt.s32.totalorder %v8002_v40, 0  ;;  %v1838_v9 = vadd.s32 1, %v7254_v32  ;;  %5372 = vsinq.f32 %v1660_v36  ;;  %4791 = vmatpush3.bf16.msra.mxu1 %v5251_v10 }
 0x21e   : > { %vm7278_vm6 = vcmp.le.f32.partialorder %v1676_v49, 0.7853982  ;;  %vm4473_vm2 = vcmp.lt.s32.totalorder %v4472_v1, 0  ;;  %v1763_v17 = vsel %vm1678_vm5, %v1762_v44, %v1738_v19  ;;  %v7284_v39 = vand.u32 3, %v1665_v52  ;;  %4792 = vmatprep.subr.bf16.mxu1 %v5252_v3 }
 0x21f   : > { %v1747_v62 = vsel %vm4473_vm2, 0, %v4472_v1  ;;  %v1835_v28 = vmul.u32 %v1828_v14, %v1819_v33  ;;  %vm1837_vm3 = vc.u32 %v7263_v2, %v7253_v4  ;;  %v1732_v61 = vadd.s32 %v7142_v57, %v7129_v13 }
 0x220   : > { %v1748_v46 = vsub.s32 32, %v1747_v62  ;;  %v1752_v49 = vsub.s32 4294967266, %v1747_v62  ;;  %v1839_v11 = vsel %vm1837_vm3, %v1838_v9, %v7254_v32  ;;  %v7291_v42 = vadd.s32 1, %v4486_v20 }
 0x221   : > { %v7294_v19 = vshrl.u32 %v7053_v63, 5  ;;  %v1765_v37 = vsel %vm7278_vm6, 0, %v1763_v17  ;;  %v1840_v48 = vadd.s32 %v1839_v11, %v1835_v28  ;;  %v1749_v47 = vshll.u32 %v7218_v0, %v1747_v62  ;;  %4793 = vmatpush3.bf16.msra.mxu1 %v5252_v3 }
 0x222   : > { %v1750_v24 = vshrl.u32 %v1732_v61, %v1748_v46  ;;  %v1753_v13 = vadd.s32 127, %v1752_v49  ;;  %v1884_v57 = vand.u32 2147483647, %v6451_v30  ;;  %v7301_v34 = vsub.s32 32, %v7272_v15  ;;  %4794 = vmatprep.subr.bf16.mxu1 %v5253_v21  ;;  %v5254_v49 = vld [vmem:[#allocation2 + $0x60] sm:$0xff]  }
 0x223   : > { %v1841_v31 = vadd.s32 536870912, %v1840_v48  ;;  %v1902_v63 = vshrl.u32 %v7959_v55, %v7269_v22  ;;  %v1905_v58 = vshrl.u32 %v7960_v16, %v7269_v22  ;;  %vm1671_vm9 = vcmp.eq.s32.totalorder %v7284_v39, 2 }
 0x224   : > { %v1751_v59 = vor.u32 %v1750_v24, %v1749_v47  ;;  %v1754_v56 = vshll.u32 %v1753_v13, 23  ;;  %v1769_v12 = vadd.s32 3, %v1765_v37  ;;  %v1911_v0 = vshrl.u32 %v7943_v7, %v7269_v22 }
 0x225   : > { %v7310_v14 = vshrl.u32 %v1841_v31, 30  ;;  %v1901_v8 = vshll.u32 %v7964_v35, %v7132_v43  ;;  %v1904_v18 = vshll.u32 %v7959_v55, %v7132_v43  ;;  %v1908_v25 = vshrl.u32 %v7942_v60, %v7269_v22  ;;  %4795 = vmatpush3.bf16.msra.mxu1 %v5253_v21 }
 0x226   : > { %v5371_v36 = vpop.eup %5370  ;;  %vm1668_vm4 = vcmp.eq.s32.totalorder %v7284_v39, 0  ;;  %v1755_v29 = vor.u32 4788187, %v1754_v56  ;;  %v1891_v32 = vand.u32 8388607, %v1884_v57  ;;  %v1910_v27 = vshll.u32 %v7942_v60, %v7132_v43  ;;  %4796 = vmatprep.subr.bf16.mxu1 %v5254_v49 }
 0x227   : > { %v1914_v44 = vshrl.u32 %v7944_v53, %v7269_v22  ;;  %v1843_v52 = vshll.u32 %v7310_v14, 30  ;;  %v1903_v50 = vor.u32 %v1902_v63, %v1901_v8  ;;  %v1906_v20 = vor.u32 %v1905_v58, %v1904_v18  ;;  %v5373_v33 = vpop.eup %5372 }
 0x228   : > { %v1907_v1 = vshll.u32 %v7960_v16, %v7132_v43  ;;  %vm2103_vm10 = vcmp.gt.s32.totalorder %v7291_v42, 0  ;;  %v1756_v9 = vand.u32 2147483647, %v1755_v29  ;;  %v1758_v45 = vcvt.s32.f32 %v1751_v59  ;;  %v5255_v59 = vld [vmem:[#allocation2 + $0x68] sm:$0xff]  }
 0x229   : > { %v1912_v10 = vor.u32 %v1911_v0, %v1910_v27  ;;  %v1913_v17 = vshll.u32 %v7943_v7, %v7132_v43  ;;  %v1672_v62 = vxor.u32 2147483648, %v5371_v36  ;;  %v7331_v28 = vand.u32 3, %v1769_v12  ;;  %4797 = vmatpush3.bf16.msra.mxu1 %v5254_v49 }
 0x22a   : > { %v7333_v61 = vsub.s32 %v1840_v48, %v1843_v52  ;;  %v1909_v46 = vor.u32 %v1908_v25, %v1907_v1  ;;  %v1759_v11 = vmul.f32 %v1758_v45, %v1756_v9  ;;  %v1892_v37 = vor.u32 8388608, %v1891_v32  ;;  %4798 = vmatprep.subr.bf16.mxu1 %v5255_v59  ;;  %v5256_v1 = vld [vmem:[#allocation2 + $0x70] sm:$0xff]  }
 0x22b   : > { %v1900_v47 = vshrl.u32 %v7964_v35, %v7269_v22  ;;  %v1915_v24 = vor.u32 %v1914_v44, %v1913_v17  ;;  %v1669_v13 = vxor.u32 2147483648, %v5373_v33  ;;  %vm1916_vm11 = vcmp.lt.s32.totalorder %v7294_v19, 1 }
 0x22c   : > { %v1846_v31 = vsub.s32 0, %v7333_v61  ;;  %vm1919_vm12 = vcmp.lt.s32.totalorder %v7294_v19, 4  ;;  %v1760_v43 = vxor.u32 2147483648, %v1759_v11  ;;  %vm1918_vm8 = vcmp.lt.s32.totalorder %v7294_v19, 3 }
 0x22d   : > { %v1924_v48 = vsel %vm1916_vm11, %v1903_v50, %v1906_v20  ;;  %v1925_v3 = vsel %vm1919_vm12, %v1912_v10, 920167782  ;;  %v1673_v63 = vsel %vm1671_vm9, %v1672_v62, %v5373_v33  ;;  %vm1917_vm13 = vcmp.lt.s32.totalorder %v7294_v19, 2  ;;  %4799 = vmatpush3.bf16.msra.mxu1 %v5255_v59 }
 0x22e   : > { %v4475_v22 = vmin.u32 %v1846_v31, %v7333_v61  ;;  %v1926_v58 = vsel %vm1918_vm8, %v1909_v46, %v1925_v3  ;;  %v1761_v56 = vsel %vm1678_vm5, %v1760_v43, %v1759_v11  ;;  %v1921_v12 = vsel %vm1919_vm12, %v1909_v46, 2102212464  ;;  %4800 = vmatprep.subr.bf16.mxu1 %v5256_v1 }
 0x22f   : > { %v1928_v0 = vsel %vm1916_vm11, %v1906_v20, %v1909_v46  ;;  %v1929_v8 = vsel %vm1919_vm12, %v1915_v24, 1326507024  ;;  %v1670_v18 = vsel %vm1668_vm4, %v5371_v36, %v1669_v13  ;;  %v1764_v25 = vsel %vm7278_vm6, %v8002_v40, %v1761_v56 }
 0x230   : > { %v1848_v21 = vclz %v4475_v22  ;;  %v1927_v29 = vsel %vm1917_vm13, %v1924_v48, %v1926_v58  ;;  %5374 = vcosq.f32 %v1764_v25  ;;  %v1920_v32 = vsel %vm1916_vm11, %v1900_v47, %v1903_v50 }
 0x231   : > { %v1930_v27 = vsel %vm1918_vm8, %v1912_v10, %v1929_v8  ;;  %v1932_v44 = vshll.u32 %v1892_v37, 8  ;;  %5376 = vsinq.f32 %v1764_v25  ;;  %v1922_v36 = vsel %vm1918_vm8, %v1906_v20, %v1921_v12  ;;  %4801 = vmatpush3.bf16.msra.mxu1 %v5256_v1 }
 0x232   : > { %v4476_v52 = vadd.s32 4294967294, %v1848_v21  ;;  %v1931_v38 = vsel %vm1917_vm13, %v1928_v0, %v1930_v27  ;;  %v7378_v10 = vsel %vm2103_vm10, %v7291_v42, 0  ;;  %v7381_v17 = vshrl.u32 %v7260_v54, 5  ;;  %v5257_v54 = vld [vmem:[#allocation2 + $0x78] sm:$0xff]  }
 0x233   : > { %v7368_v33 = vmul.u32.u64.low %v1932_v44, %v1931_v38  ;;  %v7369_v9 = vmul.u32.u64.high %v1932_v44, %v1931_v38, %v7368_v33  ;;  %v7371_v45 = vmul.u32.u64.low %v1932_v44, %v1927_v29  ;;  %v7372_v50 = vmul.u32.u64.high %v1932_v44, %v1927_v29, %v7371_v45  ;;  %4802 = vmatprep.subr.bf16.mxu1 %v5257_v54 }
 0x234   : > { %vm4477_vm14 = vcmp.lt.s32.totalorder %v4476_v52, 0  ;;  %vm1664_vm15 = vweird.f32 %v7999_v51  ;;  %vm1667_vm0 = vcmp.lt.s32.totalorder %v7284_v39, 2  ;;  %v1923_v62 = vsel %vm1917_vm13, %v1920_v32, %v1922_v36 }
 0x235   : > { %v1851_v20 = vsel %vm4477_vm14, 0, %v4476_v52  ;;  %v1674_v46 = vsel %vm1667_vm0, %v1670_v18, %v1673_v63  ;;  %vm1772_vm1 = vcmp.eq.s32.totalorder %v7331_v28, 0  ;;  %v1836_v42 = vadd.s32 %v7253_v4, %v7263_v2  ;;  %4803 = vmatpush3.bf16.msra.mxu1 %v5257_v54 }
 0x236   : > { %v1852_v49 = vsub.s32 32, %v1851_v20  ;;  %v1856_v11 = vsub.s32 4294967266, %v1851_v20  ;;  %vm1771_vm5 = vcmp.lt.s32.totalorder %v7331_v28, 2  ;;  %vm1941_vm6 = vc.u32 %v7369_v9, %v7371_v45 }
 0x237   : > { %v1942_v39 = vadd.s32 1, %v7372_v50  ;;  %v1988_v19 = vand.u32 2147483647, %v6686_v41  ;;  %v2006_v37 = vshrl.u32 %v7959_v55, %v7301_v34  ;;  %vm1768_vm2 = vweird.f32 %v8002_v40 }
 0x238   : > { %v1853_v4 = vshll.u32 %v7333_v61, %v1851_v20  ;;  %v1854_v2 = vshrl.u32 %v1836_v42, %v1852_v49  ;;  %v1857_v47 = vadd.s32 127, %v1856_v11  ;;  %v1939_v24 = vmul.u32 %v1932_v44, %v1923_v62 }
 0x239   : > { %v1675_v13 = vsel %vm1664_vm15, nan, %v1674_v46  ;;  %vm1775_vm3 = vcmp.eq.s32.totalorder %v7331_v28, 2  ;;  %v1943_v31 = vsel %vm1941_vm6, %v1942_v39, %v7372_v50  ;;  %v2005_v43 = vshll.u32 %v7964_v35, %v7272_v15 }
 0x23a   : > { %v1855_v48 = vor.u32 %v1854_v2, %v1853_v4  ;;  %v1858_v3 = vshll.u32 %v1857_v47, 23  ;;  %v1944_v63 = vadd.s32 %v1943_v31, %v1939_v24  ;;  %v2008_v61 = vshll.u32 %v7959_v55, %v7272_v15  ;;  %v5375_v22 = vpop.eup %5374 }
 0x23b   : > { %vm1782_vm9 = vcmp.lt.s32.totalorder %v8005_v5, 0  ;;  %v1995_v58 = vand.u32 8388607, %v1988_v19  ;;  %v2007_v59 = vor.u32 %v2006_v37, %v2005_v43  ;;  %v2009_v56 = vshrl.u32 %v7960_v16, %v7301_v34  ;;  %v5377_v0 = vpop.eup %5376 }
 0x23c   : > { %v2015_v12 = vshrl.u32 %v7943_v7, %v7301_v34  ;;  %v1776_v8 = vxor.u32 2147483648, %v5375_v22  ;;  %v1859_v18 = vor.u32 4788187, %v1858_v3  ;;  %v1945_v25 = vadd.s32 536870912, %v1944_v63 }
 0x23d   : > { %v2011_v21 = vshll.u32 %v7960_v16, %v7272_v15  ;;  %v1773_v29 = vxor.u32 2147483648, %v5377_v0  ;;  %v2012_v32 = vshrl.u32 %v7942_v60, %v7301_v34  ;;  %v2014_v27 = vshll.u32 %v7942_v60, %v7272_v15 }
 0x23e   : > { %v2018_v44 = vshrl.u32 %v7944_v53, %v7301_v34  ;;  %v1777_v52 = vsel %vm1775_vm3, %v1776_v8, %v5377_v0  ;;  %v1860_v36 = vand.u32 2147483647, %v1859_v18  ;;  %v1862_v38 = vcvt.s32.f32 %v1855_v48 }
 0x23f   : > { %v7424_v1 = vshrl.u32 %v1945_v25, 30  ;;  %v1774_v33 = vsel %vm1772_vm1, %v5375_v22, %v1773_v29  ;;  %v2010_v50 = vor.u32 %v2009_v56, %v2008_v61  ;;  %v2016_v20 = vor.u32 %v2015_v12, %v2014_v27 }
 0x240   : > { %v2017_v62 = vshll.u32 %v7943_v7, %v7272_v15  ;;  %v1778_v46 = vsel %vm1771_vm5, %v1774_v33, %v1777_v52  ;;  %v1863_v42 = vmul.f32 %v1862_v38, %v1860_v36  ;;  %v1866_v49 = vsub.s32 4, %v7310_v14 }
 0x241   : > { %v1947_v11 = vshll.u32 %v7424_v1, 30  ;;  %v1779_v54 = vsel %vm1768_vm2, nan, %v1778_v46  ;;  %v2208_v39 = vsel %vm6149_vm7, %v7999_v51, %v1675_v13  ;;  %v2013_v37 = vor.u32 %v2012_v32, %v2011_v21 }
 0x242   : > { %v2019_v4 = vor.u32 %v2018_v44, %v2017_v62  ;;  %v2209_v15 = vsel %vm6149_vm7, %v8002_v40, %v1779_v54  ;;  %vm2020_vm4 = vcmp.lt.s32.totalorder %v7381_v17, 1  ;;  %vm2023_vm10 = vcmp.lt.s32.totalorder %v7381_v17, 4 }
 0x243   : > { %v7442_v28 = vsub.s32 %v1944_v63, %v1947_v11  ;;  %v2219_v2 = vpack.c.bf16 %v2209_v15, %v2208_v39  ;;  %v1996_v47 = vor.u32 8388608, %v1995_v58  ;;  %v2028_v24 = vsel %vm2020_vm4, %v2007_v59, %v2010_v50 }
 0x244   : > { %v2029_v31 = vsel %vm2023_vm10, %v2016_v20, 920167782  ;;  %v1864_v43 = vxor.u32 2147483648, %v1863_v42  ;;  %v1867_v51 = vsel %vm1782_vm9, %v1866_v49, %v7310_v14  ;;  %vm2022_vm11 = vcmp.lt.s32.totalorder %v7381_v17, 3 }
 0x245   : > { %v1950_v13 = vsub.s32 0, %v7442_v28  ;;  %4781 = vmatmul.mubr.bf16.gmra.mrb[8].mxu0 %v2219_v2  ;;  %vm2021_vm12 = vcmp.lt.s32.totalorder %v7381_v17, 2  ;;  %v2025_v40 = vsel %vm2023_vm10, %v2013_v37, 2102212464  ;;  %v2030_v48 = vsel %vm2022_vm11, %v2013_v37, %v2029_v31 }
 0x246   : > { %v2033_v3 = vsel %vm2023_vm10, %v2019_v4, 1326507024  ;;  %v2004_v61 = vshrl.u32 %v7964_v35, %v7301_v34  ;;  %v2031_v14 = vsel %vm2021_vm12, %v2028_v24, %v2030_v48  ;;  %v2032_v22 = vsel %vm2020_vm4, %v2010_v50, %v2013_v37 }
 0x247   : > { %v4479_v63 = vmin.u32 %v1950_v13, %v7442_v28  ;;  %v2106_v58 = vand.u32 31, %v7378_v10  ;;  %vm7466_vm8 = vcmp.le.f32.partialorder %v1780_v6, 0.7853982  ;;  %v2034_v12 = vsel %vm2022_vm11, %v2016_v20, %v2033_v3 }
 0x248   : > { %v2036_v0 = vshll.u32 %v1996_v47, 8  ;;  %v1865_v34 = vsel %vm1782_vm9, %v1864_v43, %v1863_v42  ;;  %v2024_v18 = vsel %vm2020_vm4, %v2004_v61, %v2007_v59  ;;  %v2026_v25 = vsel %vm2022_vm11, %v2010_v50, %v2025_v40 }
 0x249   : > { %v1952_v8 = vclz %v4479_v63  ;;  %v1869_v6 = vsel %vm7466_vm8, 0, %v1867_v51  ;;  %v2035_v21 = vsel %vm2021_vm12, %v2032_v22, %v2034_v12  ;;  %v2107_v36 = vsub.s32 32, %v2106_v58 }
 0x24a   : > { %v7482_v29 = vmul.u32.u64.low %v2036_v0, %v2031_v14  ;;  %v7483_v32 = vmul.u32.u64.high %v2036_v0, %v2031_v14, %v7482_v29  ;;  %v7486_v44 = vmul.u32.u64.low %v2036_v0, %v2035_v21  ;;  %v7487_v52 = vmul.u32.u64.high %v2036_v0, %v2035_v21, %v7486_v44 }
 0x24b   : > { %v4480_v27 = vadd.s32 4294967294, %v1952_v8  ;;  %v1868_v59 = vsel %vm7466_vm8, %v8005_v5, %v1865_v34  ;;  %v2027_v38 = vsel %vm2021_vm12, %v2024_v18, %v2026_v25  ;;  %v7495_v33 = vshrl.u32 %v7378_v10, 5  ;;  %v8014_v18 = vld [vmem:[#allocation5_spill] sm:$0xff] }
 0x24c   : > { %v1873_v50 = vadd.s32 3, %v1869_v6  ;;  %v1940_v20 = vadd.s32 %v7371_v45, %v7369_v9  ;;  %v1970_v46 = vsub.s32 4, %v7424_v1  ;;  %v2046_v42 = vadd.s32 1, %v7483_v32 }
 0x24d   : > { %vm4481_vm13 = vcmp.lt.s32.totalorder %v4480_v27, 0  ;;  %5378 = vcosq.f32 %v1868_v59  ;;  %vm1886_vm14 = vcmp.lt.s32.totalorder %v6451_v30, 0  ;;  %v2043_v17 = vmul.u32 %v2036_v0, %v2027_v38 }
 0x24e   : > { %v1955_v62 = vsel %vm4481_vm13, 0, %v4480_v27  ;;  %vm2045_vm15 = vc.u32 %v7487_v52, %v7482_v29  ;;  %v2092_v10 = vand.u32 2147483647, %v6376_v23  ;;  %v2110_v54 = vshrl.u32 %v7959_v55, %v2107_v36 }
 0x24f   : > { %v1956_v49 = vsub.s32 32, %v1955_v62  ;;  %v1960_v11 = vsub.s32 4294967266, %v1955_v62  ;;  %v2113_v9 = vshrl.u32 %v7960_v16, %v2107_v36  ;;  %v1957_v45 = vshll.u32 %v7442_v28, %v1955_v62 }
 0x250   : > { %v2047_v4 = vsel %vm2045_vm15, %v2046_v42, %v7483_v32  ;;  %5380 = vsinq.f32 %v1868_v59  ;;  %v2109_v2 = vshll.u32 %v7964_v35, %v2106_v58  ;;  %v2119_v47 = vshrl.u32 %v7943_v7, %v2107_v36 }
 0x251   : > { %v1958_v39 = vshrl.u32 %v1940_v20, %v1956_v49  ;;  %v1961_v37 = vadd.s32 127, %v1960_v11  ;;  %v2048_v15 = vadd.s32 %v2047_v4, %v2043_v17  ;;  %v2112_v43 = vshll.u32 %v7959_v55, %v2106_v58 }
 0x252   : > { %v2116_v51 = vshrl.u32 %v7942_v60, %v2107_v36  ;;  %v2099_v28 = vand.u32 8388607, %v2092_v10  ;;  %v2111_v40 = vor.u32 %v2110_v54, %v2109_v2  ;;  %v2118_v48 = vshll.u32 %v7942_v60, %v2106_v58 }
 0x253   : > { %v1959_v24 = vor.u32 %v1958_v39, %v1957_v45  ;;  %v1962_v31 = vshll.u32 %v1961_v37, 23  ;;  %v2049_v13 = vadd.s32 536870912, %v2048_v15  ;;  %v2114_v63 = vor.u32 %v2113_v9, %v2112_v43 }
 0x254   : > { %v2115_v61 = vshll.u32 %v7960_v16, %v2106_v58  ;;  %v2122_v14 = vshrl.u32 %v7944_v53, %v2107_v36  ;;  %v7518_v22 = vand.u32 3, %v1873_v50  ;;  %vm7522_vm0 = vcmp.le.f32.partialorder %v1884_v57, 0.7853982 }
 0x255   : > { %v1963_v3 = vor.u32 4788187, %v1962_v31  ;;  %v7526_v56 = vshrl.u32 %v2049_v13, 30  ;;  %v2120_v12 = vor.u32 %v2119_v47, %v2118_v48  ;;  %v1966_v34 = vcvt.s32.f32 %v1959_v24 }
 0x256   : > { %v2117_v60 = vor.u32 %v2116_v51, %v2115_v61  ;;  %v2121_v8 = vshll.u32 %v7943_v7, %v2106_v58  ;;  %vm2222_vm1 = vcmp.lt.s32.totalorder %v8014_v18, 64  ;;  %v1971_v53 = vsel %vm1886_vm14, %v1970_v46, %v7424_v1 }
 0x257   : > { %v1964_v0 = vand.u32 2147483647, %v1963_v3  ;;  %v2051_v16 = vshll.u32 %v7526_v56, 30  ;;  %v2100_v57 = vor.u32 8388608, %v2099_v28  ;;  %vm2124_vm5 = vcmp.lt.s32.totalorder %v7495_v33, 1  ;;  %v5379_v25 = vpop.eup %5378 }
 0x258   : > { %v2123_v21 = vor.u32 %v2122_v14, %v2121_v8  ;;  %vm2127_vm6 = vcmp.lt.s32.totalorder %v7495_v33, 4  ;;  %v2132_v32 = vsel %vm2124_vm5, %v2111_v40, %v2114_v63  ;;  %v2108_v58 = vshrl.u32 %v7964_v35, %v2107_v36 }
 0x259   : > { %v1967_v6 = vmul.f32 %v1966_v34, %v1964_v0  ;;  %v7538_v7 = vsub.s32 %v2048_v15, %v2051_v16  ;;  %vm2126_vm2 = vcmp.lt.s32.totalorder %v7495_v33, 3  ;;  %v2133_v1 = vsel %vm2127_vm6, %v2120_v12, 920167782 }
 0x25a   : > { %vm2125_vm3 = vcmp.lt.s32.totalorder %v7495_v33, 2  ;;  %v2129_v44 = vsel %vm2127_vm6, %v2117_v60, 2102212464  ;;  %v2134_v59 = vsel %vm2126_vm2, %v2117_v60, %v2133_v1  ;;  %v5381_v38 = vpop.eup %5380  ;;  %v1973_v50 = vsel %vm7522_vm0, 0, %v1971_v53 }
 0x25b   : > { %v1968_v27 = vxor.u32 2147483648, %v1967_v6  ;;  %v2054_v35 = vsub.s32 0, %v7538_v7  ;;  %v2135_v36 = vsel %vm2125_vm3, %v2132_v32, %v2134_v59  ;;  %v2136_v20 = vsel %vm2124_vm5, %v2114_v63, %v2117_v60 }
 0x25c   : > { %v2128_v46 = vsel %vm2124_vm5, %v2108_v58, %v2111_v40  ;;  %v2137_v42 = vsel %vm2127_vm6, %v2123_v21, 1326507024  ;;  %v2140_v49 = vshll.u32 %v2100_v57, 8  ;;  %v2130_v54 = vsel %vm2126_vm2, %v2114_v63, %v2129_v44 }
 0x25d   : > { %v1969_v62 = vsel %vm1886_vm14, %v1968_v27, %v1967_v6  ;;  %v4483_v17 = vmin.u32 %v2054_v35, %v7538_v7  ;;  %v2138_v9 = vsel %vm2126_vm2, %v2120_v12, %v2137_v42  ;;  %v1977_v4 = vadd.s32 3, %v1973_v50 }
 0x25e   : > { %v1972_v11 = vsel %vm7522_vm0, %v6451_v30, %v1969_v62  ;;  %v2139_v45 = vsel %vm2125_vm3, %v2136_v20, %v2138_v9  ;;  %v7572_v39 = vmul.u32.u64.low %v2140_v49, %v2135_v36  ;;  %v7573_v37 = vmul.u32.u64.high %v2140_v49, %v2135_v36, %v7572_v39 }
 0x25f   : > { %5382 = vcosq.f32 %v1972_v11  ;;  %v2056_v15 = vclz %v4483_v17  ;;  %v1880_v2 = vxor.u32 2147483648, %v5379_v25  ;;  %v1877_v31 = vxor.u32 2147483648, %v5381_v38 }
 0x260   : > { %5384 = vsinq.f32 %v1972_v11  ;;  %v7576_v47 = vmul.u32.u64.low %v2140_v49, %v2139_v45  ;;  %v7577_v24 = vmul.u32.u64.high %v2140_v49, %v2139_v45, %v7576_v47  ;;  %v2131_v51 = vsel %vm2125_vm3, %v2128_v46, %v2130_v54  ;;  %v4774_v60 = vpop.f32.mrb[0].mxu0 }
 0x261   : > { %v4484_v43 = vadd.s32 4294967294, %v2056_v15  ;;  %v5510_v13 = vmov -3e+38   ;;  %vm1876_vm9 = vcmp.eq.s32.totalorder %v7518_v22, 0  ;;  %v2150_v40 = vadd.s32 1, %v7573_v37  ;;  %v2324_v8 = vpop.f32.mrb[1].mxu0 }
 0x262   : > { %v7584_v28 = vsel %vm2222_vm1, 0.0, %v5510_v13  ;;  %vm1879_vm4 = vcmp.eq.s32.totalorder %v7518_v22, 2  ;;  %v1978_v48 = vand.u32 3, %v1977_v4  ;;  %v2044_v3 = vadd.s32 %v7482_v29, %v7487_v52  ;;  %v4775_v21 = vpop.f32.mrb[2].mxu0 }
 0x263   : > { %vm4485_vm10 = vcmp.lt.s32.totalorder %v4484_v43, 0  ;;  %v1881_v63 = vsel %vm1879_vm4, %v1880_v2, %v5381_v38  ;;  %v2147_v61 = vmul.u32 %v2140_v49, %v2131_v51  ;;  %vm2149_vm11 = vc.u32 %v7577_v24, %v7572_v39  ;;  %v2327_v44 = vpop.f32.mrb[3].mxu0 }
 0x264   : > { %v2059_v33 = vsel %vm4485_vm10, 0, %v4484_v43  ;;  %v1878_v14 = vsel %vm1876_vm9, %v5379_v25, %v1877_v31  ;;  %v2151_v0 = vsel %vm2149_vm11, %v2150_v40, %v7573_v37  ;;  %vm1872_vm12 = vweird.f32 %v8005_v5 }
 0x265   : > { %v2060_v55 = vsub.s32 32, %v2059_v33  ;;  %v2064_v12 = vsub.s32 4294967266, %v2059_v33  ;;  %vm1875_vm8 = vcmp.lt.s32.totalorder %v7518_v22, 2  ;;  %v2152_v34 = vadd.s32 %v2151_v0, %v2147_v61 }
 0x266   : > { %vm1979_vm13 = vcmp.lt.s32.totalorder %v1978_v48, 2  ;;  %vm1983_vm14 = vcmp.eq.s32.totalorder %v1978_v48, 2  ;;  %v1882_v16 = vsel %vm1875_vm8, %v1878_v14, %v1881_v63  ;;  %v2061_v57 = vshll.u32 %v7538_v7, %v2059_v33 }
 0x267   : > { %v2062_v29 = vshrl.u32 %v2044_v3, %v2060_v55  ;;  %v2065_v52 = vadd.s32 127, %v2064_v12  ;;  %v2153_v25 = vadd.s32 536870912, %v2152_v34  ;;  %v2389_v6 = vmax.f32 %v4774_v60, %v7584_v28 }
 0x268   : > { %v2387_v22 = vmax.f32 %v2324_v8, %v7584_v28  ;;  %v2390_v27 = vmax.f32 %v4775_v21, %v7584_v28  ;;  %v2388_v35 = vmax.f32 %v2327_v44, %v7584_v28  ;;  %vm1980_vm15 = vcmp.eq.s32.totalorder %v1978_v48, 0 }
 0x269   : > { %v5383_v53 = vpop.eup %5382  ;;  %v2066_v1 = vshll.u32 %v2065_v52, 23  ;;  %v2063_v38 = vor.u32 %v2062_v29, %v2061_v57  ;;  %v2154_v50 = vshrl.u32 %v2153_v25, 30  ;;  %v1883_v62 = vsel %vm1872_vm12, nan, %v1882_v16 }
 0x26a   : > { %v5385_v32 = vpop.eup %5384  ;;  %v1984_v58 = vxor.u32 2147483648, %v5383_v53  ;;  %v2404_v20 = vpack.c.bf16 %v2390_v27, %v2389_v6  ;;  %v2403_v49 = vpack.c.bf16 %v2388_v35, %v2387_v22  ;;  %vm1976_vm0 = vweird.f32 %v6451_v30 }
 0x26b   : > { %v1981_v59 = vxor.u32 2147483648, %v5385_v32  ;;  %v2067_v36 = vor.u32 4788187, %v2066_v1  ;;  %v2155_v42 = vshll.u32 %v2154_v50, 30  ;;  %v2070_v9 = vcvt.s32.f32 %v2063_v38 }
 0x26c   : > { %v1985_v7 = vsel %vm1983_vm14, %v1984_v58, %v5385_v32  ;;  %4804 = vmatprep.mubr.bf16.mxu1 %v2403_v49  ;;  %v2210_v37 = vsel %vm6149_vm7, %v8005_v5, %v1883_v62  ;;  %vm1990_vm1 = vcmp.lt.s32.totalorder %v6686_v41, 0  ;;  %vm7617_vm6 = vcmp.le.f32.partialorder %v1988_v19, 0.7853982 }
 0x26d   : > { %v1982_v46 = vsel %vm1980_vm15, %v5383_v53, %v1981_v59  ;;  %v2068_v17 = vand.u32 2147483647, %v2067_v36  ;;  %v2156_v45 = vsub.s32 %v2152_v34, %v2155_v42  ;;  %4805 = vmatmul.mubr.bf16.vlgmr.msra.gmra.mrb[0].mxu1 %v2404_v20  ;;  %v2148_v3 = vadd.s32 %v7572_v39, %v7577_v24 }
 0x26e   : > { %v1986_v11 = vsel %vm1979_vm13, %v1982_v46, %v1985_v7  ;;  %v2074_v0 = vsub.s32 4, %v7526_v56  ;;  %v2178_v53 = vsub.s32 4, %v2154_v50  ;;  %vm2094_vm2 = vcmp.lt.s32.totalorder %v6376_v23, 0 }
 0x26f   : > { %v1987_v54 = vsel %vm1976_vm0, nan, %v1986_v11  ;;  %v2071_v2 = vmul.f32 %v2070_v9, %v2068_v17  ;;  %v2158_v47 = vsub.s32 0, %v2156_v45  ;;  %vm2093_vm3 = vcmp.le.f32.partialorder %v2092_v10, 0.7853982 }
 0x270   : > { %v2211_v4 = vsel %vm6149_vm7, %v6451_v30, %v1987_v54  ;;  %v2075_v39 = vsel %vm1990_vm1, %v2074_v0, %v7526_v56  ;;  %v2179_v21 = vsel %vm2094_vm2, %v2178_v53, %v2154_v50  ;;  %vm2080_vm11 = vweird.f32 %v6686_v41  ;;  %v5263_v30 = vld [vmem:[#allocation2 + $0xa8] sm:$0xff]  }
 0x271   : > { %v2220_v15 = vpack.c.bf16 %v2211_v4, %v2210_v37  ;;  %v4487_v31 = vmin.u32 %v2158_v47, %v2156_v45  ;;  %v2072_v43 = vxor.u32 2147483648, %v2071_v2  ;;  %v2077_v52 = vsel %vm7617_vm6, 0, %v2075_v39 }
 0x272   : > { %v2081_v57 = vadd.s32 3, %v2077_v52  ;;  %v2181_v1 = vsel %vm2093_vm3, 0, %v2179_v21  ;;  %vm2184_vm14 = vweird.f32 %v6376_v23  ;;  %vm4311_vm15 = vcmp.lt.s32.totalorder %v8014_v18, 3 }
 0x273   : > { %4784 = vmatprep.mubr.bf16.mxu0 %v2220_v15  ;;  %v2160_v51 = vclz %v4487_v31  ;;  %v2073_v48 = vsel %vm1990_vm1, %v2072_v43, %v2071_v2  ;;  %v2185_v44 = vadd.s32 3, %v2181_v1  ;;  %vm4330_vm0 = vcmask 64512  }
 0x274   : > { %v2076_v61 = vsel %vm7617_vm6, %v6686_v41, %v2073_v48  ;;  %v2082_v58 = vand.u32 3, %v2081_v57  ;;  %v5261_v48 = vld [vmem:[#allocation2 + $0x98] sm:$0xff]  }
 0x275   : > { %v4488_v40 = vadd.s32 4294967294, %v2160_v51  ;;  %5386 = vcosq.f32 %v2076_v61  ;;  %v2186_v35 = vand.u32 3, %v2185_v44 }
 0x276   : > { %5388 = vsinq.f32 %v2076_v61  ;;  %vm2084_vm9 = vcmp.eq.s32.totalorder %v2082_v58, 0  ;;  %vm2087_vm4 = vcmp.eq.s32.totalorder %v2082_v58, 2  ;;  %vm2083_vm10 = vcmp.lt.s32.totalorder %v2082_v58, 2 }
 0x277   : > { %vm4489_vm5 = vcmp.lt.s32.totalorder %v4488_v40, 0  ;;  %vm2191_vm12 = vcmp.eq.s32.totalorder %v2186_v35, 2  ;;  %vm2188_vm8 = vcmp.eq.s32.totalorder %v2186_v35, 0  ;;  %vm2187_vm13 = vcmp.lt.s32.totalorder %v2186_v35, 2 }
 0x278   : > { %v2163_v5 = vsel %vm4489_vm5, 0, %v4488_v40  ;;  %v5260_v40 = vld [vmem:[#allocation2 + $0x90] sm:$0xff]  }
 0x279   : > { %v2164_v63 = vsub.s32 32, %v2163_v5  ;;  %v2168_v33 = vsub.s32 4294967266, %v2163_v5  ;;  %v2165_v14 = vshll.u32 %v2156_v45, %v2163_v5  ;;  %v5262_v5 = vld [vmem:[#allocation2 + $0xa0] sm:$0xff]  }
 0x27b   : > { %v2166_v55 = vshrl.u32 %v2148_v3, %v2164_v63  ;;  %v2169_v12 = vadd.s32 127, %v2168_v33  ;;  %v5264_v3 = vld [vmem:[#allocation2 + $0xb0] sm:$0xff]   ;;  %v5265_v63 = vld [vmem:[#allocation2 + $0xb8] sm:$0xff]  }
 0x27d   : > { %v2167_v34 = vor.u32 %v2166_v55, %v2165_v14  ;;  %v2170_v19 = vshll.u32 %v2169_v12, 23 }
 0x27f   : > { %v2171_v60 = vor.u32 4788187, %v2170_v19  ;;  %v2174_v29 = vcvt.s32.f32 %v2167_v34  ;;  %v5387_v25 = vpop.eup %5386 }
 0x280   : > { %v5389_v32 = vpop.eup %5388  ;;  %v2088_v27 = vxor.u32 2147483648, %v5387_v25 }
 0x281   : > { %v2172_v24 = vand.u32 2147483647, %v2171_v60  ;;  %v2085_v22 = vxor.u32 2147483648, %v5389_v32 }
 0x282   : > { %v2089_v38 = vsel %vm2087_vm4, %v2088_v27, %v5389_v32 }
 0x283   : > { %v2175_v8 = vmul.f32 %v2174_v29, %v2172_v24  ;;  %v2086_v59 = vsel %vm2084_vm9, %v5387_v25, %v2085_v22 }
 0x284   : > { %v2090_v7 = vsel %vm2083_vm10, %v2086_v59, %v2089_v38 }
 0x285   : > { %v2176_v16 = vxor.u32 2147483648, %v2175_v8  ;;  %v2091_v20 = vsel %vm2080_vm11, nan, %v2090_v7 }
 0x286   : > { %v2212_v11 = vsel %vm6149_vm7, %v6686_v41, %v2091_v20 }
 0x287   : > { %v2177_v6 = vsel %vm2094_vm2, %v2176_v16, %v2175_v8 }
 0x288   : > { %v2180_v56 = vsel %vm2093_vm3, %v6376_v23, %v2177_v6 }
 0x289   : > { %5390 = vcosq.f32 %v2180_v56 }
 0x28a   : > { %5392 = vsinq.f32 %v2180_v56 }
 0x293   : > { %v5391_v10 = vpop.eup %5390 }
 0x294   : > { %v5393_v36 = vpop.eup %5392  ;;  %v2192_v50 = vxor.u32 2147483648, %v5391_v10 }
 0x295   : > { %v2189_v62 = vxor.u32 2147483648, %v5393_v36 }
 0x296   : > { %v2193_v46 = vsel %vm2191_vm12, %v2192_v50, %v5393_v36 }
 0x297   : > { %v2190_v42 = vsel %vm2188_vm8, %v5391_v10, %v2189_v62 }
 0x298   : > { %v2194_v49 = vsel %vm2187_vm13, %v2190_v42, %v2193_v46 }
 0x299   : > { %v2195_v17 = vsel %vm2184_vm14, nan, %v2194_v49 }
 0x29a   : > { %v2213_v54 = vsel %vm6149_vm7, %v6376_v23, %v2195_v17  ;;  %v5259_v23 = vld [vmem:[#allocation2 + $0x88] sm:$0xff]   ;;  %v5266_v17 = vld [vmem:[#allocation2 + $0xc0] sm:$0xff]   ;;  %vm2224_vm7 = vcmp.lt.s32.totalorder %v8014_v18, 32 }
 0x29b   : > { %v2221_v9 = vpack.c.bf16 %v2213_v54, %v2212_v11  ;;  %4822 = vmatprep.subr.bf16.mxu0 %v5259_v23  ;;  %v5267_v54 = vld [vmem:[#allocation2 + $0xc8] sm:$0xff]   ;;  %4852 = vmatprep.subr.bf16.mxu1 %v5266_v17 }
 0x29c   : > { %4823 = vmatpush3.bf16.msra.mxu0 %v5259_v23  ;;  %4853 = vmatpush3.bf16.msra.mxu1 %v5266_v17 }
 0x29d   : > { %4785 = vmatmul.mubr.bf16.gmra.mrb[12].mxu0 %v2221_v9  ;;  %4824 = vmatprep.subr.bf16.mxu0 %v5260_v40  ;;  %v5268_v9 = vld [vmem:[#allocation2 + $0xd0] sm:$0xff]  }
 0x29e   : > { %4854 = vmatprep.subr.bf16.mxu1 %v5267_v54 }
 0x2a0   : > { %4825 = vmatpush3.bf16.msra.mxu0 %v5260_v40  ;;  %4855 = vmatpush3.bf16.msra.mxu1 %v5267_v54 }
 0x2a1   : > { %4826 = vmatprep.subr.bf16.mxu0 %v5261_v48  ;;  %4856 = vmatprep.subr.bf16.mxu1 %v5268_v9 }
 0x2a4   : > { %4827 = vmatpush3.bf16.msra.mxu0 %v5261_v48  ;;  %4857 = vmatpush3.bf16.msra.mxu1 %v5268_v9 }
 0x2a5   : > { %4828 = vmatprep.subr.bf16.mxu0 %v5262_v5 }
 0x2a8   : > { %4829 = vmatpush3.bf16.msra.mxu0 %v5262_v5 }
 0x2a9   : > { %4830 = vmatprep.subr.bf16.mxu0 %v5263_v30 }
 0x2ac   : > { %4831 = vmatpush3.bf16.msra.mxu0 %v5263_v30 }
 0x2ad   : > { %4832 = vmatprep.subr.bf16.mxu0 %v5264_v3 }
 0x2b0   : > { %4833 = vmatpush3.bf16.msra.mxu0 %v5264_v3 }
 0x2b1   : > { %4834 = vmatprep.subr.bf16.mxu0 %v5265_v63 }
 0x2b4   : > { %4835 = vmatpush3.bf16.msra.mxu0 %v5265_v63 }
 0x2b9   : > { %v4778_v45 = vpop.f32.mrb[4].mxu0 }
 0x2ba   : > { %v2340_v37 = vpop.f32.mrb[5].mxu0  ;;  %v2393_v15 = vmax.f32 %v4778_v45, %v7584_v28  ;;  %v5269_v45 = vld [vmem:[#allocation2 + $0xd8] sm:$0xff]  }
 0x2bb   : > { %v4779_v4 = vpop.f32.mrb[6].mxu0  ;;  %v2391_v31 = vmax.f32 %v2340_v37, %v7584_v28  ;;  %4858 = vmatprep.subr.bf16.mxu1 %v5269_v45  ;;  %v5270_v37 = vld [vmem:[#allocation2 + $0xe0] sm:$0xff]  }
 0x2bc   : > { %v2394_v2 = vmax.f32 %v4779_v4, %v7584_v28  ;;  %v2343_v47 = vpop.f32.mrb[7].mxu0  ;;  %4859 = vmatpush3.bf16.msra.mxu1 %v5269_v45  ;;  %v5271_v4 = vld [vmem:[#allocation2 + $0xe8] sm:$0xff]  }
 0x2bd   : > { %v2392_v43 = vmax.f32 %v2343_v47, %v7584_v28  ;;  %4860 = vmatprep.subr.bf16.mxu1 %v5270_v37 }
 0x2be   : > { %v2406_v41 = vpack.c.bf16 %v2394_v2, %v2393_v15  ;;  %v5272_v15 = vld [vmem:[#allocation2 + $0xf0] sm:$0xff]   ;;  %v5273_v2 = vld [vmem:[#allocation2 + $0xf8] sm:$0xff]  }
 0x2bf   : > { %v2405_v51 = vpack.c.bf16 %v2392_v43, %v2391_v31 }
 0x2c0   : > { %4861 = vmatpush3.bf16.msra.mxu1 %v5270_v37 }
 0x2c1   : > { %4808 = vmatprep.mubr.bf16.mxu1 %v2405_v51  ;;  %4862 = vmatprep.subr.bf16.mxu1 %v5271_v4 }
 0x2c2   : > { %4809 = vmatmul.mubr.bf16.gmra.mrb[4].mxu1 %v2406_v41 }
 0x2c4   : > { %4863 = vmatpush3.bf16.msra.mxu1 %v5271_v4 }
 0x2c5   : > { %4864 = vmatprep.subr.bf16.mxu1 %v5272_v15 }
 0x2c8   : > { %4865 = vmatpush3.bf16.msra.mxu1 %v5272_v15 }
 0x2c9   : > { %4866 = vmatprep.subr.bf16.mxu1 %v5273_v2 }
 0x2cc   : > { %4867 = vmatpush3.bf16.msra.mxu1 %v5273_v2 }
 0x318   : > { %v4782_v33 = vpop.f32.mrb[8].mxu0 }
 0x319   : > { %v2356_v61 = vpop.f32.mrb[9].mxu0  ;;  %v2397_v55 = vmax.f32 %v4782_v33, %v7584_v28 }
 0x31a   : > { %v4783_v14 = vpop.f32.mrb[10].mxu0  ;;  %v2395_v34 = vmax.f32 %v2356_v61, %v7584_v28 }
 0x31b   : > { %v2398_v12 = vmax.f32 %v4783_v14, %v7584_v28  ;;  %v2359_v0 = vpop.f32.mrb[11].mxu0 }
 0x31c   : > { %v2396_v19 = vmax.f32 %v2359_v0, %v7584_v28 }
 0x31d   : > { %v2408_v60 = vpack.c.bf16 %v2398_v12, %v2397_v55 }
 0x31e   : > { %v2407_v39 = vpack.c.bf16 %v2396_v19, %v2395_v34 }
 0x320   : > { %4812 = vmatprep.mubr.bf16.mxu1 %v2407_v39 }
 0x321   : > { %4813 = vmatmul.mubr.bf16.gmra.mrb[8].mxu1 %v2408_v60 }
 0x340   : > { %v4806_v24 = vpop.f32.mrb[0].mxu1 }
 0x341   : > { %v2510_v29 = vpop.f32.mrb[1].mxu1  ;;  %v2575_v8 = vmax.f32 %v4806_v24, %v7584_v28 }
 0x342   : > { %v4807_v52 = vpop.f32.mrb[2].mxu1  ;;  %v2573_v57 = vmax.f32 %v2510_v29, %v7584_v28 }
 0x343   : > { %v2576_v53 = vmax.f32 %v4807_v52, %v7584_v28  ;;  %v2513_v16 = vpop.f32.mrb[3].mxu1 }
 0x344   : > { %v2574_v25 = vmax.f32 %v2513_v16, %v7584_v28 }
 0x345   : > { %v2590_v6 = vpack.c.bf16 %v2576_v53, %v2575_v8 }
 0x346   : > { %v2589_v21 = vpack.c.bf16 %v2574_v25, %v2573_v57 }
 0x348   : > { %4836 = vmatprep.mubr.bf16.mxu0 %v2589_v21 }
 0x349   : > { %4837 = vmatmul.mubr.bf16.vlgmr.msra.gmra.mrb[16].mxu0 %v2590_v6 }
 0x370   : > { %v4786_v32 = vpop.f32.mrb[12].mxu0 }
 0x371   : > { %v2372_v56 = vpop.f32.mrb[13].mxu0  ;;  %v2401_v1 = vmax.f32 %v4786_v32, %v7584_v28 }
 0x372   : > { %v4787_v58 = vpop.f32.mrb[14].mxu0  ;;  %v2399_v44 = vmax.f32 %v2372_v56, %v7584_v28 }
 0x373   : > { %v2402_v22 = vmax.f32 %v4787_v58, %v7584_v28  ;;  %v2375_v27 = vpop.f32.mrb[15].mxu0 }
 0x374   : > { %v2400_v59 = vmax.f32 %v2375_v27, %v7584_v28 }
 0x375   : > { %v2410_v38 = vpack.c.bf16 %v2402_v22, %v2401_v1 }
 0x376   : > { %v2409_v35 = vpack.c.bf16 %v2400_v59, %v2399_v44  ;;  %v5274_v59 = vld [vmem:[#allocation2 + $0x100] sm:$0xff]  }
 0x377   : > { %4884 = vmatprep.subr.bf16.mxu0 %v5274_v59 }
 0x378   : > { %4816 = vmatprep.mubr.bf16.mxu1 %v2409_v35  ;;  %4885 = vmatpush3.bf16.msra.mxu0 %v5274_v59  ;;  %v5276_v35 = vld [vmem:[#allocation2 + $0x110] sm:$0xff]  }
 0x379   : > { %4817 = vmatmul.mubr.bf16.gmra.mrb[12].mxu1 %v2410_v38  ;;  %v5275_v38 = vld [vmem:[#allocation2 + $0x108] sm:$0xff]  }
 0x37a   : > { %4886 = vmatprep.subr.bf16.mxu0 %v5275_v38 }
 0x37c   : > { %4887 = vmatpush3.bf16.msra.mxu0 %v5275_v38 }
 0x37d   : > { %4888 = vmatprep.subr.bf16.mxu0 %v5276_v35 }
 0x380   : > { %4889 = vmatpush3.bf16.msra.mxu0 %v5276_v35 }
 0x395   : > { %v4810_v7 = vpop.f32.mrb[4].mxu1 }
 0x396   : > { %v2526_v10 = vpop.f32.mrb[5].mxu1  ;;  %v2579_v50 = vmax.f32 %v4810_v7, %v7584_v28  ;;  %v5277_v7 = vld [vmem:[#allocation2 + $0x118] sm:$0xff]  }
 0x397   : > { %v4811_v36 = vpop.f32.mrb[6].mxu1  ;;  %v2577_v46 = vmax.f32 %v2526_v10, %v7584_v28  ;;  %4890 = vmatprep.subr.bf16.mxu0 %v5277_v7  ;;  %v5278_v10 = vld [vmem:[#allocation2 + $0x120] sm:$0xff]  }
 0x398   : > { %v2580_v20 = vmax.f32 %v4811_v36, %v7584_v28  ;;  %v2529_v62 = vpop.f32.mrb[7].mxu1  ;;  %4891 = vmatpush3.bf16.msra.mxu0 %v5277_v7  ;;  %v5279_v36 = vld [vmem:[#allocation2 + $0x128] sm:$0xff]  }
 0x399   : > { %v2578_v42 = vmax.f32 %v2529_v62, %v7584_v28  ;;  %4892 = vmatprep.subr.bf16.mxu0 %v5278_v10 }
 0x39a   : > { %v2592_v49 = vpack.c.bf16 %v2580_v20, %v2579_v50  ;;  %v5280_v50 = vld [vmem:[#allocation2 + $0x130] sm:$0xff]   ;;  %v5281_v20 = vld [vmem:[#allocation2 + $0x138] sm:$0xff]  }
 0x39b   : > { %v2591_v11 = vpack.c.bf16 %v2578_v42, %v2577_v46 }
 0x39c   : > { %4893 = vmatpush3.bf16.msra.mxu0 %v5278_v10 }
 0x39d   : > { %4840 = vmatprep.mubr.bf16.mxu0 %v2591_v11  ;;  %4894 = vmatprep.subr.bf16.mxu0 %v5279_v36 }
 0x39e   : > { %4841 = vmatmul.mubr.bf16.gmra.mrb[20].mxu0 %v2592_v49 }
 0x3a0   : > { %4895 = vmatpush3.bf16.msra.mxu0 %v5279_v36 }
 0x3a1   : > { %4896 = vmatprep.subr.bf16.mxu0 %v5280_v50 }
 0x3a4   : > { %4897 = vmatpush3.bf16.msra.mxu0 %v5280_v50 }
 0x3a5   : > { %4898 = vmatprep.subr.bf16.mxu0 %v5281_v20 }
 0x3a8   : > { %4899 = vmatpush3.bf16.msra.mxu0 %v5281_v20 }
 0x3f4   : > { %v4814_v47 = vpop.f32.mrb[8].mxu1 }
 0x3f5   : > { %v2542_v31 = vpop.f32.mrb[9].mxu1  ;;  %v2583_v41 = vmax.f32 %v4814_v47, %v7584_v28 }
 0x3f6   : > { %v4815_v43 = vpop.f32.mrb[10].mxu1  ;;  %v2581_v23 = vmax.f32 %v2542_v31, %v7584_v28 }
 0x3f7   : > { %v2584_v51 = vmax.f32 %v4815_v43, %v7584_v28  ;;  %v2545_v26 = vpop.f32.mrb[11].mxu1 }
 0x3f8   : > { %v2582_v40 = vmax.f32 %v2545_v26, %v7584_v28 }
 0x3f9   : > { %v2594_v48 = vpack.c.bf16 %v2584_v51, %v2583_v41 }
 0x3fa   : > { %v2593_v5 = vpack.c.bf16 %v2582_v40, %v2581_v23 }
 0x3fc   : > { %4844 = vmatprep.mubr.bf16.mxu0 %v2593_v5 }
 0x3fd   : > { %4845 = vmatmul.mubr.bf16.gmra.mrb[24].mxu0 %v2594_v48 }
 0x41c   : > { %v4838_v30 = vpop.f32.mrb[16].mxu0 }
 0x41d   : > { %v2696_v3 = vpop.f32.mrb[17].mxu0  ;;  %v2761_v33 = vmax.f32 %v4838_v30, %v7584_v28 }
 0x41e   : > { %v4839_v63 = vpop.f32.mrb[18].mxu0  ;;  %v2759_v55 = vmax.f32 %v2696_v3, %v7584_v28 }
 0x41f   : > { %v2762_v61 = vmax.f32 %v4839_v63, %v7584_v28  ;;  %v2699_v14 = vpop.f32.mrb[19].mxu0 }
 0x420   : > { %v2760_v12 = vmax.f32 %v2699_v14, %v7584_v28 }
 0x421   : > { %v2776_v0 = vpack.c.bf16 %v2762_v61, %v2761_v33 }
 0x422   : > { %v2775_v34 = vpack.c.bf16 %v2760_v12, %v2759_v55 }
 0x424   : > { %4868 = vmatprep.mubr.bf16.mxu1 %v2775_v34 }
 0x425   : > { %4869 = vmatmul.mubr.bf16.vlgmr.msra.gmra.mrb[16].mxu1 %v2776_v0 }
 0x44c   : > { %v4818_v19 = vpop.f32.mrb[12].mxu1 }
 0x44d   : > { %v2558_v60 = vpop.f32.mrb[13].mxu1  ;;  %v2587_v24 = vmax.f32 %v4818_v19, %v7584_v28 }
 0x44e   : > { %v4819_v39 = vpop.f32.mrb[14].mxu1  ;;  %v2585_v8 = vmax.f32 %v2558_v60, %v7584_v28 }
 0x44f   : > { %v2588_v29 = vmax.f32 %v4819_v39, %v7584_v28  ;;  %v2561_v52 = vpop.f32.mrb[15].mxu1 }
 0x450   : > { %v2586_v53 = vmax.f32 %v2561_v52, %v7584_v28 }
 0x451   : > { %v2596_v16 = vpack.c.bf16 %v2588_v29, %v2587_v24 }
 0x452   : > { %v2595_v57 = vpack.c.bf16 %v2586_v53, %v2585_v8  ;;  %v5282_v53 = vld [vmem:[#allocation2 + $0x140] sm:$0xff]  }
 0x453   : > { %4916 = vmatprep.subr.bf16.mxu1 %v5282_v53 }
 0x454   : > { %4848 = vmatprep.mubr.bf16.mxu0 %v2595_v57  ;;  %4917 = vmatpush3.bf16.msra.mxu1 %v5282_v53  ;;  %v5284_v57 = vld [vmem:[#allocation2 + $0x150] sm:$0xff]  }
 0x455   : > { %4849 = vmatmul.mubr.bf16.gmra.mrb[28].mxu0 %v2596_v16  ;;  %v5283_v16 = vld [vmem:[#allocation2 + $0x148] sm:$0xff]  }
 0x456   : > { %4918 = vmatprep.subr.bf16.mxu1 %v5283_v16 }
 0x458   : > { %4919 = vmatpush3.bf16.msra.mxu1 %v5283_v16 }
 0x459   : > { %4920 = vmatprep.subr.bf16.mxu1 %v5284_v57 }
 0x45c   : > { %4921 = vmatpush3.bf16.msra.mxu1 %v5284_v57 }
 0x471   : > { %v4842_v25 = vpop.f32.mrb[20].mxu0 }
 0x472   : > { %v2712_v6 = vpop.f32.mrb[21].mxu0  ;;  %v2765_v32 = vmax.f32 %v4842_v25, %v7584_v28  ;;  %v5285_v25 = vld [vmem:[#allocation2 + $0x158] sm:$0xff]  }
 0x473   : > { %v4843_v21 = vpop.f32.mrb[22].mxu0  ;;  %v2763_v1 = vmax.f32 %v2712_v6, %v7584_v28  ;;  %4922 = vmatprep.subr.bf16.mxu1 %v5285_v25  ;;  %v5286_v6 = vld [vmem:[#allocation2 + $0x160] sm:$0xff]  }
 0x474   : > { %v2766_v56 = vmax.f32 %v4843_v21, %v7584_v28  ;;  %v2715_v58 = vpop.f32.mrb[23].mxu0  ;;  %4923 = vmatpush3.bf16.msra.mxu1 %v5285_v25  ;;  %v5287_v21 = vld [vmem:[#allocation2 + $0x168] sm:$0xff]  }
 0x475   : > { %v2764_v22 = vmax.f32 %v2715_v58, %v7584_v28  ;;  %4924 = vmatprep.subr.bf16.mxu1 %v5286_v6 }
 0x476   : > { %v2778_v27 = vpack.c.bf16 %v2766_v56, %v2765_v32  ;;  %v5288_v32 = vld [vmem:[#allocation2 + $0x170] sm:$0xff]   ;;  %v5289_v56 = vld [vmem:[#allocation2 + $0x178] sm:$0xff]  }
 0x477   : > { %v2777_v44 = vpack.c.bf16 %v2764_v22, %v2763_v1 }
 0x478   : > { %4925 = vmatpush3.bf16.msra.mxu1 %v5286_v6 }
 0x479   : > { %4872 = vmatprep.mubr.bf16.mxu1 %v2777_v44  ;;  %4926 = vmatprep.subr.bf16.mxu1 %v5287_v21 }
 0x47a   : > { %4873 = vmatmul.mubr.bf16.gmra.mrb[20].mxu1 %v2778_v27 }
 0x47c   : > { %4927 = vmatpush3.bf16.msra.mxu1 %v5287_v21 }
 0x47d   : > { %4928 = vmatprep.subr.bf16.mxu1 %v5288_v32 }
 0x480   : > { %4929 = vmatpush3.bf16.msra.mxu1 %v5288_v32 }
 0x481   : > { %4930 = vmatprep.subr.bf16.mxu1 %v5289_v56 }
 0x484   : > { %4931 = vmatpush3.bf16.msra.mxu1 %v5289_v56 }
 0x4d0   : > { %v4846_v62 = vpop.f32.mrb[24].mxu0 }
 0x4d1   : > { %v2728_v46 = vpop.f32.mrb[25].mxu0  ;;  %v2769_v49 = vmax.f32 %v4846_v62, %v7584_v28 }
 0x4d2   : > { %v4847_v42 = vpop.f32.mrb[26].mxu0  ;;  %v2767_v54 = vmax.f32 %v2728_v46, %v7584_v28 }
 0x4d3   : > { %v2770_v11 = vmax.f32 %v4847_v42, %v7584_v28  ;;  %v2731_v17 = vpop.f32.mrb[27].mxu0 }
 0x4d4   : > { %v2768_v9 = vmax.f32 %v2731_v17, %v7584_v28 }
 0x4d5   : > { %v2780_v45 = vpack.c.bf16 %v2770_v11, %v2769_v49 }
 0x4d6   : > { %v2779_v37 = vpack.c.bf16 %v2768_v9, %v2767_v54 }
 0x4d8   : > { %4876 = vmatprep.mubr.bf16.mxu1 %v2779_v37 }
 0x4d9   : > { %4877 = vmatmul.mubr.bf16.gmra.mrb[24].mxu1 %v2780_v45 }
 0x4f8   : > { %v4870_v4 = vpop.f32.mrb[16].mxu1 }
 0x4f9   : > { %v2882_v15 = vpop.f32.mrb[17].mxu1  ;;  %v2947_v47 = vmax.f32 %v4870_v4, %v7584_v28 }
 0x4fa   : > { %v4871_v2 = vpop.f32.mrb[18].mxu1  ;;  %v2945_v41 = vmax.f32 %v2882_v15, %v7584_v28 }
 0x4fb   : > { %v2948_v31 = vmax.f32 %v4871_v2, %v7584_v28  ;;  %v2885_v43 = vpop.f32.mrb[19].mxu1 }
 0x4fc   : > { %v2946_v51 = vmax.f32 %v2885_v43, %v7584_v28 }
 0x4fd   : > { %v2962_v26 = vpack.c.bf16 %v2948_v31, %v2947_v47 }
 0x4fe   : > { %v2961_v23 = vpack.c.bf16 %v2946_v51, %v2945_v41 }
 0x500   : > { %4900 = vmatprep.mubr.bf16.mxu0 %v2961_v23 }
 0x501   : > { %4901 = vmatmul.mubr.bf16.vlgmr.msra.gmra.mrb[32].mxu0 %v2962_v26 }
 0x528   : > { %v4850_v40 = vpop.f32.mrb[28].mxu0 }
 0x529   : > { %v2744_v48 = vpop.f32.mrb[29].mxu0  ;;  %v2773_v30 = vmax.f32 %v4850_v40, %v7584_v28 }
 0x52a   : > { %v4851_v5 = vpop.f32.mrb[30].mxu0  ;;  %v2771_v33 = vmax.f32 %v2744_v48, %v7584_v28 }
 0x52b   : > { %v2774_v3 = vmax.f32 %v4851_v5, %v7584_v28  ;;  %v2747_v63 = vpop.f32.mrb[31].mxu0 }
 0x52c   : > { %v2772_v61 = vmax.f32 %v2747_v63, %v7584_v28 }
 0x52d   : > { %v2782_v14 = vpack.c.bf16 %v2774_v3, %v2773_v30 }
 0x52e   : > { %v2781_v55 = vpack.c.bf16 %v2772_v61, %v2771_v33  ;;  %v5290_v61 = vld [vmem:[#allocation2 + $0x180] sm:$0xff]  }
 0x52f   : > { %4948 = vmatprep.subr.bf16.mxu0 %v5290_v61 }
 0x530   : > { %4880 = vmatprep.mubr.bf16.mxu1 %v2781_v55  ;;  %4949 = vmatpush3.bf16.msra.mxu0 %v5290_v61  ;;  %v5292_v55 = vld [vmem:[#allocation2 + $0x190] sm:$0xff]  }
 0x531   : > { %4881 = vmatmul.mubr.bf16.gmra.mrb[28].mxu1 %v2782_v14  ;;  %v5291_v14 = vld [vmem:[#allocation2 + $0x188] sm:$0xff]  }
 0x532   : > { %4950 = vmatprep.subr.bf16.mxu0 %v5291_v14 }
 0x534   : > { %4951 = vmatpush3.bf16.msra.mxu0 %v5291_v14 }
 0x535   : > { %4952 = vmatprep.subr.bf16.mxu0 %v5292_v55 }
 0x538   : > { %4953 = vmatpush3.bf16.msra.mxu0 %v5292_v55 }
 0x54d   : > { %v4874_v12 = vpop.f32.mrb[20].mxu1 }
 0x54e   : > { %v2898_v0 = vpop.f32.mrb[21].mxu1  ;;  %v2951_v19 = vmax.f32 %v4874_v12, %v7584_v28  ;;  %v5293_v12 = vld [vmem:[#allocation2 + $0x198] sm:$0xff]  }
 0x54f   : > { %v4875_v34 = vpop.f32.mrb[22].mxu1  ;;  %v2949_v24 = vmax.f32 %v2898_v0, %v7584_v28  ;;  %4954 = vmatprep.subr.bf16.mxu0 %v5293_v12  ;;  %v5294_v0 = vld [vmem:[#allocation2 + $0x1a0] sm:$0xff]  }
 0x550   : > { %v2952_v60 = vmax.f32 %v4875_v34, %v7584_v28  ;;  %v2901_v39 = vpop.f32.mrb[23].mxu1  ;;  %4955 = vmatpush3.bf16.msra.mxu0 %v5293_v12  ;;  %v5295_v34 = vld [vmem:[#allocation2 + $0x1a8] sm:$0xff]  }
 0x551   : > { %v2950_v29 = vmax.f32 %v2901_v39, %v7584_v28  ;;  %4956 = vmatprep.subr.bf16.mxu0 %v5294_v0 }
 0x552   : > { %v2964_v52 = vpack.c.bf16 %v2952_v60, %v2951_v19  ;;  %v5296_v19 = vld [vmem:[#allocation2 + $0x1b0] sm:$0xff]   ;;  %v5297_v60 = vld [vmem:[#allocation2 + $0x1b8] sm:$0xff]  }
 0x553   : > { %v2963_v8 = vpack.c.bf16 %v2950_v29, %v2949_v24 }
 0x554   : > { %4957 = vmatpush3.bf16.msra.mxu0 %v5294_v0 }
 0x555   : > { %4904 = vmatprep.mubr.bf16.mxu0 %v2963_v8  ;;  %4958 = vmatprep.subr.bf16.mxu0 %v5295_v34 }
 0x556   : > { %4905 = vmatmul.mubr.bf16.gmra.mrb[36].mxu0 %v2964_v52 }
 0x558   : > { %4959 = vmatpush3.bf16.msra.mxu0 %v5295_v34 }
 0x559   : > { %4960 = vmatprep.subr.bf16.mxu0 %v5296_v19 }
 0x55c   : > { %4961 = vmatpush3.bf16.msra.mxu0 %v5296_v19 }
 0x55d   : > { %4962 = vmatprep.subr.bf16.mxu0 %v5297_v60 }
 0x560   : > { %4963 = vmatpush3.bf16.msra.mxu0 %v5297_v60 }
 0x5ac   : > { %v4878_v58 = vpop.f32.mrb[24].mxu1 }
 0x5ad   : > { %v2914_v1 = vpop.f32.mrb[25].mxu1  ;;  %v2955_v27 = vmax.f32 %v4878_v58, %v7584_v28 }
 0x5ae   : > { %v4879_v22 = vpop.f32.mrb[26].mxu1  ;;  %v2953_v38 = vmax.f32 %v2914_v1, %v7584_v28 }
 0x5af   : > { %v2956_v44 = vmax.f32 %v4879_v22, %v7584_v28  ;;  %v2917_v59 = vpop.f32.mrb[27].mxu1 }
 0x5b0   : > { %v2954_v35 = vmax.f32 %v2917_v59, %v7584_v28 }
 0x5b1   : > { %v2966_v7 = vpack.c.bf16 %v2956_v44, %v2955_v27 }
 0x5b2   : > { %v2965_v10 = vpack.c.bf16 %v2954_v35, %v2953_v38 }
 0x5b4   : > { %4908 = vmatprep.mubr.bf16.mxu0 %v2965_v10 }
 0x5b5   : > { %4909 = vmatmul.mubr.bf16.gmra.mrb[40].mxu0 %v2966_v7 }
 0x5d4   : > { %v4902_v36 = vpop.f32.mrb[32].mxu0 }
 0x5d5   : > { %v3068_v50 = vpop.f32.mrb[33].mxu0  ;;  %v3133_v62 = vmax.f32 %v4902_v36, %v7584_v28 }
 0x5d6   : > { %v4903_v20 = vpop.f32.mrb[34].mxu0  ;;  %v3131_v49 = vmax.f32 %v3068_v50, %v7584_v28 }
 0x5d7   : > { %v3134_v46 = vmax.f32 %v4903_v20, %v7584_v28  ;;  %v3071_v42 = vpop.f32.mrb[35].mxu0 }
 0x5d8   : > { %v3132_v11 = vmax.f32 %v3071_v42, %v7584_v28 }
 0x5d9   : > { %v3148_v17 = vpack.c.bf16 %v3134_v46, %v3133_v62 }
 0x5da   : > { %v3147_v54 = vpack.c.bf16 %v3132_v11, %v3131_v49 }
 0x5dc   : > { %4932 = vmatprep.mubr.bf16.mxu1 %v3147_v54 }
 0x5dd   : > { %4933 = vmatmul.mubr.bf16.vlgmr.msra.gmra.mrb[32].mxu1 %v3148_v17 }
 0x604   : > { %v4882_v9 = vpop.f32.mrb[28].mxu1 }
 0x605   : > { %v2930_v45 = vpop.f32.mrb[29].mxu1  ;;  %v2959_v4 = vmax.f32 %v4882_v9, %v7584_v28 }
 0x606   : > { %v4883_v37 = vpop.f32.mrb[30].mxu1  ;;  %v2957_v47 = vmax.f32 %v2930_v45, %v7584_v28 }
 0x607   : > { %v2960_v15 = vmax.f32 %v4883_v37, %v7584_v28  ;;  %v2933_v2 = vpop.f32.mrb[31].mxu1 }
 0x608   : > { %v2958_v31 = vmax.f32 %v2933_v2, %v7584_v28 }
 0x609   : > { %v2968_v43 = vpack.c.bf16 %v2960_v15, %v2959_v4 }
 0x60a   : > { %v2967_v41 = vpack.c.bf16 %v2958_v31, %v2957_v47  ;;  %v5298_v31 = vld [vmem:[#allocation2 + $0x1c0] sm:$0xff]  }
 0x60b   : > { %4980 = vmatprep.subr.bf16.mxu1 %v5298_v31 }
 0x60c   : > { %4912 = vmatprep.mubr.bf16.mxu0 %v2967_v41  ;;  %4981 = vmatpush3.bf16.msra.mxu1 %v5298_v31  ;;  %v5300_v41 = vld [vmem:[#allocation2 + $0x1d0] sm:$0xff]  }
 0x60d   : > { %4913 = vmatmul.mubr.bf16.gmra.mrb[44].mxu0 %v2968_v43  ;;  %v5299_v43 = vld [vmem:[#allocation2 + $0x1c8] sm:$0xff]  }
 0x60e   : > { %4982 = vmatprep.subr.bf16.mxu1 %v5299_v43 }
 0x610   : > { %4983 = vmatpush3.bf16.msra.mxu1 %v5299_v43 }
 0x611   : > { %4984 = vmatprep.subr.bf16.mxu1 %v5300_v41 }
 0x614   : > { %4985 = vmatpush3.bf16.msra.mxu1 %v5300_v41 }
 0x629   : > { %v4906_v51 = vpop.f32.mrb[36].mxu0 }
 0x62a   : > { %v3084_v26 = vpop.f32.mrb[37].mxu0  ;;  %v3137_v40 = vmax.f32 %v4906_v51, %v7584_v28  ;;  %v5301_v51 = vld [vmem:[#allocation2 + $0x1d8] sm:$0xff]  }
 0x62b   : > { %v4907_v23 = vpop.f32.mrb[38].mxu0  ;;  %v3135_v30 = vmax.f32 %v3084_v26, %v7584_v28  ;;  %4986 = vmatprep.subr.bf16.mxu1 %v5301_v51  ;;  %v5302_v26 = vld [vmem:[#allocation2 + $0x1e0] sm:$0xff]  }
 0x62c   : > { %v3138_v48 = vmax.f32 %v4907_v23, %v7584_v28  ;;  %v3087_v5 = vpop.f32.mrb[39].mxu0  ;;  %4987 = vmatpush3.bf16.msra.mxu1 %v5301_v51  ;;  %v5303_v23 = vld [vmem:[#allocation2 + $0x1e8] sm:$0xff]  }
 0x62d   : > { %v3136_v3 = vmax.f32 %v3087_v5, %v7584_v28  ;;  %4988 = vmatprep.subr.bf16.mxu1 %v5302_v26 }
 0x62e   : > { %v3150_v63 = vpack.c.bf16 %v3138_v48, %v3137_v40  ;;  %v5304_v40 = vld [vmem:[#allocation2 + $0x1f0] sm:$0xff]   ;;  %v5305_v48 = vld [vmem:[#allocation2 + $0x1f8] sm:$0xff]  }
 0x62f   : > { %v3149_v33 = vpack.c.bf16 %v3136_v3, %v3135_v30 }
 0x630   : > { %4989 = vmatpush3.bf16.msra.mxu1 %v5302_v26 }
 0x631   : > { %4936 = vmatprep.mubr.bf16.mxu1 %v3149_v33  ;;  %4990 = vmatprep.subr.bf16.mxu1 %v5303_v23 }
 0x632   : > { %4937 = vmatmul.mubr.bf16.gmra.mrb[36].mxu1 %v3150_v63 }
 0x634   : > { %4991 = vmatpush3.bf16.msra.mxu1 %v5303_v23 }
 0x635   : > { %4992 = vmatprep.subr.bf16.mxu1 %v5304_v40 }
 0x638   : > { %4993 = vmatpush3.bf16.msra.mxu1 %v5304_v40 }
 0x639   : > { %4994 = vmatprep.subr.bf16.mxu1 %v5305_v48 }
 0x63c   : > { %4995 = vmatpush3.bf16.msra.mxu1 %v5305_v48 }
 0x688   : > { %v4910_v39 = vpop.f32.mrb[40].mxu0 }
 0x689   : > { %v3100_v24 = vpop.f32.mrb[41].mxu0  ;;  %v3141_v52 = vmax.f32 %v4910_v39, %v7584_v28 }
 0x68a   : > { %v4911_v29 = vpop.f32.mrb[42].mxu0  ;;  %v3139_v16 = vmax.f32 %v3100_v24, %v7584_v28 }
 0x68b   : > { %v3142_v8 = vmax.f32 %v4911_v29, %v7584_v28  ;;  %v3103_v53 = vpop.f32.mrb[43].mxu0 }
 0x68c   : > { %v3140_v57 = vmax.f32 %v3103_v53, %v7584_v28 }
 0x68d   : > { %v3152_v25 = vpack.c.bf16 %v3142_v8, %v3141_v52 }
 0x68e   : > { %v3151_v6 = vpack.c.bf16 %v3140_v57, %v3139_v16 }
 0x690   : > { %4940 = vmatprep.mubr.bf16.mxu1 %v3151_v6 }
 0x691   : > { %4941 = vmatmul.mubr.bf16.gmra.mrb[40].mxu1 %v3152_v25 }
 0x6b0   : > { %v4934_v21 = vpop.f32.mrb[32].mxu1 }
 0x6b1   : > { %v3254_v32 = vpop.f32.mrb[33].mxu1  ;;  %v3319_v58 = vmax.f32 %v4934_v21, %v7584_v28 }
 0x6b2   : > { %v4935_v56 = vpop.f32.mrb[34].mxu1  ;;  %v3317_v27 = vmax.f32 %v3254_v32, %v7584_v28 }
 0x6b3   : > { %v3320_v1 = vmax.f32 %v4935_v56, %v7584_v28  ;;  %v3257_v22 = vpop.f32.mrb[35].mxu1 }
 0x6b4   : > { %v3318_v44 = vmax.f32 %v3257_v22, %v7584_v28 }
 0x6b5   : > { %v3334_v59 = vpack.c.bf16 %v3320_v1, %v3319_v58 }
 0x6b6   : > { %v3333_v38 = vpack.c.bf16 %v3318_v44, %v3317_v27 }
 0x6b8   : > { %4964 = vmatprep.mubr.bf16.mxu0 %v3333_v38 }
 0x6b9   : > { %4965 = vmatmul.mubr.bf16.vlgmr.msra.gmra.mrb[48].mxu0 %v3334_v59 }
 0x6e0   : > { %v4914_v35 = vpop.f32.mrb[44].mxu0 }
 0x6e1   : > { %v3116_v7 = vpop.f32.mrb[45].mxu0  ;;  %v3145_v36 = vmax.f32 %v4914_v35, %v7584_v28 }
 0x6e2   : > { %v4915_v10 = vpop.f32.mrb[46].mxu0  ;;  %v3143_v62 = vmax.f32 %v3116_v7, %v7584_v28 }
 0x6e3   : > { %v3146_v50 = vmax.f32 %v4915_v10, %v7584_v28  ;;  %v3119_v20 = vpop.f32.mrb[47].mxu0 }
 0x6e4   : > { %v3144_v46 = vmax.f32 %v3119_v20, %v7584_v28 }
 0x6e5   : > { %v3154_v42 = vpack.c.bf16 %v3146_v50, %v3145_v36 }
 0x6e6   : > { %v3153_v49 = vpack.c.bf16 %v3144_v46, %v3143_v62  ;;  %v5306_v46 = vld [vmem:[#allocation2 + $0x200] sm:$0xff]  }
 0x6e7   : > { %5012 = vmatprep.subr.bf16.mxu0 %v5306_v46 }
 0x6e8   : > { %4944 = vmatprep.mubr.bf16.mxu1 %v3153_v49  ;;  %5013 = vmatpush3.bf16.msra.mxu0 %v5306_v46  ;;  %v5308_v49 = vld [vmem:[#allocation2 + $0x210] sm:$0xff]  }
 0x6e9   : > { %4945 = vmatmul.mubr.bf16.gmra.mrb[44].mxu1 %v3154_v42  ;;  %v5307_v42 = vld [vmem:[#allocation2 + $0x208] sm:$0xff]  }
 0x6ea   : > { %5014 = vmatprep.subr.bf16.mxu0 %v5307_v42 }
 0x6ec   : > { %5015 = vmatpush3.bf16.msra.mxu0 %v5307_v42 }
 0x6ed   : > { %5016 = vmatprep.subr.bf16.mxu0 %v5308_v49 }
 0x6f0   : > { %5017 = vmatpush3.bf16.msra.mxu0 %v5308_v49 }
 0x705   : > { %v4938_v11 = vpop.f32.mrb[36].mxu1 }
 0x706   : > { %v3270_v17 = vpop.f32.mrb[37].mxu1  ;;  %v3323_v9 = vmax.f32 %v4938_v11, %v7584_v28  ;;  %v5309_v11 = vld [vmem:[#allocation2 + $0x218] sm:$0xff]  }
 0x707   : > { %v4939_v54 = vpop.f32.mrb[38].mxu1  ;;  %v3321_v4 = vmax.f32 %v3270_v17, %v7584_v28  ;;  %5018 = vmatprep.subr.bf16.mxu0 %v5309_v11  ;;  %v5310_v17 = vld [vmem:[#allocation2 + $0x220] sm:$0xff]  }
 0x708   : > { %v3324_v45 = vmax.f32 %v4939_v54, %v7584_v28  ;;  %v3273_v37 = vpop.f32.mrb[39].mxu1  ;;  %5019 = vmatpush3.bf16.msra.mxu0 %v5309_v11  ;;  %v5311_v54 = vld [vmem:[#allocation2 + $0x228] sm:$0xff]  }
 0x709   : > { %v3322_v15 = vmax.f32 %v3273_v37, %v7584_v28  ;;  %5020 = vmatprep.subr.bf16.mxu0 %v5310_v17 }
 0x70a   : > { %v3336_v2 = vpack.c.bf16 %v3324_v45, %v3323_v9  ;;  %v5312_v9 = vld [vmem:[#allocation2 + $0x230] sm:$0xff]   ;;  %v5313_v45 = vld [vmem:[#allocation2 + $0x238] sm:$0xff]  }
 0x70b   : > { %v3335_v47 = vpack.c.bf16 %v3322_v15, %v3321_v4 }
 0x70c   : > { %5021 = vmatpush3.bf16.msra.mxu0 %v5310_v17 }
 0x70d   : > { %4968 = vmatprep.mubr.bf16.mxu0 %v3335_v47  ;;  %5022 = vmatprep.subr.bf16.mxu0 %v5311_v54 }
 0x70e   : > { %4969 = vmatmul.mubr.bf16.gmra.mrb[52].mxu0 %v3336_v2 }
 0x710   : > { %5023 = vmatpush3.bf16.msra.mxu0 %v5311_v54 }
 0x711   : > { %5024 = vmatprep.subr.bf16.mxu0 %v5312_v9 }
 0x714   : > { %5025 = vmatpush3.bf16.msra.mxu0 %v5312_v9 }
 0x715   : > { %5026 = vmatprep.subr.bf16.mxu0 %v5313_v45 }
 0x718   : > { %5027 = vmatpush3.bf16.msra.mxu0 %v5313_v45 }
 0x764   : > { %v4942_v5 = vpop.f32.mrb[40].mxu1 }
 0x765   : > { %v3286_v30 = vpop.f32.mrb[41].mxu1  ;;  %v3327_v63 = vmax.f32 %v4942_v5, %v7584_v28 }
 0x766   : > { %v4943_v3 = vpop.f32.mrb[42].mxu1  ;;  %v3325_v14 = vmax.f32 %v3286_v30, %v7584_v28 }
 0x767   : > { %v3328_v33 = vmax.f32 %v4943_v3, %v7584_v28  ;;  %v3289_v61 = vpop.f32.mrb[43].mxu1 }
 0x768   : > { %v3326_v55 = vmax.f32 %v3289_v61, %v7584_v28 }
 0x769   : > { %v3338_v12 = vpack.c.bf16 %v3328_v33, %v3327_v63 }
 0x76a   : > { %v3337_v0 = vpack.c.bf16 %v3326_v55, %v3325_v14 }
 0x76c   : > { %4972 = vmatprep.mubr.bf16.mxu0 %v3337_v0 }
 0x76d   : > { %4973 = vmatmul.mubr.bf16.gmra.mrb[56].mxu0 %v3338_v12 }
 0x78c   : > { %v4966_v34 = vpop.f32.mrb[48].mxu0 }
 0x78d   : > { %v3440_v19 = vpop.f32.mrb[49].mxu0  ;;  %v3505_v39 = vmax.f32 %v4966_v34, %v7584_v28 }
 0x78e   : > { %v4967_v60 = vpop.f32.mrb[50].mxu0  ;;  %v3503_v52 = vmax.f32 %v3440_v19, %v7584_v28 }
 0x78f   : > { %v3506_v24 = vmax.f32 %v4967_v60, %v7584_v28  ;;  %v3443_v29 = vpop.f32.mrb[51].mxu0 }
 0x790   : > { %v3504_v8 = vmax.f32 %v3443_v29, %v7584_v28 }
 0x791   : > { %v3520_v53 = vpack.c.bf16 %v3506_v24, %v3505_v39 }
 0x792   : > { %v3519_v16 = vpack.c.bf16 %v3504_v8, %v3503_v52 }
 0x794   : > { %4996 = vmatprep.mubr.bf16.mxu1 %v3519_v16 }
 0x795   : > { %4997 = vmatmul.mubr.bf16.vlgmr.msra.gmra.mrb[48].mxu1 %v3520_v53 }
 0x7bc   : > { %v4946_v57 = vpop.f32.mrb[44].mxu1 }
 0x7bd   : > { %v3302_v25 = vpop.f32.mrb[45].mxu1  ;;  %v3331_v21 = vmax.f32 %v4946_v57, %v7584_v28 }
 0x7be   : > { %v4947_v6 = vpop.f32.mrb[46].mxu1  ;;  %v3329_v58 = vmax.f32 %v3302_v25, %v7584_v28 }
 0x7bf   : > { %v3332_v32 = vmax.f32 %v4947_v6, %v7584_v28  ;;  %v3305_v56 = vpop.f32.mrb[47].mxu1 }
 0x7c0   : > { %v3330_v1 = vmax.f32 %v3305_v56, %v7584_v28 }
 0x7c1   : > { %v3340_v22 = vpack.c.bf16 %v3332_v32, %v3331_v21 }
 0x7c2   : > { %v3339_v27 = vpack.c.bf16 %v3330_v1, %v3329_v58  ;;  %v5314_v1 = vld [vmem:[#allocation2 + $0x240] sm:$0xff]  }
 0x7c3   : > { %5044 = vmatprep.subr.bf16.mxu1 %v5314_v1 }
 0x7c4   : > { %4976 = vmatprep.mubr.bf16.mxu0 %v3339_v27  ;;  %5045 = vmatpush3.bf16.msra.mxu1 %v5314_v1  ;;  %v5316_v27 = vld [vmem:[#allocation2 + $0x250] sm:$0xff]  }
 0x7c5   : > { %4977 = vmatmul.mubr.bf16.gmra.mrb[60].mxu0 %v3340_v22  ;;  %v5315_v22 = vld [vmem:[#allocation2 + $0x248] sm:$0xff]  }
 0x7c6   : > { %5046 = vmatprep.subr.bf16.mxu1 %v5315_v22 }
 0x7c8   : > { %5047 = vmatpush3.bf16.msra.mxu1 %v5315_v22 }
 0x7c9   : > { %5048 = vmatprep.subr.bf16.mxu1 %v5316_v27 }
 0x7cc   : > { %5049 = vmatpush3.bf16.msra.mxu1 %v5316_v27 }
 0x7e1   : > { %v4970_v44 = vpop.f32.mrb[52].mxu0 }
 0x7e2   : > { %v3456_v59 = vpop.f32.mrb[53].mxu0  ;;  %v3509_v35 = vmax.f32 %v4970_v44, %v7584_v28  ;;  %v5317_v44 = vld [vmem:[#allocation2 + $0x258] sm:$0xff]  }
 0x7e3   : > { %v4971_v38 = vpop.f32.mrb[54].mxu0  ;;  %v3507_v36 = vmax.f32 %v3456_v59, %v7584_v28  ;;  %5050 = vmatprep.subr.bf16.mxu1 %v5317_v44  ;;  %v5318_v59 = vld [vmem:[#allocation2 + $0x260] sm:$0xff]  }
 0x7e4   : > { %v3510_v7 = vmax.f32 %v4971_v38, %v7584_v28  ;;  %v3459_v10 = vpop.f32.mrb[55].mxu0  ;;  %5051 = vmatpush3.bf16.msra.mxu1 %v5317_v44  ;;  %v5319_v38 = vld [vmem:[#allocation2 + $0x268] sm:$0xff]  }
 0x7e5   : > { %v3508_v50 = vmax.f32 %v3459_v10, %v7584_v28  ;;  %5052 = vmatprep.subr.bf16.mxu1 %v5318_v59 }
 0x7e6   : > { %v3522_v20 = vpack.c.bf16 %v3510_v7, %v3509_v35  ;;  %v5320_v35 = vld [vmem:[#allocation2 + $0x270] sm:$0xff]   ;;  %v5321_v7 = vld [vmem:[#allocation2 + $0x278] sm:$0xff]  }
 0x7e7   : > { %v3521_v62 = vpack.c.bf16 %v3508_v50, %v3507_v36 }
 0x7e8   : > { %5053 = vmatpush3.bf16.msra.mxu1 %v5318_v59 }
 0x7e9   : > { %5000 = vmatprep.mubr.bf16.mxu1 %v3521_v62  ;;  %5054 = vmatprep.subr.bf16.mxu1 %v5319_v38 }
 0x7ea   : > { %5001 = vmatmul.mubr.bf16.gmra.mrb[52].mxu1 %v3522_v20 }
 0x7ec   : > { %5055 = vmatpush3.bf16.msra.mxu1 %v5319_v38 }
 0x7ed   : > { %5056 = vmatprep.subr.bf16.mxu1 %v5320_v35 }
 0x7f0   : > { %5057 = vmatpush3.bf16.msra.mxu1 %v5320_v35 }
 0x7f1   : > { %5058 = vmatprep.subr.bf16.mxu1 %v5321_v7 }
 0x7f4   : > { %5059 = vmatpush3.bf16.msra.mxu1 %v5321_v7 }
 0x840   : > { %v4974_v37 = vpop.f32.mrb[56].mxu0 }
 0x841   : > { %v3472_v4 = vpop.f32.mrb[57].mxu0  ;;  %v3513_v2 = vmax.f32 %v4974_v37, %v7584_v28 }
 0x842   : > { %v4975_v15 = vpop.f32.mrb[58].mxu0  ;;  %v3511_v43 = vmax.f32 %v3472_v4, %v7584_v28 }
 0x843   : > { %v3514_v47 = vmax.f32 %v4975_v15, %v7584_v28  ;;  %v3475_v31 = vpop.f32.mrb[59].mxu0 }
 0x844   : > { %v3512_v41 = vmax.f32 %v3475_v31, %v7584_v28 }
 0x845   : > { %v3524_v51 = vpack.c.bf16 %v3514_v47, %v3513_v2 }
 0x846   : > { %v3523_v26 = vpack.c.bf16 %v3512_v41, %v3511_v43 }
 0x848   : > { %5004 = vmatprep.mubr.bf16.mxu1 %v3523_v26 }
 0x849   : > { %5005 = vmatmul.mubr.bf16.gmra.mrb[56].mxu1 %v3524_v51 }
 0x868   : > { %v4998_v23 = vpop.f32.mrb[48].mxu1 }
 0x869   : > { %v3626_v40 = vpop.f32.mrb[49].mxu1  ;;  %v3691_v5 = vmax.f32 %v4998_v23, %v7584_v28 }
 0x86a   : > { %v4999_v48 = vpop.f32.mrb[50].mxu1  ;;  %v3689_v63 = vmax.f32 %v3626_v40, %v7584_v28 }
 0x86b   : > { %v3692_v30 = vmax.f32 %v4999_v48, %v7584_v28  ;;  %v3629_v3 = vpop.f32.mrb[51].mxu1 }
 0x86c   : > { %v3690_v33 = vmax.f32 %v3629_v3, %v7584_v28 }
 0x86d   : > { %v3706_v61 = vpack.c.bf16 %v3692_v30, %v3691_v5 }
 0x86e   : > { %v3705_v14 = vpack.c.bf16 %v3690_v33, %v3689_v63 }
 0x870   : > { %5028 = vmatprep.mubr.bf16.mxu0 %v3705_v14  ;;  %v5322_v14 = vld [vmem:[#allocation2 + $0x280] sm:$0xff]  }
 0x871   : > { %5029 = vmatmul.mubr.bf16.vlgmr.msra.gmra.mrb[64].mxu0 %v3706_v61  ;;  %5076 = vmatprep.subr.bf16.mxu0 %v5322_v14 }
 0x872   : > { %5108 = vmatprep.subr.bf16.mxu1 %v5322_v14  ;;  %5077 = vmatpush3.bf16.msra.mxu0 %v5322_v14 }
 0x898   : > { %v4978_v55 = vpop.f32.mrb[60].mxu0 }
 0x899   : > { %v3488_v12 = vpop.f32.mrb[61].mxu0  ;;  %v3517_v34 = vmax.f32 %v4978_v55, %v7584_v28  ;;  %v5323_v55 = vld [vmem:[#allocation2 + $0x288] sm:$0xff]  }
 0x89a   : > { %v4979_v0 = vpop.f32.mrb[62].mxu0  ;;  %v3515_v39 = vmax.f32 %v3488_v12, %v7584_v28  ;;  %5078 = vmatprep.subr.bf16.mxu0 %v5323_v55  ;;  %v5325_v12 = vld [vmem:[#allocation2 + $0x298] sm:$0xff]  }
 0x89b   : > { %v3518_v19 = vmax.f32 %v4979_v0, %v7584_v28  ;;  %v3491_v60 = vpop.f32.mrb[63].mxu0  ;;  %5079 = vmatpush3.bf16.msra.mxu0 %v5323_v55  ;;  %v5326_v0 = vld [vmem:[#allocation2 + $0x2a0] sm:$0xff]  }
 0x89c   : > { %v3516_v24 = vmax.f32 %v3491_v60, %v7584_v28  ;;  %v5329_v60 = vld [vmem:[#allocation2 + $0x2b8] sm:$0xff]  }
 0x89d   : > { %v3526_v29 = vpack.c.bf16 %v3518_v19, %v3517_v34  ;;  %v5327_v34 = vld [vmem:[#allocation2 + $0x2a8] sm:$0xff]   ;;  %v5328_v19 = vld [vmem:[#allocation2 + $0x2b0] sm:$0xff]  }
 0x89e   : > { %v3525_v52 = vpack.c.bf16 %v3516_v24, %v3515_v39 }
 0x8a0   : > { %5008 = vmatprep.mubr.bf16.mxu1 %v3525_v52 }
 0x8a1   : > { %5009 = vmatmul.mubr.bf16.gmra.mrb[60].mxu1 %v3526_v29 }
 0x8bd   : > { %v5002_v8 = vpop.f32.mrb[52].mxu1 }
 0x8be   : > { %v3642_v53 = vpop.f32.mrb[53].mxu1  ;;  %v3695_v57 = vmax.f32 %v5002_v8, %v7584_v28 }
 0x8bf   : > { %v5003_v16 = vpop.f32.mrb[54].mxu1  ;;  %v3693_v21 = vmax.f32 %v3642_v53, %v7584_v28 }
 0x8c0   : > { %v3696_v25 = vmax.f32 %v5003_v16, %v7584_v28  ;;  %v3645_v6 = vpop.f32.mrb[55].mxu1  ;;  %v7770_v16 = vsel %vm2224_vm7, 0.0, %v5510_v13 }
 0x8c1   : > { %v3694_v32 = vmax.f32 %v3645_v6, %v7584_v28 }
 0x8c2   : > { %v3708_v56 = vpack.c.bf16 %v3696_v25, %v3695_v57 }
 0x8c3   : > { %v3707_v58 = vpack.c.bf16 %v3694_v32, %v3693_v21 }
 0x8c5   : > { %5032 = vmatprep.mubr.bf16.mxu0 %v3707_v58 }
 0x8c6   : > { %5033 = vmatmul.mubr.bf16.gmra.mrb[68].mxu0 %v3708_v56 }
 0x91c   : > { %v5006_v10 = vpop.f32.mrb[56].mxu1 }
 0x91d   : > { %v3658_v36 = vpop.f32.mrb[57].mxu1  ;;  %v3699_v20 = vmax.f32 %v5006_v10, %v7584_v28 }
 0x91e   : > { %v5007_v50 = vpop.f32.mrb[58].mxu1  ;;  %v3697_v42 = vmax.f32 %v3658_v36, %v7584_v28 }
 0x91f   : > { %v3700_v62 = vmax.f32 %v5007_v50, %v7584_v28  ;;  %v3661_v46 = vpop.f32.mrb[59].mxu1 }
 0x920   : > { %v3698_v49 = vmax.f32 %v3661_v46, %v7584_v28 }
 0x921   : > { %v3710_v11 = vpack.c.bf16 %v3700_v62, %v3699_v20 }
 0x922   : > { %v3709_v17 = vpack.c.bf16 %v3698_v49, %v3697_v42 }
 0x924   : > { %5036 = vmatprep.mubr.bf16.mxu0 %v3709_v17 }
 0x925   : > { %5037 = vmatmul.mubr.bf16.gmra.mrb[72].mxu0 %v3710_v11 }
 0x944   : > { %v5030_v54 = vpop.f32.mrb[64].mxu0 }
 0x945   : > { %v3812_v9 = vpop.f32.mrb[65].mxu0 }
 0x946   : > { %v5031_v45 = vpop.f32.mrb[66].mxu0 }
 0x947   : > { %v3876_v37 = vpack.c.bf16 %v5031_v45, %v5030_v54  ;;  %v3815_v4 = vpop.f32.mrb[67].mxu0 }
 0x948   : > { %v3875_v15 = vpack.c.bf16 %v3815_v4, %v3812_v9 }
 0x94a   : > { %5060 = vmatprep.mubr.bf16.mxu1 %v3875_v15 }
 0x94b   : > { %5061 = vmatmul.mubr.bf16.vlgmr.msra.gmra.mrb[64].mxu1 %v3876_v37 }
 0x94c   : > { %5116 = vmatpush3.bf16.msra.mxu1 %v5322_v14 }
 0x94d   : > { %5109 = vmatprep.subr.bf16.mxu1 %v5323_v55 }
 0x950   : > { %5117 = vmatpush3.bf16.msra.mxu1 %v5323_v55 }
 0x974   : > { %v5010_v2 = vpop.f32.mrb[60].mxu1 }
 0x975   : > { %v3674_v47 = vpop.f32.mrb[61].mxu1  ;;  %v3703_v43 = vmax.f32 %v5010_v2, %v7584_v28 }
 0x976   : > { %v5011_v31 = vpop.f32.mrb[62].mxu1  ;;  %v3701_v26 = vmax.f32 %v3674_v47, %v7584_v28 }
 0x977   : > { %v3704_v41 = vmax.f32 %v5011_v31, %v7584_v28  ;;  %v3677_v51 = vpop.f32.mrb[63].mxu1 }
 0x978   : > { %v3702_v23 = vmax.f32 %v3677_v51, %v7584_v28  ;;  %v5324_v28 = vld [vmem:[#allocation2 + $0x290] sm:$0xff]  }
 0x979   : > { %v3712_v40 = vpack.c.bf16 %v3704_v41, %v3703_v43  ;;  %5080 = vmatprep.subr.bf16.mxu0 %v5324_v28  ;;  %5110 = vmatprep.subr.bf16.mxu1 %v5324_v28 }
 0x97a   : > { %v3711_v48 = vpack.c.bf16 %v3702_v23, %v3701_v26  ;;  %5081 = vmatpush3.bf16.msra.mxu0 %v5324_v28  ;;  %5118 = vmatpush3.bf16.msra.mxu1 %v5324_v28 }
 0x97b   : > { %5082 = vmatprep.subr.bf16.mxu0 %v5325_v12  ;;  %5111 = vmatprep.subr.bf16.mxu1 %v5325_v12 }
 0x97c   : > { %5040 = vmatprep.mubr.bf16.mxu0 %v3711_v48 }
 0x97d   : > { %5041 = vmatmul.mubr.bf16.gmra.mrb[76].mxu0 %v3712_v40 }
 0x97e   : > { %5083 = vmatpush3.bf16.msra.mxu0 %v5325_v12  ;;  %5119 = vmatpush3.bf16.msra.mxu1 %v5325_v12 }
 0x97f   : > { %5084 = vmatprep.subr.bf16.mxu0 %v5326_v0  ;;  %5112 = vmatprep.subr.bf16.mxu1 %v5326_v0 }
 0x982   : > { %5085 = vmatpush3.bf16.msra.mxu0 %v5326_v0  ;;  %5120 = vmatpush3.bf16.msra.mxu1 %v5326_v0 }
 0x983   : > { %5086 = vmatprep.subr.bf16.mxu0 %v5327_v34  ;;  %5113 = vmatprep.subr.bf16.mxu1 %v5327_v34 }
 0x986   : > { %5087 = vmatpush3.bf16.msra.mxu0 %v5327_v34  ;;  %5121 = vmatpush3.bf16.msra.mxu1 %v5327_v34 }
 0x987   : > { %5088 = vmatprep.subr.bf16.mxu0 %v5328_v19  ;;  %5114 = vmatprep.subr.bf16.mxu1 %v5328_v19 }
 0x98a   : > { %5089 = vmatpush3.bf16.msra.mxu0 %v5328_v19  ;;  %5122 = vmatpush3.bf16.msra.mxu1 %v5328_v19 }
 0x98b   : > { %5090 = vmatprep.subr.bf16.mxu0 %v5329_v60  ;;  %5115 = vmatprep.subr.bf16.mxu1 %v5329_v60 }
 0x98e   : > { %5091 = vmatpush3.bf16.msra.mxu0 %v5329_v60  ;;  %5123 = vmatpush3.bf16.msra.mxu1 %v5329_v60 }
 0x999   : > { %v5034_v5 = vpop.f32.mrb[68].mxu0 }
 0x99a   : > { %v3828_v30 = vpop.f32.mrb[69].mxu0 }
 0x99b   : > { %v5035_v3 = vpop.f32.mrb[70].mxu0 }
 0x99c   : > { %v3878_v63 = vpack.c.bf16 %v5035_v3, %v5034_v5  ;;  %v3831_v33 = vpop.f32.mrb[71].mxu0 }
 0x99d   : > { %v3877_v61 = vpack.c.bf16 %v3831_v33, %v3828_v30 }
 0x99f   : > { %5064 = vmatprep.mubr.bf16.mxu1 %v3877_v61 }
 0x9a0   : > { %5065 = vmatmul.mubr.bf16.gmra.mrb[68].mxu1 %v3878_v63 }
 0x9f8   : > { %v5038_v39 = vpop.f32.mrb[72].mxu0 }
 0x9f9   : > { %v3844_v24 = vpop.f32.mrb[73].mxu0 }
 0x9fa   : > { %v5039_v29 = vpop.f32.mrb[74].mxu0 }
 0x9fb   : > { %v3880_v52 = vpack.c.bf16 %v5039_v29, %v5038_v39  ;;  %v3847_v8 = vpop.f32.mrb[75].mxu0 }
 0x9fc   : > { %v3879_v53 = vpack.c.bf16 %v3847_v8, %v3844_v24 }
 0x9fe   : > { %5068 = vmatprep.mubr.bf16.mxu1 %v3879_v53 }
 0x9ff   : > { %5069 = vmatmul.mubr.bf16.gmra.mrb[72].mxu1 %v3880_v52 }
 0xa1e   : > { %v5062_v57 = vpop.f32.mrb[64].mxu1 }
 0xa1f   : > { %v3982_v25 = vpop.f32.mrb[65].mxu1  ;;  %v4047_v21 = vmax.f32 %v5062_v57, %v7770_v16 }
 0xa20   : > { %v5063_v6 = vpop.f32.mrb[66].mxu1  ;;  %v4045_v58 = vmax.f32 %v3982_v25, %v7770_v16 }
 0xa21   : > { %v4048_v32 = vmax.f32 %v5063_v6, %v7770_v16  ;;  %v3985_v56 = vpop.f32.mrb[67].mxu1 }
 0xa22   : > { %v4046_v1 = vmax.f32 %v3985_v56, %v7770_v16 }
 0xa23   : > { %v4062_v22 = vpack.c.bf16 %v4048_v32, %v4047_v21 }
 0xa24   : > { %v4061_v27 = vpack.c.bf16 %v4046_v1, %v4045_v58 }
 0xa26   : > { %5092 = vmatprep.mubr.bf16.mxu0 %v4061_v27 }
 0xa27   : > { %5093 = vmatmul.mubr.bf16.vlgmr.msra.gmra.mrb[80].mxu0 %v4062_v22 }
 0xa50   : > { %v5042_v44 = vpop.f32.mrb[76].mxu0 }
 0xa51   : > { %v3860_v59 = vpop.f32.mrb[77].mxu0 }
 0xa52   : > { %v5043_v13 = vpop.f32.mrb[78].mxu0 }
 0xa53   : > { %v3882_v38 = vpack.c.bf16 %v5043_v13, %v5042_v44  ;;  %v3863_v35 = vpop.f32.mrb[79].mxu0 }
 0xa54   : > { %v3881_v7 = vpack.c.bf16 %v3863_v35, %v3860_v59 }
 0xa56   : > { %5072 = vmatprep.mubr.bf16.mxu1 %v3881_v7 }
 0xa57   : > { %5073 = vmatmul.mubr.bf16.gmra.mrb[76].mxu1 %v3882_v38 }
 0xa73   : > { %v5066_v10 = vpop.f32.mrb[68].mxu1 }
 0xa74   : > { %v3998_v36 = vpop.f32.mrb[69].mxu1  ;;  %v4051_v20 = vmax.f32 %v5066_v10, %v7770_v16 }
 0xa75   : > { %v5067_v50 = vpop.f32.mrb[70].mxu1  ;;  %v4049_v42 = vmax.f32 %v3998_v36, %v7770_v16 }
 0xa76   : > { %v4052_v62 = vmax.f32 %v5067_v50, %v7770_v16  ;;  %v4001_v46 = vpop.f32.mrb[71].mxu1 }
 0xa77   : > { %v4050_v49 = vmax.f32 %v4001_v46, %v7770_v16 }
 0xa78   : > { %v4064_v11 = vpack.c.bf16 %v4052_v62, %v4051_v20 }
 0xa79   : > { %v4063_v17 = vpack.c.bf16 %v4050_v49, %v4049_v42 }
 0xa7b   : > { %5096 = vmatprep.mubr.bf16.mxu0 %v4063_v17 }
 0xa7c   : > { %5097 = vmatmul.mubr.bf16.gmra.mrb[84].mxu0 %v4064_v11 }
 0xad2   : > { %v5070_v54 = vpop.f32.mrb[72].mxu1 }
 0xad3   : > { %v4014_v9 = vpop.f32.mrb[73].mxu1  ;;  %v4055_v37 = vmax.f32 %v5070_v54, %v7770_v16 }
 0xad4   : > { %v5071_v45 = vpop.f32.mrb[74].mxu1  ;;  %v4053_v2 = vmax.f32 %v4014_v9, %v7770_v16 }
 0xad5   : > { %v4056_v4 = vmax.f32 %v5071_v45, %v7770_v16  ;;  %v4017_v15 = vpop.f32.mrb[75].mxu1 }
 0xad6   : > { %v4054_v47 = vmax.f32 %v4017_v15, %v7770_v16 }
 0xad7   : > { %v4066_v31 = vpack.c.bf16 %v4056_v4, %v4055_v37 }
 0xad8   : > { %v4065_v43 = vpack.c.bf16 %v4054_v47, %v4053_v2 }
 0xada   : > { %5100 = vmatprep.mubr.bf16.mxu1 %v4065_v43 }
 0xadb   : > { %5101 = vmatmul.mubr.bf16.vlgmr.msra.gmra.mrb[80].mxu1 %v4066_v31 }
 0xafa   : > { %v5094_v41 = vpop.f32.mrb[80].mxu0 }
 0xafb   : > { %v4233_v51 = vsub.f32 0.0, %v5094_v41  ;;  %v4168_v26 = vpop.f32.mrb[81].mxu0 }
 0xafc   : > { %v4231_v23 = vsub.f32 0.0, %v4168_v26  ;;  %v5095_v40 = vpop.f32.mrb[82].mxu0 }
 0xafd   : > { %v4251_v48 = vmul.f32 1.442695, %v4233_v51  ;;  %v4234_v5 = vsub.f32 0.0, %v5095_v40  ;;  %v4171_v30 = vpop.f32.mrb[83].mxu0 }
 0xafe   : > { %v4247_v3 = vmul.f32 1.442695, %v4231_v23  ;;  %v4232_v63 = vsub.f32 0.0, %v4171_v30 }
 0xaff   : > { %5394 = vpow2.f32 %v4251_v48  ;;  %v4253_v33 = vmul.f32 1.442695, %v4234_v5 }
 0xb00   : > { %5396 = vpow2.f32 %v4247_v3  ;;  %v4249_v61 = vmul.f32 1.442695, %v4232_v63 }
 0xb01   : > { %5398 = vpow2.f32 %v4253_v33 }
 0xb02   : > { %5400 = vpow2.f32 %v4249_v61 }
 0xb09   : > { %v5395_v14 = vpop.eup %5394 }
 0xb0a   : > { %v5397_v55 = vpop.eup %5396  ;;  %v4281_v28 = vadd.f32 1.0, %v5395_v14 }
 0xb0b   : > { %v5399_v12 = vpop.eup %5398  ;;  %v4279_v0 = vadd.f32 1.0, %v5397_v55 }
 0xb0c   : > { %v5401_v34 = vpop.eup %5400  ;;  %5402 = vrcp.f32 %v4281_v28  ;;  %v4282_v19 = vadd.f32 1.0, %v5399_v12 }
 0xb0d   : > { %5404 = vrcp.f32 %v4279_v0  ;;  %v4280_v60 = vadd.f32 1.0, %v5401_v34 }
 0xb0e   : > { %5406 = vrcp.f32 %v4282_v19 }
 0xb0f   : > { %5408 = vrcp.f32 %v4280_v60 }
 0xb16   : > { %v5403_v39 = vpop.eup %5402 }
 0xb17   : > { %v5405_v24 = vpop.eup %5404  ;;  %v4316_v29 = vsel %vm4311_vm15, %v5403_v39, %v5094_v41 }
 0xb18   : > { %v5407_v52 = vpop.eup %5406  ;;  %4333 = vst.msk [vmem:[%s7790_s14 + $0x10] sm:$0xff] %vm4330_vm0, %v4316_v29  ;;  %v4314_v8 = vsel %vm4311_vm15, %v5405_v24, %v4168_v26 }
 0xb19   : > { %v5409_v53 = vpop.eup %5408  ;;  %4331 = vst.msk [vmem:[%s7790_s14] sm:$0xff] %vm4330_vm0, %v4314_v8  ;;  %v4317_v57 = vsel %vm4311_vm15, %v5407_v52, %v5095_v40 }
 0xb1a   : > { %4334 = vst.msk [vmem:[%s7790_s14 + $0x18] sm:$0xff] %vm4330_vm0, %v4317_v57  ;;  %v4315_v25 = vsel %vm4311_vm15, %v5409_v53, %v4171_v30 }
 0xb1b   : > { %4332 = vst.msk [vmem:[%s7790_s14 + $0x8] sm:$0xff] %vm4330_vm0, %v4315_v25 }
 0xb2a   : > { %v5074_v6 = vpop.f32.mrb[76].mxu1 }
 0xb2b   : > { %v4030_v21 = vpop.f32.mrb[77].mxu1  ;;  %v4059_v56 = vmax.f32 %v5074_v6, %v7770_v16 }
 0xb2c   : > { %v5075_v32 = vpop.f32.mrb[78].mxu1  ;;  %v4057_v22 = vmax.f32 %v4030_v21, %v7770_v16 }
 0xb2d   : > { %v4060_v58 = vmax.f32 %v5075_v32, %v7770_v16  ;;  %v4033_v1 = vpop.f32.mrb[79].mxu1 }
 0xb2e   : > { %v4058_v27 = vmax.f32 %v4033_v1, %v7770_v16 }
 0xb2f   : > { %v4068_v44 = vpack.c.bf16 %v4060_v58, %v4059_v56 }
 0xb30   : > { %v4067_v59 = vpack.c.bf16 %v4058_v27, %v4057_v22 }
 0xb32   : > { %5104 = vmatprep.mubr.bf16.mxu1 %v4067_v59 }
 0xb33   : > { %5105 = vmatmul.mubr.bf16.gmra.mrb[84].mxu1 %v4068_v44 }
 0xb4f   : > { %v5098_v13 = vpop.f32.mrb[84].mxu0 }
 0xb50   : > { %v4237_v38 = vsub.f32 0.0, %v5098_v13  ;;  %v4184_v35 = vpop.f32.mrb[85].mxu0 }
 0xb51   : > { %v4235_v7 = vsub.f32 0.0, %v4184_v35  ;;  %v5099_v10 = vpop.f32.mrb[86].mxu0 }
 0xb52   : > { %v4259_v36 = vmul.f32 1.442695, %v4237_v38  ;;  %v4238_v50 = vsub.f32 0.0, %v5099_v10  ;;  %v4187_v20 = vpop.f32.mrb[87].mxu0 }
 0xb53   : > { %v4255_v62 = vmul.f32 1.442695, %v4235_v7  ;;  %v4236_v46 = vsub.f32 0.0, %v4187_v20 }
 0xb54   : > { %5410 = vpow2.f32 %v4259_v36  ;;  %v4261_v42 = vmul.f32 1.442695, %v4238_v50 }
 0xb55   : > { %5412 = vpow2.f32 %v4255_v62  ;;  %v4257_v49 = vmul.f32 1.442695, %v4236_v46 }
 0xb56   : > { %5414 = vpow2.f32 %v4261_v42 }
 0xb57   : > { %5416 = vpow2.f32 %v4257_v49 }
 0xb5e   : > { %v5411_v16 = vpop.eup %5410 }
 0xb5f   : > { %v5413_v11 = vpop.eup %5412  ;;  %v4285_v17 = vadd.f32 1.0, %v5411_v16 }
 0xb60   : > { %v5415_v54 = vpop.eup %5414  ;;  %v4283_v9 = vadd.f32 1.0, %v5413_v11 }
 0xb61   : > { %v5417_v45 = vpop.eup %5416  ;;  %5418 = vrcp.f32 %v4285_v17  ;;  %v4286_v37 = vadd.f32 1.0, %v5415_v54 }
 0xb62   : > { %5420 = vrcp.f32 %v4283_v9  ;;  %v4284_v4 = vadd.f32 1.0, %v5417_v45 }
 0xb63   : > { %5422 = vrcp.f32 %v4286_v37 }
 0xb64   : > { %5424 = vrcp.f32 %v4284_v4 }
 0xb6b   : > { %v5419_v15 = vpop.eup %5418 }
 0xb6c   : > { %v5421_v2 = vpop.eup %5420  ;;  %v4320_v47 = vsel %vm4311_vm15, %v5419_v15, %v5098_v13 }
 0xb6d   : > { %v5423_v31 = vpop.eup %5422  ;;  %4337 = vst.msk [vmem:[%s7790_s14 + $0x30] sm:$0xff] %vm4330_vm0, %v4320_v47  ;;  %v4318_v43 = vsel %vm4311_vm15, %v5421_v2, %v4184_v35 }
 0xb6e   : > { %v5425_v41 = vpop.eup %5424  ;;  %4335 = vst.msk [vmem:[%s7790_s14 + $0x20] sm:$0xff] %vm4330_vm0, %v4318_v43  ;;  %v4321_v51 = vsel %vm4311_vm15, %v5423_v31, %v5099_v10 }
 0xb6f   : > { %4338 = vst.msk [vmem:[%s7790_s14 + $0x38] sm:$0xff] %vm4330_vm0, %v4321_v51  ;;  %v4319_v26 = vsel %vm4311_vm15, %v5425_v41, %v4187_v20 }
 0xb70   : > { %4336 = vst.msk [vmem:[%s7790_s14 + $0x28] sm:$0xff] %vm4330_vm0, %v4319_v26 }
 0xbae   : > { %v5102_v23 = vpop.f32.mrb[80].mxu1 }
 0xbaf   : > { %v4241_v40 = vsub.f32 0.0, %v5102_v23  ;;  %v4200_v48 = vpop.f32.mrb[81].mxu1 }
 0xbb0   : > { %v4239_v5 = vsub.f32 0.0, %v4200_v48  ;;  %v5103_v30 = vpop.f32.mrb[82].mxu1 }
 0xbb1   : > { %v4267_v3 = vmul.f32 1.442695, %v4241_v40  ;;  %v4242_v63 = vsub.f32 0.0, %v5103_v30  ;;  %v4203_v33 = vpop.f32.mrb[83].mxu1 }
 0xbb2   : > { %v4263_v61 = vmul.f32 1.442695, %v4239_v5  ;;  %v4240_v14 = vsub.f32 0.0, %v4203_v33 }
 0xbb3   : > { %5426 = vpow2.f32 %v4267_v3  ;;  %v4269_v55 = vmul.f32 1.442695, %v4242_v63 }
 0xbb4   : > { %5428 = vpow2.f32 %v4263_v61  ;;  %v4265_v28 = vmul.f32 1.442695, %v4240_v14 }
 0xbb5   : > { %5430 = vpow2.f32 %v4269_v55 }
 0xbb6   : > { %5432 = vpow2.f32 %v4265_v28 }
 0xbbd   : > { %v5427_v12 = vpop.eup %5426 }
 0xbbe   : > { %v5429_v0 = vpop.eup %5428  ;;  %v4289_v34 = vadd.f32 1.0, %v5427_v12 }
 0xbbf   : > { %v5431_v19 = vpop.eup %5430  ;;  %v4287_v60 = vadd.f32 1.0, %v5429_v0 }
 0xbc0   : > { %v5433_v39 = vpop.eup %5432  ;;  %5434 = vrcp.f32 %v4289_v34  ;;  %v4290_v24 = vadd.f32 1.0, %v5431_v19 }
 0xbc1   : > { %5436 = vrcp.f32 %v4287_v60  ;;  %v4288_v29 = vadd.f32 1.0, %v5433_v39 }
 0xbc2   : > { %5438 = vrcp.f32 %v4290_v24 }
 0xbc3   : > { %5440 = vrcp.f32 %v4288_v29 }
 0xbca   : > { %v5435_v52 = vpop.eup %5434 }
 0xbcb   : > { %v5437_v8 = vpop.eup %5436  ;;  %v4324_v53 = vsel %vm4311_vm15, %v5435_v52, %v5102_v23 }
 0xbcc   : > { %v5439_v57 = vpop.eup %5438  ;;  %4341 = vst.msk [vmem:[%s7790_s14 + $0x50] sm:$0xff] %vm4330_vm0, %v4324_v53  ;;  %v4322_v25 = vsel %vm4311_vm15, %v5437_v8, %v4200_v48 }
 0xbcd   : > { %v5441_v6 = vpop.eup %5440  ;;  %4339 = vst.msk [vmem:[%s7790_s14 + $0x40] sm:$0xff] %vm4330_vm0, %v4322_v25  ;;  %v4325_v21 = vsel %vm4311_vm15, %v5439_v57, %v5103_v30 }
 0xbce   : > { %4342 = vst.msk [vmem:[%s7790_s14 + $0x58] sm:$0xff] %vm4330_vm0, %v4325_v21  ;;  %v4323_v32 = vsel %vm4311_vm15, %v5441_v6, %v4203_v33 }
 0xbcf   : > { %4340 = vst.msk [vmem:[%s7790_s14 + $0x48] sm:$0xff] %vm4330_vm0, %v4323_v32 }
 0xc06   : > { %v5106_v56 = vpop.f32.mrb[84].mxu1 }
 0xc07   : > { %v4245_v58 = vsub.f32 0.0, %v5106_v56  ;;  %v4216_v1 = vpop.f32.mrb[85].mxu1 }
 0xc08   : > { %v4243_v22 = vsub.f32 0.0, %v4216_v1  ;;  %v5107_v27 = vpop.f32.mrb[86].mxu1 }
 0xc09   : > { %v4275_v44 = vmul.f32 1.442695, %v4245_v58  ;;  %v4246_v59 = vsub.f32 0.0, %v5107_v27  ;;  %v4219_v13 = vpop.f32.mrb[87].mxu1 }
 0xc0a   : > { %v4271_v38 = vmul.f32 1.442695, %v4243_v22  ;;  %v4244_v35 = vsub.f32 0.0, %v4219_v13 }
 0xc0b   : > { %5442 = vpow2.f32 %v4275_v44  ;;  %v4277_v7 = vmul.f32 1.442695, %v4246_v59 }
 0xc0c   : > { %5444 = vpow2.f32 %v4271_v38  ;;  %v4273_v10 = vmul.f32 1.442695, %v4244_v35 }
 0xc0d   : > { %5446 = vpow2.f32 %v4277_v7 }
 0xc0e   : > { %5448 = vpow2.f32 %v4273_v10 }
 0xc15   : > { %v5443_v36 = vpop.eup %5442 }
 0xc16   : > { %v5445_v50 = vpop.eup %5444  ;;  %v4293_v20 = vadd.f32 1.0, %v5443_v36 }
 0xc17   : > { %v5447_v62 = vpop.eup %5446  ;;  %v4291_v46 = vadd.f32 1.0, %v5445_v50 }
 0xc18   : > { %v5449_v42 = vpop.eup %5448  ;;  %5450 = vrcp.f32 %v4293_v20  ;;  %v4294_v49 = vadd.f32 1.0, %v5447_v62 }
 0xc19   : > { %5452 = vrcp.f32 %v4291_v46  ;;  %v4292_v16 = vadd.f32 1.0, %v5449_v42 }
 0xc1a   : > { %5454 = vrcp.f32 %v4294_v49 }
 0xc1b   : > { %5456 = vrcp.f32 %v4292_v16 }
 0xc22   : > { %v5451_v11 = vpop.eup %5450 }
 0xc23   : > { %v5453_v17 = vpop.eup %5452  ;;  %v4328_v54 = vsel %vm4311_vm15, %v5451_v11, %v5106_v56 }
 0xc24   : > { %v5455_v9 = vpop.eup %5454  ;;  %4345 = vst.msk [vmem:[%s7790_s14 + $0x70] sm:$0xff] %vm4330_vm0, %v4328_v54  ;;  %v4326_v45 = vsel %vm4311_vm15, %v5453_v17, %v4216_v1 }
 0xc25   : > { %v5457_v37 = vpop.eup %5456  ;;  %4343 = vst.msk [vmem:[%s7790_s14 + $0x60] sm:$0xff] %vm4330_vm0, %v4326_v45  ;;  %v4329_v4 = vsel %vm4311_vm15, %v5455_v9, %v5107_v27 }
 0xc26   : > { %4346 = vst.msk [vmem:[%s7790_s14 + $0x78] sm:$0xff] %vm4330_vm0, %v4329_v4  ;;  %v4327_v15 = vsel %vm4311_vm15, %v5457_v37, %v4219_v13 }
 0xc27   : > { %4344 = vst.msk [vmem:[%s7790_s14 + $0x68] sm:$0xff] %vm4330_vm0, %v4327_v15 }
 0xc28 PF: > { %s14_s12 = sadd.s32 1, %s5496_s12  }
 0xc29   : > { %p11_p3 = scmp.ge.s32.totalorder %s14_s12, 4  }
 0xc2b   :  { %13 = sbr.rel (!%p11_p3) target bundleno = 1 (0x1), region = 77 }
 0xc32   :  { %4369 = vsyncpa [#allocation3], 1 }
 0xc33   :  { %4371 = vsyncpa [#allocation3 + $0x1], 1 }

</bundles_post_ra>
